<compile_context>
chip_gen: v6e
topology: v6e:2x2x1
jax: 0.10.0
libtpu: 0.0.40
codegen_flags: <defaults>
</compile_context>

<pallas_src>
import functools

import jax
import jax.numpy as jnp
from jax import lax
from jax.experimental import pallas as pl
from jax.experimental.pallas import tpu as pltpu

LAYNORM_EPS = 1e-12   # matches `laynorm_eps` in the reference module
TAU = 1.2
SCALE = 0.125


# ------------------------------ tiling helpers -----------------------------

def _pick_row_tile(n, cap=256):
    """Largest row tile <= cap that divides n (prefer multiples of 8).

    cap should be tuned per generation (v7x has 64 MiB VMEM vs 128 MiB on v5e/v6e);
    256 rows x full feature width is comfortably inside the default scoped VMEM
    for the hidden sizes this module uses.
    """
    if n <= cap:
        return n
    for t in (256, 128, 64, 32, 16, 8):
        if t <= cap and n % t == 0:
            return t
    return n


def _pick_group(n, cap=16):
    """Largest divisor of n that is <= cap (attention (t,b)-group batching)."""
    g = 1
    for t in range(1, min(n, cap) + 1):
        if n % t == 0:
            g = t
    return g


# ----------------------- fused Linear + LN + LIF kernel ---------------------

def _lin_ln_lif_body(x_ref, w_ref, b_ref, g_ref, beta_ref, o_ref, res_ref, *,
                     n_chunks, eps, tau, v_th):
    # x_ref: (T, tn, Din) ; w_ref: (Din, Dout) ; o_ref: (T, tn, Dout)
    T, tn, Din = x_ref.shape
    Dout = w_ref.shape[1]
    chunk = Dout // n_chunks

    # Single big matmul over all T*tn rows (weight stays resident across the grid).
    y = jnp.dot(x_ref[...].reshape(T * tn, Din), w_ref[...],
                preferred_element_type=jnp.float32) + b_ref[...]

    # Per-chunk LayerNorm (chunks = the q/k/v slices of the fused QKV projection;
    # they share gamma/beta, so g_ref/beta_ref are pre-tiled to (1, Dout)).
    parts = []
    for c in range(n_chunks):
        yc = y[:, c * chunk:(c + 1) * chunk]
        mu = jnp.mean(yc, axis=-1, keepdims=True)
        var = jnp.mean((yc - mu) ** 2, axis=-1, keepdims=True)
        parts.append((yc - mu) * lax.rsqrt(var + eps))
    yn = parts[0] if n_chunks == 1 else jnp.concatenate(parts, axis=-1)
    yn = (yn * g_ref[...] + beta_ref[...]).reshape(T, tn, Dout)

    # Multi-step LIF (spikingjelly MultiStepLIFNode: decay_input=True, v_reset=0,
    # hard reset). Membrane carried across the unrolled T loop for this row tile.
    v = jnp.zeros((tn, Dout), jnp.float32)
    inv_tau = 1.0 / tau
    for t in range(T):
        v = v + (yn[t] - v) * inv_tau
        s = (v >= v_th).astype(jnp.float32)
        o_ref[t] = s if res_ref is None else res_ref[t] + s
        v = v * (1.0 - s)


def _linear_ln_lif_kernel(x_ref, w_ref, b_ref, g_ref, beta_ref, o_ref, *,
                          n_chunks, eps, tau, v_th):
    _lin_ln_lif_body(x_ref, w_ref, b_ref, g_ref, beta_ref, o_ref, None,
                     n_chunks=n_chunks, eps=eps, tau=tau, v_th=v_th)


def _linear_ln_lif_res_kernel(x_ref, w_ref, b_ref, g_ref, beta_ref, res_ref,
                              o_ref, *, n_chunks, eps, tau, v_th):
    _lin_ln_lif_body(x_ref, w_ref, b_ref, g_ref, beta_ref, o_ref, res_ref,
                     n_chunks=n_chunks, eps=eps, tau=tau, v_th=v_th)


def linear_ln_lif(x, w, b, g, beta, *, n_chunks=1, v_th=1.0, residual=None,
                  eps=LAYNORM_EPS, tau=TAU):
    """Fused Linear + (per-chunk) LayerNorm + multi-step LIF (+ optional residual).

    x: (T, N, Din) -> spikes (T, N, Dout). Grid is parallel over N row tiles; the
    LIF membrane evolves over T inside the kernel.
    """
    T, N, Din = x.shape
    Dout = w.shape[1]
    tn = _pick_row_tile(N)

    w_spec = pl.BlockSpec((Din, Dout), lambda n: (0, 0))
    vec_spec = pl.BlockSpec((1, Dout), lambda n: (0, 0))
    act_in_spec = pl.BlockSpec((T, tn, Din), lambda n: (0, n, 0))
    act_out_spec = pl.BlockSpec((T, tn, Dout), lambda n: (0, n, 0))

    args = [x, w, b.reshape(1, -1), g.reshape(1, -1), beta.reshape(1, -1)]
    in_specs = [act_in_spec, w_spec, vec_spec, vec_spec, vec_spec]
    if residual is None:
        kernel = functools.partial(_linear_ln_lif_kernel, n_chunks=n_chunks,
                                   eps=eps, tau=tau, v_th=v_th)
    else:
        kernel = functools.partial(_linear_ln_lif_res_kernel, n_chunks=n_chunks,
                                   eps=eps, tau=tau, v_th=v_th)
        args.append(residual)
        in_specs.append(act_out_spec)

    return pl.pallas_call(
        kernel,
        out_shape=jax.ShapeDtypeStruct((T, N, Dout), jnp.float32),
        grid=(N // tn,),
        in_specs=in_specs,
        out_specs=act_out_spec,
        compiler_params=pltpu.CompilerParams(dimension_semantics=("parallel",)),
    )(*args)


# ------------------------------ attention kernel ---------------------------

def _attn_kernel(qkv_ref, o_ref, *, D, H, scale):
    # qkv_ref: (G, L, 3D) packed q|k|v spikes for G (t,b) pairs.
    G, L, _ = qkv_ref.shape
    Dh = D // H
    qkv = qkv_ref[...]
    row = lax.broadcasted_iota(jnp.int32, (L, L), 0)
    col = lax.broadcasted_iota(jnp.int32, (L, L), 1)
    keep = (col <= row)[None]                         # causal tril, (1, L, L)
    outs = []
    for h in range(H):
        q = qkv[:, :, h * Dh:(h + 1) * Dh]
        k = qkv[:, :, D + h * Dh:D + (h + 1) * Dh]
        v = qkv[:, :, 2 * D + h * Dh:2 * D + (h + 1) * Dh]
        s = jnp.einsum("gld,gmd->glm", q, k,
                       preferred_element_type=jnp.float32) * scale
        s = jnp.where(keep, s, 0.0)                   # masked_fill(mask==0, 0); no softmax
        outs.append(jnp.einsum("glm,gmd->gld", s, v,
                               preferred_element_type=jnp.float32))
    # Concatenating heads along the last axis == transpose(2,3).flatten(-2,-1).
    o_ref[...] = jnp.concatenate(outs, axis=-1)


def masked_attn(qkv, *, D, num_heads, scale=SCALE):
    """qkv: (T*B, L, 3D) packed spikes -> attn@v reassembled as (T*B, L, D)."""
    TB, L, D3 = qkv.shape
    G = _pick_group(TB)
    return pl.pallas_call(
        functools.partial(_attn_kernel, D=D, H=num_heads, scale=scale),
        out_shape=jax.ShapeDtypeStruct((TB, L, D), jnp.float32),
        grid=(TB // G,),
        in_specs=[pl.BlockSpec((G, L, D3), lambda i: (i, 0, 0))],
        out_specs=pl.BlockSpec((G, L, D), lambda i: (i, 0, 0)),
        compiler_params=pltpu.CompilerParams(dimension_semantics=("parallel",)),
    )(qkv)


# --------------------- SSA output: fc + ln2 + chained attn_lif --------------

def _ssa_out_kernel(av_ref, res_ref, w_ref, b_ref, g_ref, beta_ref, o_ref, *,
                    eps, tau, v_th):
    T, tn, D = av_ref.shape
    av = av_ref[...]
    y = jnp.dot(av.reshape(T * tn, D), w_ref[...],
                preferred_element_type=jnp.float32) + b_ref[...]
    mu = jnp.mean(y, axis=-1, keepdims=True)
    var = jnp.mean((y - mu) ** 2, axis=-1, keepdims=True)
    y2 = ((y - mu) * lax.rsqrt(var + eps) * g_ref[...] + beta_ref[...]
          ).reshape(T, tn, D)

    # attn_lif is STATEFUL and called twice in the PyTorch forward: first on
    # attn@v (its spikes are discarded -> only the membrane matters), then on
    # ln2(fc(attn@v)). Chain the membrane through both passes in-register and
    # emit spikes only for the second pass; no concat / discarded HBM traffic.
    inv_tau = 1.0 / tau
    v = jnp.zeros((tn, D), jnp.float32)
    for t in range(T):                                # pass 1: membrane only
        v = v + (av[t] - v) * inv_tau
        s = (v >= v_th).astype(jnp.float32)
        v = v * (1.0 - s)
    for t in range(T):                                # pass 2: spikes + residual
        v = v + (y2[t] - v) * inv_tau
        s = (v >= v_th).astype(jnp.float32)
        o_ref[t] = res_ref[t] + s                     # fused x + SSA(x)
        v = v * (1.0 - s)


def ssa_out(av, res, w, b, g, beta, *, v_th=0.5, eps=LAYNORM_EPS, tau=TAU):
    T, N, D = av.shape
    tn = _pick_row_tile(N)
    act_spec = pl.BlockSpec((T, tn, D), lambda n: (0, n, 0))
    vec_spec = pl.BlockSpec((1, D), lambda n: (0, 0))
    return pl.pallas_call(
        functools.partial(_ssa_out_kernel, eps=eps, tau=tau, v_th=v_th),
        out_shape=jax.ShapeDtypeStruct((T, N, D), jnp.float32),
        grid=(N // tn,),
        in_specs=[act_spec, act_spec,
                  pl.BlockSpec((D, D), lambda n: (0, 0)),
                  vec_spec, vec_spec, vec_spec],
        out_specs=act_spec,
        compiler_params=pltpu.CompilerParams(dimension_semantics=("parallel",)),
    )(av, res, w, b.reshape(1, -1), g.reshape(1, -1), beta.reshape(1, -1))


# ------------------------------ Block forward -------------------------------

def block_forward(x, params, num_heads):
    """Pallas-fused forward of Block: x + SSA(x), then + MLP(...)."""
    T, B, L, D = x.shape
    N = B * L
    pa, pm = params["attn"], params["mlp"]
    x3 = x.reshape(T, N, D)

    # ---- SSA ----
    qkv = linear_ln_lif(
        x3, pa["qkv_w"], pa["qkv_b"],
        jnp.tile(pa["ln_g"], 3), jnp.tile(pa["ln_b"], 3),
        n_chunks=3, v_th=1.0)                                  # (T, N, 3D) spikes
    av = masked_attn(qkv.reshape(T * B, L, 3 * D), D=D, num_heads=num_heads)
    x1 = ssa_out(av.reshape(T, N, D), x3, pa["fc_w"], pa["fc_b"],
                 pa["ln2_g"], pa["ln2_b"], v_th=0.5)           # x + SSA(x)

    # ---- MLP ----
    h = linear_ln_lif(x1, pm["fc1_w"], pm["fc1_b"], pm["ln1_g"], pm["ln1_b"],
                      n_chunks=1, v_th=1.0)                    # (T, N, 4D) spikes
    x2 = linear_ln_lif(h, pm["fc2_w"], pm["fc2_b"], pm["ln2_g"], pm["ln2_b"],
                       n_chunks=1, v_th=1.0, residual=x1)      # x1 + MLP(x1)
    return x2.reshape(T, B, L, D)


# ------------------------- pure-JAX reference path --------------------------

def _linear_ln_ref(x, w, b, g, beta, eps=LAYNORM_EPS):
    y = jnp.dot(x, w, precision=lax.Precision.HIGHEST) + b
    mu = jnp.mean(y, -1, keepdims=True)
    var = jnp.mean((y - mu) ** 2, -1, keepdims=True)
    return (y - mu) * lax.rsqrt(var + eps) * g + beta


def _lif_ref(x, tau=TAU, v_th=1.0):
    def step(v, xt):
        v = v + (xt - v) * (1.0 / tau)
        s = (v >= v_th).astype(jnp.float32)
        return v * (1.0 - s), s
    _, spikes = lax.scan(step, jnp.zeros_like(x[0]), x)
    return spikes


def ssa_forward_ref(x, p, H):
    T, B, L, D = x.shape
    Dh = D // H
    xf = x.reshape(T * B * L, D)
    w, b, g, be = p["qkv_w"], p["qkv_b"], p["ln_g"], p["ln_b"]
    q = _linear_ln_ref(xf, w[:, 0 * D:1 * D], b[0 * D:1 * D], g, be)
    k = _linear_ln_ref(xf, w[:, 1 * D:2 * D], b[1 * D:2 * D], g, be)
    v = _linear_ln_ref(xf, w[:, 2 * D:3 * D], b[2 * D:3 * D], g, be)
    q = _lif_ref(q.reshape(T, B * L, D), TAU, 1.0)
    k = _lif_ref(k.reshape(T, B * L, D), TAU, 1.0)
    v = _lif_ref(v.reshape(T, B * L, D), TAU, 1.0)

    def heads(t):
        return t.reshape(T, B, L, H, Dh).transpose(0, 1, 3, 2, 4)

    qh, kh, vh = heads(q), heads(k), heads(v)
    s = jnp.einsum("tbhld,tbhmd->tbhlm", qh, kh,
                   precision=lax.Precision.HIGHEST) * SCALE
    mask = jnp.tril(jnp.ones((L, L), jnp.float32))
    s = jnp.where(mask == 0, 0.0, s)
    av = jnp.einsum("tbhlm,tbhmd->tbhld", s, vh, precision=lax.Precision.HIGHEST)
    av = av.transpose(0, 1, 3, 2, 4).reshape(T, B, L, D)
    y2 = _linear_ln_ref(av.reshape(-1, D), p["fc_w"], p["fc_b"],
                        p["ln2_g"], p["ln2_b"]).reshape(T, B, L, D)
    # attn_lif is stateful and called twice (first on attn@v, then on ln2(fc(.)));
    # chain the two calls by concatenating along time, keep the second half.
    chain = jnp.concatenate(
        [av.reshape(T, B * L, D), y2.reshape(T, B * L, D)], axis=0)
    out = _lif_ref(chain, TAU, 0.5)[T:]
    return out.reshape(T, B, L, D)


def mlp_forward_ref(x, p):
    T, B, L, D = x.shape
    h = _linear_ln_ref(x.reshape(-1, D), p["fc1_w"], p["fc1_b"],
                       p["ln1_g"], p["ln1_b"])
    h = _lif_ref(h.reshape(T, B * L, 4 * D), TAU, 1.0)
    o = _linear_ln_ref(h.reshape(-1, 4 * D), p["fc2_w"], p["fc2_b"],
                       p["ln2_g"], p["ln2_b"])
    o = _lif_ref(o.reshape(T, B * L, D), TAU, 1.0)
    return o.reshape(T, B, L, D)


def block_forward_ref(x, params, H):
    x = x + ssa_forward_ref(x, params["attn"], H)
    x = x + mlp_forward_ref(x, params["mlp"])
    return x


# --------------------------------- params ----------------------------------

def init_params(key, D):
    ks = jax.random.split(key, 8)

    def w(k, shape, s=0.02):
        return jax.random.normal(k, shape, jnp.float32) * s

    attn = dict(
        qkv_w=w(ks[0], (D, 3 * D)), qkv_b=w(ks[1], (3 * D,)),
        ln_g=jnp.ones((D,), jnp.float32), ln_b=jnp.zeros((D,), jnp.float32),
        fc_w=w(ks[2], (D, D)), fc_b=w(ks[3], (D,)),
        ln2_g=jnp.ones((D,), jnp.float32), ln2_b=jnp.zeros((D,), jnp.float32),
    )
    mlp = dict(
        fc1_w=w(ks[4], (D, 4 * D)), fc1_b=w(ks[5], (4 * D,)),
        ln1_g=jnp.ones((4 * D,), jnp.float32), ln1_b=jnp.zeros((4 * D,), jnp.float32),
        fc2_w=w(ks[6], (4 * D, D)), fc2_b=w(ks[7], (D,)),
        ln2_g=jnp.ones((D,), jnp.float32), ln2_b=jnp.zeros((D,), jnp.float32),
    )
    return {"attn": attn, "mlp": mlp}


if __name__ == "__main__":
    # config: hidden_dim=32, num_heads=4, block_size=L=8; T=4 time steps, B=2.
    T, B, L, D, H = 4, 2, 8, 32, 4
    key = jax.random.PRNGKey(0)
    kp, kx = jax.random.split(key)
    params = init_params(kp, D)
    x = jax.random.normal(kx, (T, B, L, D), jnp.float32)

    fwd = jax.jit(block_forward, static_argnums=(2,))
    out = jax.block_until_ready(fwd(x, params, H))
    ref = jax.block_until_ready(block_forward_ref(x, params, H))

    assert out.shape == (T, B, L, D)
    # tolerate a tiny fraction of spike flips from matmul rounding at the threshold
    mismatch = float(jnp.mean((jnp.abs(out - ref) > 1e-3).astype(jnp.float32)))
    assert mismatch < 0.01, f"mismatch fraction {mismatch}"
    print("KERNEL_OK")
</pallas_src>

<mosaic_0001>
module attributes {stable_mosaic.version = 11 : i64} {
  func.func @_linear_ln_lif_kernel(%arg0: i32, %arg1: memref<4x16x32xf32, #tpu.memory_space<vmem>>, %arg2: memref<32x96xf32, #tpu.memory_space<vmem>>, %arg3: memref<1x96xf32, #tpu.memory_space<vmem>>, %arg4: memref<1x96xf32, #tpu.memory_space<vmem>>, %arg5: memref<1x96xf32, #tpu.memory_space<vmem>>, %arg6: memref<4x16x96xf32, #tpu.memory_space<vmem>>) attributes {dimension_semantics = [#tpu.dimension_semantics<parallel>], iteration_bounds = array<i64: 1>, scalar_prefetch = 0 : i64, scratch_operands = 0 : i64, tpu.core_type = #tpu.core_type<tc>, window_params = [{transform_indices = @transform_0, window_bounds = array<i64: 4, 16, 32>}, {pipeline_mode = #tpu.pipeline_mode<synchronous>, transform_indices = @transform_1, window_bounds = array<i64: 32, 96>}, {pipeline_mode = #tpu.pipeline_mode<synchronous>, transform_indices = @transform_2, window_bounds = array<i64: 1, 96>}, {pipeline_mode = #tpu.pipeline_mode<synchronous>, transform_indices = @transform_3, window_bounds = array<i64: 1, 96>}, {pipeline_mode = #tpu.pipeline_mode<synchronous>, transform_indices = @transform_4, window_bounds = array<i64: 1, 96>}, {transform_indices = @transform_5, window_bounds = array<i64: 4, 16, 96>}]} {
    %c0 = arith.constant 0 : index
    %c0_0 = arith.constant 0 : index
    %c0_1 = arith.constant 0 : index
    %0 = vector.load %arg1[%c0, %c0_0, %c0_1] : memref<4x16x32xf32, #tpu.memory_space<vmem>>, vector<4x16x32xf32>
    %1 = vector.shape_cast %0 : vector<4x16x32xf32> to vector<64x32xf32>
    %c0_2 = arith.constant 0 : index
    %c0_3 = arith.constant 0 : index
    %2 = vector.load %arg2[%c0_2, %c0_3] : memref<32x96xf32, #tpu.memory_space<vmem>>, vector<32x96xf32>
    %cst = arith.constant dense<0.000000e+00> : vector<64x96xf32>
    %3 = tpu.matmul %1, %2, %cst {dimension_numbers = #tpu.dot_dimension_numbers<[1], [0], [0], [1], [0, 0, 1, 1], [], []>} : vector<64x32xf32>, vector<32x96xf32>, vector<64x96xf32> -> vector<64x96xf32>
    %c0_4 = arith.constant 0 : index
    %c0_5 = arith.constant 0 : index
    %4 = vector.load %arg3[%c0_4, %c0_5] : memref<1x96xf32, #tpu.memory_space<vmem>>, vector<1x96xf32>
    %5 = vector.broadcast %4 : vector<1x96xf32> to vector<64x96xf32>
    %6 = arith.addf %3, %5 : vector<64x96xf32>
    %7 = vector.extract_strided_slice %6 {offsets = [0, 0], sizes = [64, 32], strides = [1, 1]} : vector<64x96xf32> to vector<64x32xf32>
    %cst_6 = arith.constant dense<0.000000e+00> : vector<64xf32>
    %8 = vector.multi_reduction <add>, %7, %cst_6 [1] : vector<64x32xf32> to vector<64xf32>
    %9 = vector.shape_cast %8 : vector<64xf32> to vector<64x1xf32>
    %cst_7 = arith.constant 3.200000e+01 : f32
    %10 = vector.broadcast %cst_7 : f32 to vector<64x1xf32>
    %11 = arith.divf %9, %10 : vector<64x1xf32>
    %12 = vector.broadcast %11 : vector<64x1xf32> to vector<64x32xf32>
    %13 = arith.subf %7, %12 : vector<64x32xf32>
    %14 = arith.mulf %13, %13 : vector<64x32xf32>
    %cst_8 = arith.constant dense<0.000000e+00> : vector<64xf32>
    %15 = vector.multi_reduction <add>, %14, %cst_8 [1] : vector<64x32xf32> to vector<64xf32>
    %16 = vector.shape_cast %15 : vector<64xf32> to vector<64x1xf32>
    %cst_9 = arith.constant 3.200000e+01 : f32
    %17 = vector.broadcast %cst_9 : f32 to vector<64x1xf32>
    %18 = arith.divf %16, %17 : vector<64x1xf32>
    %19 = vector.broadcast %11 : vector<64x1xf32> to vector<64x32xf32>
    %20 = arith.subf %7, %19 : vector<64x32xf32>
    %cst_10 = arith.constant 9.99999996E-13 : f32
    %21 = vector.broadcast %cst_10 : f32 to vector<64x1xf32>
    %22 = arith.addf %18, %21 : vector<64x1xf32>
    %23 = math.rsqrt %22 : vector<64x1xf32>
    %24 = vector.broadcast %23 : vector<64x1xf32> to vector<64x32xf32>
    %25 = arith.mulf %20, %24 : vector<64x32xf32>
    %26 = vector.extract_strided_slice %6 {offsets = [0, 32], sizes = [64, 32], strides = [1, 1]} : vector<64x96xf32> to vector<64x32xf32>
    %cst_11 = arith.constant dense<0.000000e+00> : vector<64xf32>
    %27 = vector.multi_reduction <add>, %26, %cst_11 [1] : vector<64x32xf32> to vector<64xf32>
    %28 = vector.shape_cast %27 : vector<64xf32> to vector<64x1xf32>
    %cst_12 = arith.constant 3.200000e+01 : f32
    %29 = vector.broadcast %cst_12 : f32 to vector<64x1xf32>
    %30 = arith.divf %28, %29 : vector<64x1xf32>
    %31 = vector.broadcast %30 : vector<64x1xf32> to vector<64x32xf32>
    %32 = arith.subf %26, %31 : vector<64x32xf32>
    %33 = arith.mulf %32, %32 : vector<64x32xf32>
    %cst_13 = arith.constant dense<0.000000e+00> : vector<64xf32>
    %34 = vector.multi_reduction <add>, %33, %cst_13 [1] : vector<64x32xf32> to vector<64xf32>
    %35 = vector.shape_cast %34 : vector<64xf32> to vector<64x1xf32>
    %cst_14 = arith.constant 3.200000e+01 : f32
    %36 = vector.broadcast %cst_14 : f32 to vector<64x1xf32>
    %37 = arith.divf %35, %36 : vector<64x1xf32>
    %38 = vector.broadcast %30 : vector<64x1xf32> to vector<64x32xf32>
    %39 = arith.subf %26, %38 : vector<64x32xf32>
    %cst_15 = arith.constant 9.99999996E-13 : f32
    %40 = vector.broadcast %cst_15 : f32 to vector<64x1xf32>
    %41 = arith.addf %37, %40 : vector<64x1xf32>
    %42 = math.rsqrt %41 : vector<64x1xf32>
    %43 = vector.broadcast %42 : vector<64x1xf32> to vector<64x32xf32>
    %44 = arith.mulf %39, %43 : vector<64x32xf32>
    %45 = vector.extract_strided_slice %6 {offsets = [0, 64], sizes = [64, 32], strides = [1, 1]} : vector<64x96xf32> to vector<64x32xf32>
    %cst_16 = arith.constant dense<0.000000e+00> : vector<64xf32>
    %46 = vector.multi_reduction <add>, %45, %cst_16 [1] : vector<64x32xf32> to vector<64xf32>
    %47 = vector.shape_cast %46 : vector<64xf32> to vector<64x1xf32>
    %cst_17 = arith.constant 3.200000e+01 : f32
    %48 = vector.broadcast %cst_17 : f32 to vector<64x1xf32>
    %49 = arith.divf %47, %48 : vector<64x1xf32>
    %50 = vector.broadcast %49 : vector<64x1xf32> to vector<64x32xf32>
    %51 = arith.subf %45, %50 : vector<64x32xf32>
    %52 = arith.mulf %51, %51 : vector<64x32xf32>
    %cst_18 = arith.constant dense<0.000000e+00> : vector<64xf32>
    %53 = vector.multi_reduction <add>, %52, %cst_18 [1] : vector<64x32xf32> to vector<64xf32>
    %54 = vector.shape_cast %53 : vector<64xf32> to vector<64x1xf32>
    %cst_19 = arith.constant 3.200000e+01 : f32
    %55 = vector.broadcast %cst_19 : f32 to vector<64x1xf32>
    %56 = arith.divf %54, %55 : vector<64x1xf32>
    %57 = vector.broadcast %49 : vector<64x1xf32> to vector<64x32xf32>
    %58 = arith.subf %45, %57 : vector<64x32xf32>
    %cst_20 = arith.constant 9.99999996E-13 : f32
    %59 = vector.broadcast %cst_20 : f32 to vector<64x1xf32>
    %60 = arith.addf %56, %59 : vector<64x1xf32>
    %61 = math.rsqrt %60 : vector<64x1xf32>
    %62 = vector.broadcast %61 : vector<64x1xf32> to vector<64x32xf32>
    %63 = arith.mulf %58, %62 : vector<64x32xf32>
    %64 = tpu.concatenate %25, %44, %63 in 1 : vector<64x32xf32>, vector<64x32xf32>, vector<64x32xf32> -> vector<64x96xf32>
    %c0_21 = arith.constant 0 : index
    %c0_22 = arith.constant 0 : index
    %65 = vector.load %arg4[%c0_21, %c0_22] : memref<1x96xf32, #tpu.memory_space<vmem>>, vector<1x96xf32>
    %66 = vector.broadcast %65 : vector<1x96xf32> to vector<64x96xf32>
    %67 = arith.mulf %64, %66 : vector<64x96xf32>
    %c0_23 = arith.constant 0 : index
    %c0_24 = arith.constant 0 : index
    %68 = vector.load %arg5[%c0_23, %c0_24] : memref<1x96xf32, #tpu.memory_space<vmem>>, vector<1x96xf32>
    %69 = vector.broadcast %68 : vector<1x96xf32> to vector<64x96xf32>
    %70 = arith.addf %67, %69 : vector<64x96xf32>
    %71 = vector.shape_cast %70 : vector<64x96xf32> to vector<4x16x96xf32>
    %cst_25 = arith.constant 0.000000e+00 : f32
    %72 = vector.broadcast %cst_25 : f32 to vector<16x96xf32>
    %73 = vector.extract_strided_slice %71 {offsets = [0, 0, 0], sizes = [1, 16, 96], strides = [1, 1, 1]} : vector<4x16x96xf32> to vector<1x16x96xf32>
    %74 = vector.shape_cast %73 : vector<1x16x96xf32> to vector<16x96xf32>
    %75 = arith.subf %74, %72 : vector<16x96xf32>
    %cst_26 = arith.constant 0.833333313 : f32
    %76 = vector.broadcast %cst_26 : f32 to vector<16x96xf32>
    %77 = arith.mulf %75, %76 : vector<16x96xf32>
    %78 = arith.addf %72, %77 : vector<16x96xf32>
    %cst_27 = arith.constant 1.000000e+00 : f32
    %79 = vector.broadcast %cst_27 : f32 to vector<16x96xf32>
    %80 = arith.cmpf oge, %78, %79 : vector<16x96xf32>
    %81 = arith.extui %80 : vector<16x96xi1> to vector<16x96xi32>
    %82 = arith.sitofp %81 : vector<16x96xi32> to vector<16x96xf32>
    %c0_28 = arith.constant 0 : index
    %c0_29 = arith.constant 0 : index
    %c0_30 = arith.constant 0 : index
    %83 = vector.load %arg6[%c0_28, %c0_29, %c0_30] : memref<4x16x96xf32, #tpu.memory_space<vmem>>, vector<1x16x96xf32>
    %84 = vector.shape_cast %83 : vector<1x16x96xf32> to vector<16x96xf32>
    %85 = vector.shape_cast %82 : vector<16x96xf32> to vector<1x16x96xf32>
    tpu.vector_store %arg6[%c0_28, %c0_29, %c0_30], %85 {strides = array<i32>} : memref<4x16x96xf32, #tpu.memory_space<vmem>>, vector<1x16x96xf32>,
    %cst_31 = arith.constant 1.000000e+00 : f32
    %86 = vector.broadcast %cst_31 : f32 to vector<16x96xf32>
    %87 = arith.subf %86, %82 : vector<16x96xf32>
    %88 = arith.mulf %78, %87 : vector<16x96xf32>
    %89 = vector.extract_strided_slice %71 {offsets = [1, 0, 0], sizes = [1, 16, 96], strides = [1, 1, 1]} : vector<4x16x96xf32> to vector<1x16x96xf32>
    %90 = vector.shape_cast %89 : vector<1x16x96xf32> to vector<16x96xf32>
    %91 = arith.subf %90, %88 : vector<16x96xf32>
    %cst_32 = arith.constant 0.833333313 : f32
    %92 = vector.broadcast %cst_32 : f32 to vector<16x96xf32>
    %93 = arith.mulf %91, %92 : vector<16x96xf32>
    %94 = arith.addf %88, %93 : vector<16x96xf32>
    %cst_33 = arith.constant 1.000000e+00 : f32
    %95 = vector.broadcast %cst_33 : f32 to vector<16x96xf32>
    %96 = arith.cmpf oge, %94, %95 : vector<16x96xf32>
    %97 = arith.extui %96 : vector<16x96xi1> to vector<16x96xi32>
    %98 = arith.sitofp %97 : vector<16x96xi32> to vector<16x96xf32>
    %c1 = arith.constant 1 : index
    %c0_34 = arith.constant 0 : index
    %c0_35 = arith.constant 0 : index
    %99 = vector.load %arg6[%c1, %c0_34, %c0_35] : memref<4x16x96xf32, #tpu.memory_space<vmem>>, vector<1x16x96xf32>
    %100 = vector.shape_cast %99 : vector<1x16x96xf32> to vector<16x96xf32>
    %101 = vector.shape_cast %98 : vector<16x96xf32> to vector<1x16x96xf32>
    tpu.vector_store %arg6[%c1, %c0_34, %c0_35], %101 {strides = array<i32>} : memref<4x16x96xf32, #tpu.memory_space<vmem>>, vector<1x16x96xf32>,
    %cst_36 = arith.constant 1.000000e+00 : f32
    %102 = vector.broadcast %cst_36 : f32 to vector<16x96xf32>
    %103 = arith.subf %102, %98 : vector<16x96xf32>
    %104 = arith.mulf %94, %103 : vector<16x96xf32>
    %105 = vector.extract_strided_slice %71 {offsets = [2, 0, 0], sizes = [1, 16, 96], strides = [1, 1, 1]} : vector<4x16x96xf32> to vector<1x16x96xf32>
    %106 = vector.shape_cast %105 : vector<1x16x96xf32> to vector<16x96xf32>
    %107 = arith.subf %106, %104 : vector<16x96xf32>
    %cst_37 = arith.constant 0.833333313 : f32
    %108 = vector.broadcast %cst_37 : f32 to vector<16x96xf32>
    %109 = arith.mulf %107, %108 : vector<16x96xf32>
    %110 = arith.addf %104, %109 : vector<16x96xf32>
    %cst_38 = arith.constant 1.000000e+00 : f32
    %111 = vector.broadcast %cst_38 : f32 to vector<16x96xf32>
    %112 = arith.cmpf oge, %110, %111 : vector<16x96xf32>
    %113 = arith.extui %112 : vector<16x96xi1> to vector<16x96xi32>
    %114 = arith.sitofp %113 : vector<16x96xi32> to vector<16x96xf32>
    %c2 = arith.constant 2 : index
    %c0_39 = arith.constant 0 : index
    %c0_40 = arith.constant 0 : index
    %115 = vector.load %arg6[%c2, %c0_39, %c0_40] : memref<4x16x96xf32, #tpu.memory_space<vmem>>, vector<1x16x96xf32>
    %116 = vector.shape_cast %115 : vector<1x16x96xf32> to vector<16x96xf32>
    %117 = vector.shape_cast %114 : vector<16x96xf32> to vector<1x16x96xf32>
    tpu.vector_store %arg6[%c2, %c0_39, %c0_40], %117 {strides = array<i32>} : memref<4x16x96xf32, #tpu.memory_space<vmem>>, vector<1x16x96xf32>,
    %cst_41 = arith.constant 1.000000e+00 : f32
    %118 = vector.broadcast %cst_41 : f32 to vector<16x96xf32>
    %119 = arith.subf %118, %114 : vector<16x96xf32>
    %120 = arith.mulf %110, %119 : vector<16x96xf32>
    %121 = vector.extract_strided_slice %71 {offsets = [3, 0, 0], sizes = [1, 16, 96], strides = [1, 1, 1]} : vector<4x16x96xf32> to vector<1x16x96xf32>
    %122 = vector.shape_cast %121 : vector<1x16x96xf32> to vector<16x96xf32>
    %123 = arith.subf %122, %120 : vector<16x96xf32>
    %cst_42 = arith.constant 0.833333313 : f32
    %124 = vector.broadcast %cst_42 : f32 to vector<16x96xf32>
    %125 = arith.mulf %123, %124 : vector<16x96xf32>
    %126 = arith.addf %120, %125 : vector<16x96xf32>
    %cst_43 = arith.constant 1.000000e+00 : f32
    %127 = vector.broadcast %cst_43 : f32 to vector<16x96xf32>
    %128 = arith.cmpf oge, %126, %127 : vector<16x96xf32>
    %129 = arith.extui %128 : vector<16x96xi1> to vector<16x96xi32>
    %130 = arith.sitofp %129 : vector<16x96xi32> to vector<16x96xf32>
    %c3 = arith.constant 3 : index
    %c0_44 = arith.constant 0 : index
    %c0_45 = arith.constant 0 : index
    %131 = vector.load %arg6[%c3, %c0_44, %c0_45] : memref<4x16x96xf32, #tpu.memory_space<vmem>>, vector<1x16x96xf32>
    %132 = vector.shape_cast %131 : vector<1x16x96xf32> to vector<16x96xf32>
    %133 = vector.shape_cast %130 : vector<16x96xf32> to vector<1x16x96xf32>
    tpu.vector_store %arg6[%c3, %c0_44, %c0_45], %133 {strides = array<i32>} : memref<4x16x96xf32, #tpu.memory_space<vmem>>, vector<1x16x96xf32>,
    return
  }
  func.func @transform_0(%arg0: i32) -> (i32, i32, i32) {
    %c0_i32 = arith.constant 0 : i32
    %c0_i32_0 = arith.constant 0 : i32
    %c0_i32_1 = arith.constant 0 : i32
    return %c0_i32, %arg0, %c0_i32_0 : i32, i32, i32
  }
  func.func @transform_1(%arg0: i32) -> (i32, i32) {
    %c0_i32 = arith.constant 0 : i32
    %c0_i32_0 = arith.constant 0 : i32
    %c0_i32_1 = arith.constant 0 : i32
    return %c0_i32, %c0_i32_0 : i32, i32
  }
  func.func @transform_2(%arg0: i32) -> (i32, i32) {
    %c0_i32 = arith.constant 0 : i32
    %c0_i32_0 = arith.constant 0 : i32
    %c0_i32_1 = arith.constant 0 : i32
    return %c0_i32, %c0_i32_0 : i32, i32
  }
  func.func @transform_3(%arg0: i32) -> (i32, i32) {
    %c0_i32 = arith.constant 0 : i32
    %c0_i32_0 = arith.constant 0 : i32
    %c0_i32_1 = arith.constant 0 : i32
    return %c0_i32, %c0_i32_0 : i32, i32
  }
  func.func @transform_4(%arg0: i32) -> (i32, i32) {
    %c0_i32 = arith.constant 0 : i32
    %c0_i32_0 = arith.constant 0 : i32
    %c0_i32_1 = arith.constant 0 : i32
    return %c0_i32, %c0_i32_0 : i32, i32
  }
  func.func @transform_5(%arg0: i32) -> (i32, i32, i32) {
    %c0_i32 = arith.constant 0 : i32
    %c0_i32_0 = arith.constant 0 : i32
    %c0_i32_1 = arith.constant 0 : i32
    return %c0_i32, %arg0, %c0_i32_0 : i32, i32, i32
  }
}

module attributes {stable_mosaic.version = 11 : i64} {
  func.func @_attn_kernel(%arg0: i32, %arg1: memref<8x8x96xf32, #tpu.memory_space<vmem>>, %arg2: memref<8x8x32xf32, #tpu.memory_space<vmem>>) attributes {dimension_semantics = [#tpu.dimension_semantics<parallel>], iteration_bounds = array<i64: 1>, scalar_prefetch = 0 : i64, scratch_operands = 0 : i64, tpu.core_type = #tpu.core_type<tc>, window_params = [{transform_indices = @transform_0, window_bounds = array<i64: 8, 8, 96>}, {transform_indices = @transform_1, window_bounds = array<i64: 8, 8, 32>}]} {
    %c0 = arith.constant 0 : index
    %c0_0 = arith.constant 0 : index
    %c0_1 = arith.constant 0 : index
    %0 = vector.load %arg1[%c0, %c0_0, %c0_1] : memref<8x8x96xf32, #tpu.memory_space<vmem>>, vector<8x8x96xf32>
    %1 = tpu.iota {dimensions = array<i32: 0>} : vector<8x8xi32>
    %2 = tpu.iota {dimensions = array<i32: 1>} : vector<8x8xi32>
    %3 = arith.cmpi sle, %2, %1 : vector<8x8xi32>
    %4 = vector.shape_cast %3 : vector<8x8xi1> to vector<1x8x8xi1>
    %5 = vector.extract_strided_slice %0 {offsets = [0, 0, 0], sizes = [8, 8, 8], strides = [1, 1, 1]} : vector<8x8x96xf32> to vector<8x8x8xf32>
    %6 = vector.extract_strided_slice %0 {offsets = [0, 0, 32], sizes = [8, 8, 8], strides = [1, 1, 1]} : vector<8x8x96xf32> to vector<8x8x8xf32>
    %7 = vector.extract_strided_slice %0 {offsets = [0, 0, 64], sizes = [8, 8, 8], strides = [1, 1, 1]} : vector<8x8x96xf32> to vector<8x8x8xf32>
    "tpu.trace_start"() <{level = 10 : i32, message = "gld,gmd->glm"}> : () -> ()
    %cst = arith.constant dense<0.000000e+00> : vector<8x8x8xf32>
    %8 = tpu.matmul %5, %6, %cst {dimension_numbers = #tpu.dot_dimension_numbers<[2], [2], [1], [1], [0, 0, 0, 1, 1, 1], [0], [0]>} : vector<8x8x8xf32>, vector<8x8x8xf32>, vector<8x8x8xf32> -> vector<8x8x8xf32>
    "tpu.trace_stop"() : () -> ()
    %cst_2 = arith.constant 1.250000e-01 : f32
    %9 = vector.broadcast %cst_2 : f32 to vector<8x8x8xf32>
    %10 = arith.mulf %8, %9 : vector<8x8x8xf32>
    %cst_3 = arith.constant 0.000000e+00 : f32
    %11 = vector.shape_cast %4 : vector<1x8x8xi1> to vector<1x8x8xi1>
    %12 = vector.broadcast %11 : vector<1x8x8xi1> to vector<8x8x8xi1>
    %13 = vector.broadcast %cst_3 : f32 to vector<8x8x8xf32>
    %14 = arith.select %12, %10, %13 : vector<8x8x8xi1>, vector<8x8x8xf32>
    "tpu.trace_start"() <{level = 10 : i32, message = "glm,gmd->gld"}> : () -> ()
    %cst_4 = arith.constant dense<0.000000e+00> : vector<8x8x8xf32>
    %15 = tpu.matmul %14, %7, %cst_4 {dimension_numbers = #tpu.dot_dimension_numbers<[2], [1], [1], [2], [0, 0, 0, 1, 1, 2], [0], [0]>} : vector<8x8x8xf32>, vector<8x8x8xf32>, vector<8x8x8xf32> -> vector<8x8x8xf32>
    "tpu.trace_stop"() : () -> ()
    %16 = vector.extract_strided_slice %0 {offsets = [0, 0, 8], sizes = [8, 8, 8], strides = [1, 1, 1]} : vector<8x8x96xf32> to vector<8x8x8xf32>
    %17 = vector.extract_strided_slice %0 {offsets = [0, 0, 40], sizes = [8, 8, 8], strides = [1, 1, 1]} : vector<8x8x96xf32> to vector<8x8x8xf32>
    %18 = vector.extract_strided_slice %0 {offsets = [0, 0, 72], sizes = [8, 8, 8], strides = [1, 1, 1]} : vector<8x8x96xf32> to vector<8x8x8xf32>
    "tpu.trace_start"() <{level = 10 : i32, message = "gld,gmd->glm"}> : () -> ()
    %cst_5 = arith.constant dense<0.000000e+00> : vector<8x8x8xf32>
    %19 = tpu.matmul %16, %17, %cst_5 {dimension_numbers = #tpu.dot_dimension_numbers<[2], [2], [1], [1], [0, 0, 0, 1, 1, 1], [0], [0]>} : vector<8x8x8xf32>, vector<8x8x8xf32>, vector<8x8x8xf32> -> vector<8x8x8xf32>
    "tpu.trace_stop"() : () -> ()
    %cst_6 = arith.constant 1.250000e-01 : f32
    %20 = vector.broadcast %cst_6 : f32 to vector<8x8x8xf32>
    %21 = arith.mulf %19, %20 : vector<8x8x8xf32>
    %cst_7 = arith.constant 0.000000e+00 : f32
    %22 = vector.shape_cast %4 : vector<1x8x8xi1> to vector<1x8x8xi1>
    %23 = vector.broadcast %22 : vector<1x8x8xi1> to vector<8x8x8xi1>
    %24 = vector.broadcast %cst_7 : f32 to vector<8x8x8xf32>
    %25 = arith.select %23, %21, %24 : vector<8x8x8xi1>, vector<8x8x8xf32>
    "tpu.trace_start"() <{level = 10 : i32, message = "glm,gmd->gld"}> : () -> ()
    %cst_8 = arith.constant dense<0.000000e+00> : vector<8x8x8xf32>
    %26 = tpu.matmul %25, %18, %cst_8 {dimension_numbers = #tpu.dot_dimension_numbers<[2], [1], [1], [2], [0, 0, 0, 1, 1, 2], [0], [0]>} : vector<8x8x8xf32>, vector<8x8x8xf32>, vector<8x8x8xf32> -> vector<8x8x8xf32>
    "tpu.trace_stop"() : () -> ()
    %27 = vector.extract_strided_slice %0 {offsets = [0, 0, 16], sizes = [8, 8, 8], strides = [1, 1, 1]} : vector<8x8x96xf32> to vector<8x8x8xf32>
    %28 = vector.extract_strided_slice %0 {offsets = [0, 0, 48], sizes = [8, 8, 8], strides = [1, 1, 1]} : vector<8x8x96xf32> to vector<8x8x8xf32>
    %29 = vector.extract_strided_slice %0 {offsets = [0, 0, 80], sizes = [8, 8, 8], strides = [1, 1, 1]} : vector<8x8x96xf32> to vector<8x8x8xf32>
    "tpu.trace_start"() <{level = 10 : i32, message = "gld,gmd->glm"}> : () -> ()
    %cst_9 = arith.constant dense<0.000000e+00> : vector<8x8x8xf32>
    %30 = tpu.matmul %27, %28, %cst_9 {dimension_numbers = #tpu.dot_dimension_numbers<[2], [2], [1], [1], [0, 0, 0, 1, 1, 1], [0], [0]>} : vector<8x8x8xf32>, vector<8x8x8xf32>, vector<8x8x8xf32> -> vector<8x8x8xf32>
    "tpu.trace_stop"() : () -> ()
    %cst_10 = arith.constant 1.250000e-01 : f32
    %31 = vector.broadcast %cst_10 : f32 to vector<8x8x8xf32>
    %32 = arith.mulf %30, %31 : vector<8x8x8xf32>
    %cst_11 = arith.constant 0.000000e+00 : f32
    %33 = vector.shape_cast %4 : vector<1x8x8xi1> to vector<1x8x8xi1>
    %34 = vector.broadcast %33 : vector<1x8x8xi1> to vector<8x8x8xi1>
    %35 = vector.broadcast %cst_11 : f32 to vector<8x8x8xf32>
    %36 = arith.select %34, %32, %35 : vector<8x8x8xi1>, vector<8x8x8xf32>
    "tpu.trace_start"() <{level = 10 : i32, message = "glm,gmd->gld"}> : () -> ()
    %cst_12 = arith.constant dense<0.000000e+00> : vector<8x8x8xf32>
    %37 = tpu.matmul %36, %29, %cst_12 {dimension_numbers = #tpu.dot_dimension_numbers<[2], [1], [1], [2], [0, 0, 0, 1, 1, 2], [0], [0]>} : vector<8x8x8xf32>, vector<8x8x8xf32>, vector<8x8x8xf32> -> vector<8x8x8xf32>
    "tpu.trace_stop"() : () -> ()
    %38 = vector.extract_strided_slice %0 {offsets = [0, 0, 24], sizes = [8, 8, 8], strides = [1, 1, 1]} : vector<8x8x96xf32> to vector<8x8x8xf32>
    %39 = vector.extract_strided_slice %0 {offsets = [0, 0, 56], sizes = [8, 8, 8], strides = [1, 1, 1]} : vector<8x8x96xf32> to vector<8x8x8xf32>
    %40 = vector.extract_strided_slice %0 {offsets = [0, 0, 88], sizes = [8, 8, 8], strides = [1, 1, 1]} : vector<8x8x96xf32> to vector<8x8x8xf32>
    "tpu.trace_start"() <{level = 10 : i32, message = "gld,gmd->glm"}> : () -> ()
    %cst_13 = arith.constant dense<0.000000e+00> : vector<8x8x8xf32>
    %41 = tpu.matmul %38, %39, %cst_13 {dimension_numbers = #tpu.dot_dimension_numbers<[2], [2], [1], [1], [0, 0, 0, 1, 1, 1], [0], [0]>} : vector<8x8x8xf32>, vector<8x8x8xf32>, vector<8x8x8xf32> -> vector<8x8x8xf32>
    "tpu.trace_stop"() : () -> ()
    %cst_14 = arith.constant 1.250000e-01 : f32
    %42 = vector.broadcast %cst_14 : f32 to vector<8x8x8xf32>
    %43 = arith.mulf %41, %42 : vector<8x8x8xf32>
    %cst_15 = arith.constant 0.000000e+00 : f32
    %44 = vector.shape_cast %4 : vector<1x8x8xi1> to vector<1x8x8xi1>
    %45 = vector.broadcast %44 : vector<1x8x8xi1> to vector<8x8x8xi1>
    %46 = vector.broadcast %cst_15 : f32 to vector<8x8x8xf32>
    %47 = arith.select %45, %43, %46 : vector<8x8x8xi1>, vector<8x8x8xf32>
    "tpu.trace_start"() <{level = 10 : i32, message = "glm,gmd->gld"}> : () -> ()
    %cst_16 = arith.constant dense<0.000000e+00> : vector<8x8x8xf32>
    %48 = tpu.matmul %47, %40, %cst_16 {dimension_numbers = #tpu.dot_dimension_numbers<[2], [1], [1], [2], [0, 0, 0, 1, 1, 2], [0], [0]>} : vector<8x8x8xf32>, vector<8x8x8xf32>, vector<8x8x8xf32> -> vector<8x8x8xf32>
    "tpu.trace_stop"() : () -> ()
    %49 = tpu.concatenate %15, %26, %37, %48 in 2 : vector<8x8x8xf32>, vector<8x8x8xf32>, vector<8x8x8xf32>, vector<8x8x8xf32> -> vector<8x8x32xf32>
    %c0_17 = arith.constant 0 : index
    %c0_18 = arith.constant 0 : index
    %c0_19 = arith.constant 0 : index
    %50 = vector.load %arg2[%c0_17, %c0_18, %c0_19] : memref<8x8x32xf32, #tpu.memory_space<vmem>>, vector<8x8x32xf32>
    tpu.vector_store %arg2[%c0_17, %c0_18, %c0_19], %49 {strides = array<i32>} : memref<8x8x32xf32, #tpu.memory_space<vmem>>, vector<8x8x32xf32>,
    return
  }
  func.func @transform_0(%arg0: i32) -> (i32, i32, i32) {
    %c0_i32 = arith.constant 0 : i32
    %c0_i32_0 = arith.constant 0 : i32
    %c0_i32_1 = arith.constant 0 : i32
    return %arg0, %c0_i32, %c0_i32_0 : i32, i32, i32
  }
  func.func @transform_1(%arg0: i32) -> (i32, i32, i32) {
    %c0_i32 = arith.constant 0 : i32
    %c0_i32_0 = arith.constant 0 : i32
    %c0_i32_1 = arith.constant 0 : i32
    return %arg0, %c0_i32, %c0_i32_0 : i32, i32, i32
  }
}

module attributes {stable_mosaic.version = 11 : i64} {
  func.func @_ssa_out_kernel(%arg0: i32, %arg1: memref<4x16x32xf32, #tpu.memory_space<vmem>>, %arg2: memref<4x16x32xf32, #tpu.memory_space<vmem>>, %arg3: memref<32x32xf32, #tpu.memory_space<vmem>>, %arg4: memref<1x32xf32, #tpu.memory_space<vmem>>, %arg5: memref<1x32xf32, #tpu.memory_space<vmem>>, %arg6: memref<1x32xf32, #tpu.memory_space<vmem>>, %arg7: memref<4x16x32xf32, #tpu.memory_space<vmem>>) attributes {dimension_semantics = [#tpu.dimension_semantics<parallel>], iteration_bounds = array<i64: 1>, scalar_prefetch = 0 : i64, scratch_operands = 0 : i64, tpu.core_type = #tpu.core_type<tc>, window_params = [{transform_indices = @transform_0, window_bounds = array<i64: 4, 16, 32>}, {transform_indices = @transform_1, window_bounds = array<i64: 4, 16, 32>}, {pipeline_mode = #tpu.pipeline_mode<synchronous>, transform_indices = @transform_2, window_bounds = array<i64: 32, 32>}, {pipeline_mode = #tpu.pipeline_mode<synchronous>, transform_indices = @transform_3, window_bounds = array<i64: 1, 32>}, {pipeline_mode = #tpu.pipeline_mode<synchronous>, transform_indices = @transform_4, window_bounds = array<i64: 1, 32>}, {pipeline_mode = #tpu.pipeline_mode<synchronous>, transform_indices = @transform_5, window_bounds = array<i64: 1, 32>}, {transform_indices = @transform_6, window_bounds = array<i64: 4, 16, 32>}]} {
    %c0 = arith.constant 0 : index
    %c0_0 = arith.constant 0 : index
    %c0_1 = arith.constant 0 : index
    %0 = vector.load %arg1[%c0, %c0_0, %c0_1] : memref<4x16x32xf32, #tpu.memory_space<vmem>>, vector<4x16x32xf32>
    %1 = vector.shape_cast %0 : vector<4x16x32xf32> to vector<64x32xf32>
    %c0_2 = arith.constant 0 : index
    %c0_3 = arith.constant 0 : index
    %2 = vector.load %arg3[%c0_2, %c0_3] : memref<32x32xf32, #tpu.memory_space<vmem>>, vector<32x32xf32>
    %cst = arith.constant dense<0.000000e+00> : vector<64x32xf32>
    %3 = tpu.matmul %1, %2, %cst {dimension_numbers = #tpu.dot_dimension_numbers<[1], [0], [0], [1], [0, 0, 1, 1], [], []>} : vector<64x32xf32>, vector<32x32xf32>, vector<64x32xf32> -> vector<64x32xf32>
    %c0_4 = arith.constant 0 : index
    %c0_5 = arith.constant 0 : index
    %4 = vector.load %arg4[%c0_4, %c0_5] : memref<1x32xf32, #tpu.memory_space<vmem>>, vector<1x32xf32>
    %5 = vector.broadcast %4 : vector<1x32xf32> to vector<64x32xf32>
    %6 = arith.addf %3, %5 : vector<64x32xf32>
    %cst_6 = arith.constant dense<0.000000e+00> : vector<64xf32>
    %7 = vector.multi_reduction <add>, %6, %cst_6 [1] : vector<64x32xf32> to vector<64xf32>
    %8 = vector.shape_cast %7 : vector<64xf32> to vector<64x1xf32>
    %cst_7 = arith.constant 3.200000e+01 : f32
    %9 = vector.broadcast %cst_7 : f32 to vector<64x1xf32>
    %10 = arith.divf %8, %9 : vector<64x1xf32>
    %11 = vector.broadcast %10 : vector<64x1xf32> to vector<64x32xf32>
    %12 = arith.subf %6, %11 : vector<64x32xf32>
    %13 = arith.mulf %12, %12 : vector<64x32xf32>
    %cst_8 = arith.constant dense<0.000000e+00> : vector<64xf32>
    %14 = vector.multi_reduction <add>, %13, %cst_8 [1] : vector<64x32xf32> to vector<64xf32>
    %15 = vector.shape_cast %14 : vector<64xf32> to vector<64x1xf32>
    %cst_9 = arith.constant 3.200000e+01 : f32
    %16 = vector.broadcast %cst_9 : f32 to vector<64x1xf32>
    %17 = arith.divf %15, %16 : vector<64x1xf32>
    %18 = vector.broadcast %10 : vector<64x1xf32> to vector<64x32xf32>
    %19 = arith.subf %6, %18 : vector<64x32xf32>
    %cst_10 = arith.constant 9.99999996E-13 : f32
    %20 = vector.broadcast %cst_10 : f32 to vector<64x1xf32>
    %21 = arith.addf %17, %20 : vector<64x1xf32>
    %22 = math.rsqrt %21 : vector<64x1xf32>
    %23 = vector.broadcast %22 : vector<64x1xf32> to vector<64x32xf32>
    %24 = arith.mulf %19, %23 : vector<64x32xf32>
    %c0_11 = arith.constant 0 : index
    %c0_12 = arith.constant 0 : index
    %25 = vector.load %arg5[%c0_11, %c0_12] : memref<1x32xf32, #tpu.memory_space<vmem>>, vector<1x32xf32>
    %26 = vector.broadcast %25 : vector<1x32xf32> to vector<64x32xf32>
    %27 = arith.mulf %24, %26 : vector<64x32xf32>
    %c0_13 = arith.constant 0 : index
    %c0_14 = arith.constant 0 : index
    %28 = vector.load %arg6[%c0_13, %c0_14] : memref<1x32xf32, #tpu.memory_space<vmem>>, vector<1x32xf32>
    %29 = vector.broadcast %28 : vector<1x32xf32> to vector<64x32xf32>
    %30 = arith.addf %27, %29 : vector<64x32xf32>
    %31 = vector.shape_cast %30 : vector<64x32xf32> to vector<4x16x32xf32>
    %cst_15 = arith.constant 0.000000e+00 : f32
    %32 = vector.broadcast %cst_15 : f32 to vector<16x32xf32>
    %33 = vector.extract_strided_slice %0 {offsets = [0, 0, 0], sizes = [1, 16, 32], strides = [1, 1, 1]} : vector<4x16x32xf32> to vector<1x16x32xf32>
    %34 = vector.shape_cast %33 : vector<1x16x32xf32> to vector<16x32xf32>
    %35 = arith.subf %34, %32 : vector<16x32xf32>
    %cst_16 = arith.constant 0.833333313 : f32
    %36 = vector.broadcast %cst_16 : f32 to vector<16x32xf32>
    %37 = arith.mulf %35, %36 : vector<16x32xf32>
    %38 = arith.addf %32, %37 : vector<16x32xf32>
    %cst_17 = arith.constant 5.000000e-01 : f32
    %39 = vector.broadcast %cst_17 : f32 to vector<16x32xf32>
    %40 = arith.cmpf oge, %38, %39 : vector<16x32xf32>
    %41 = arith.extui %40 : vector<16x32xi1> to vector<16x32xi32>
    %42 = arith.sitofp %41 : vector<16x32xi32> to vector<16x32xf32>
    %cst_18 = arith.constant 1.000000e+00 : f32
    %43 = vector.broadcast %cst_18 : f32 to vector<16x32xf32>
    %44 = arith.subf %43, %42 : vector<16x32xf32>
    %45 = arith.mulf %38, %44 : vector<16x32xf32>
    %46 = vector.extract_strided_slice %0 {offsets = [1, 0, 0], sizes = [1, 16, 32], strides = [1, 1, 1]} : vector<4x16x32xf32> to vector<1x16x32xf32>
    %47 = vector.shape_cast %46 : vector<1x16x32xf32> to vector<16x32xf32>
    %48 = arith.subf %47, %45 : vector<16x32xf32>
    %cst_19 = arith.constant 0.833333313 : f32
    %49 = vector.broadcast %cst_19 : f32 to vector<16x32xf32>
    %50 = arith.mulf %48, %49 : vector<16x32xf32>
    %51 = arith.addf %45, %50 : vector<16x32xf32>
    %cst_20 = arith.constant 5.000000e-01 : f32
    %52 = vector.broadcast %cst_20 : f32 to vector<16x32xf32>
    %53 = arith.cmpf oge, %51, %52 : vector<16x32xf32>
    %54 = arith.extui %53 : vector<16x32xi1> to vector<16x32xi32>
    %55 = arith.sitofp %54 : vector<16x32xi32> to vector<16x32xf32>
    %cst_21 = arith.constant 1.000000e+00 : f32
    %56 = vector.broadcast %cst_21 : f32 to vector<16x32xf32>
    %57 = arith.subf %56, %55 : vector<16x32xf32>
    %58 = arith.mulf %51, %57 : vector<16x32xf32>
    %59 = vector.extract_strided_slice %0 {offsets = [2, 0, 0], sizes = [1, 16, 32], strides = [1, 1, 1]} : vector<4x16x32xf32> to vector<1x16x32xf32>
    %60 = vector.shape_cast %59 : vector<1x16x32xf32> to vector<16x32xf32>
    %61 = arith.subf %60, %58 : vector<16x32xf32>
    %cst_22 = arith.constant 0.833333313 : f32
    %62 = vector.broadcast %cst_22 : f32 to vector<16x32xf32>
    %63 = arith.mulf %61, %62 : vector<16x32xf32>
    %64 = arith.addf %58, %63 : vector<16x32xf32>
    %cst_23 = arith.constant 5.000000e-01 : f32
    %65 = vector.broadcast %cst_23 : f32 to vector<16x32xf32>
    %66 = arith.cmpf oge, %64, %65 : vector<16x32xf32>
    %67 = arith.extui %66 : vector<16x32xi1> to vector<16x32xi32>
    %68 = arith.sitofp %67 : vector<16x32xi32> to vector<16x32xf32>
    %cst_24 = arith.constant 1.000000e+00 : f32
    %69 = vector.broadcast %cst_24 : f32 to vector<16x32xf32>
    %70 = arith.subf %69, %68 : vector<16x32xf32>
    %71 = arith.mulf %64, %70 : vector<16x32xf32>
    %72 = vector.extract_strided_slice %0 {offsets = [3, 0, 0], sizes = [1, 16, 32], strides = [1, 1, 1]} : vector<4x16x32xf32> to vector<1x16x32xf32>
    %73 = vector.shape_cast %72 : vector<1x16x32xf32> to vector<16x32xf32>
    %74 = arith.subf %73, %71 : vector<16x32xf32>
    %cst_25 = arith.constant 0.833333313 : f32
    %75 = vector.broadcast %cst_25 : f32 to vector<16x32xf32>
    %76 = arith.mulf %74, %75 : vector<16x32xf32>
    %77 = arith.addf %71, %76 : vector<16x32xf32>
    %cst_26 = arith.constant 5.000000e-01 : f32
    %78 = vector.broadcast %cst_26 : f32 to vector<16x32xf32>
    %79 = arith.cmpf oge, %77, %78 : vector<16x32xf32>
    %80 = arith.extui %79 : vector<16x32xi1> to vector<16x32xi32>
    %81 = arith.sitofp %80 : vector<16x32xi32> to vector<16x32xf32>
    %cst_27 = arith.constant 1.000000e+00 : f32
    %82 = vector.broadcast %cst_27 : f32 to vector<16x32xf32>
    %83 = arith.subf %82, %81 : vector<16x32xf32>
    %84 = arith.mulf %77, %83 : vector<16x32xf32>
    %85 = vector.extract_strided_slice %31 {offsets = [0, 0, 0], sizes = [1, 16, 32], strides = [1, 1, 1]} : vector<4x16x32xf32> to vector<1x16x32xf32>
    %86 = vector.shape_cast %85 : vector<1x16x32xf32> to vector<16x32xf32>
    %87 = arith.subf %86, %84 : vector<16x32xf32>
    %cst_28 = arith.constant 0.833333313 : f32
    %88 = vector.broadcast %cst_28 : f32 to vector<16x32xf32>
    %89 = arith.mulf %87, %88 : vector<16x32xf32>
    %90 = arith.addf %84, %89 : vector<16x32xf32>
    %cst_29 = arith.constant 5.000000e-01 : f32
    %91 = vector.broadcast %cst_29 : f32 to vector<16x32xf32>
    %92 = arith.cmpf oge, %90, %91 : vector<16x32xf32>
    %93 = arith.extui %92 : vector<16x32xi1> to vector<16x32xi32>
    %94 = arith.sitofp %93 : vector<16x32xi32> to vector<16x32xf32>
    %c0_30 = arith.constant 0 : index
    %c0_31 = arith.constant 0 : index
    %c0_32 = arith.constant 0 : index
    %95 = vector.load %arg2[%c0_30, %c0_31, %c0_32] : memref<4x16x32xf32, #tpu.memory_space<vmem>>, vector<1x16x32xf32>
    %96 = vector.shape_cast %95 : vector<1x16x32xf32> to vector<16x32xf32>
    %97 = arith.addf %96, %94 : vector<16x32xf32>
    %c0_33 = arith.constant 0 : index
    %c0_34 = arith.constant 0 : index
    %c0_35 = arith.constant 0 : index
    %98 = vector.load %arg7[%c0_33, %c0_34, %c0_35] : memref<4x16x32xf32, #tpu.memory_space<vmem>>, vector<1x16x32xf32>
    %99 = vector.shape_cast %98 : vector<1x16x32xf32> to vector<16x32xf32>
    %100 = vector.shape_cast %97 : vector<16x32xf32> to vector<1x16x32xf32>
    tpu.vector_store %arg7[%c0_33, %c0_34, %c0_35], %100 {strides = array<i32>} : memref<4x16x32xf32, #tpu.memory_space<vmem>>, vector<1x16x32xf32>,
    %cst_36 = arith.constant 1.000000e+00 : f32
    %101 = vector.broadcast %cst_36 : f32 to vector<16x32xf32>
    %102 = arith.subf %101, %94 : vector<16x32xf32>
    %103 = arith.mulf %90, %102 : vector<16x32xf32>
    %104 = vector.extract_strided_slice %31 {offsets = [1, 0, 0], sizes = [1, 16, 32], strides = [1, 1, 1]} : vector<4x16x32xf32> to vector<1x16x32xf32>
    %105 = vector.shape_cast %104 : vector<1x16x32xf32> to vector<16x32xf32>
    %106 = arith.subf %105, %103 : vector<16x32xf32>
    %cst_37 = arith.constant 0.833333313 : f32
    %107 = vector.broadcast %cst_37 : f32 to vector<16x32xf32>
    %108 = arith.mulf %106, %107 : vector<16x32xf32>
    %109 = arith.addf %103, %108 : vector<16x32xf32>
    %cst_38 = arith.constant 5.000000e-01 : f32
    %110 = vector.broadcast %cst_38 : f32 to vector<16x32xf32>
    %111 = arith.cmpf oge, %109, %110 : vector<16x32xf32>
    %112 = arith.extui %111 : vector<16x32xi1> to vector<16x32xi32>
    %113 = arith.sitofp %112 : vector<16x32xi32> to vector<16x32xf32>
    %c1 = arith.constant 1 : index
    %c0_39 = arith.constant 0 : index
    %c0_40 = arith.constant 0 : index
    %114 = vector.load %arg2[%c1, %c0_39, %c0_40] : memref<4x16x32xf32, #tpu.memory_space<vmem>>, vector<1x16x32xf32>
    %115 = vector.shape_cast %114 : vector<1x16x32xf32> to vector<16x32xf32>
    %116 = arith.addf %115, %113 : vector<16x32xf32>
    %c1_41 = arith.constant 1 : index
    %c0_42 = arith.constant 0 : index
    %c0_43 = arith.constant 0 : index
    %117 = vector.load %arg7[%c1_41, %c0_42, %c0_43] : memref<4x16x32xf32, #tpu.memory_space<vmem>>, vector<1x16x32xf32>
    %118 = vector.shape_cast %117 : vector<1x16x32xf32> to vector<16x32xf32>
    %119 = vector.shape_cast %116 : vector<16x32xf32> to vector<1x16x32xf32>
    tpu.vector_store %arg7[%c1_41, %c0_42, %c0_43], %119 {strides = array<i32>} : memref<4x16x32xf32, #tpu.memory_space<vmem>>, vector<1x16x32xf32>,
    %cst_44 = arith.constant 1.000000e+00 : f32
    %120 = vector.broadcast %cst_44 : f32 to vector<16x32xf32>
    %121 = arith.subf %120, %113 : vector<16x32xf32>
    %122 = arith.mulf %109, %121 : vector<16x32xf32>
    %123 = vector.extract_strided_slice %31 {offsets = [2, 0, 0], sizes = [1, 16, 32], strides = [1, 1, 1]} : vector<4x16x32xf32> to vector<1x16x32xf32>
    %124 = vector.shape_cast %123 : vector<1x16x32xf32> to vector<16x32xf32>
    %125 = arith.subf %124, %122 : vector<16x32xf32>
    %cst_45 = arith.constant 0.833333313 : f32
    %126 = vector.broadcast %cst_45 : f32 to vector<16x32xf32>
    %127 = arith.mulf %125, %126 : vector<16x32xf32>
    %128 = arith.addf %122, %127 : vector<16x32xf32>
    %cst_46 = arith.constant 5.000000e-01 : f32
    %129 = vector.broadcast %cst_46 : f32 to vector<16x32xf32>
    %130 = arith.cmpf oge, %128, %129 : vector<16x32xf32>
    %131 = arith.extui %130 : vector<16x32xi1> to vector<16x32xi32>
    %132 = arith.sitofp %131 : vector<16x32xi32> to vector<16x32xf32>
    %c2 = arith.constant 2 : index
    %c0_47 = arith.constant 0 : index
    %c0_48 = arith.constant 0 : index
    %133 = vector.load %arg2[%c2, %c0_47, %c0_48] : memref<4x16x32xf32, #tpu.memory_space<vmem>>, vector<1x16x32xf32>
    %134 = vector.shape_cast %133 : vector<1x16x32xf32> to vector<16x32xf32>
    %135 = arith.addf %134, %132 : vector<16x32xf32>
    %c2_49 = arith.constant 2 : index
    %c0_50 = arith.constant 0 : index
    %c0_51 = arith.constant 0 : index
    %136 = vector.load %arg7[%c2_49, %c0_50, %c0_51] : memref<4x16x32xf32, #tpu.memory_space<vmem>>, vector<1x16x32xf32>
    %137 = vector.shape_cast %136 : vector<1x16x32xf32> to vector<16x32xf32>
    %138 = vector.shape_cast %135 : vector<16x32xf32> to vector<1x16x32xf32>
    tpu.vector_store %arg7[%c2_49, %c0_50, %c0_51], %138 {strides = array<i32>} : memref<4x16x32xf32, #tpu.memory_space<vmem>>, vector<1x16x32xf32>,
    %cst_52 = arith.constant 1.000000e+00 : f32
    %139 = vector.broadcast %cst_52 : f32 to vector<16x32xf32>
    %140 = arith.subf %139, %132 : vector<16x32xf32>
    %141 = arith.mulf %128, %140 : vector<16x32xf32>
    %142 = vector.extract_strided_slice %31 {offsets = [3, 0, 0], sizes = [1, 16, 32], strides = [1, 1, 1]} : vector<4x16x32xf32> to vector<1x16x32xf32>
    %143 = vector.shape_cast %142 : vector<1x16x32xf32> to vector<16x32xf32>
    %144 = arith.subf %143, %141 : vector<16x32xf32>
    %cst_53 = arith.constant 0.833333313 : f32
    %145 = vector.broadcast %cst_53 : f32 to vector<16x32xf32>
    %146 = arith.mulf %144, %145 : vector<16x32xf32>
    %147 = arith.addf %141, %146 : vector<16x32xf32>
    %cst_54 = arith.constant 5.000000e-01 : f32
    %148 = vector.broadcast %cst_54 : f32 to vector<16x32xf32>
    %149 = arith.cmpf oge, %147, %148 : vector<16x32xf32>
    %150 = arith.extui %149 : vector<16x32xi1> to vector<16x32xi32>
    %151 = arith.sitofp %150 : vector<16x32xi32> to vector<16x32xf32>
    %c3 = arith.constant 3 : index
    %c0_55 = arith.constant 0 : index
    %c0_56 = arith.constant 0 : index
    %152 = vector.load %arg2[%c3, %c0_55, %c0_56] : memref<4x16x32xf32, #tpu.memory_space<vmem>>, vector<1x16x32xf32>
    %153 = vector.shape_cast %152 : vector<1x16x32xf32> to vector<16x32xf32>
    %154 = arith.addf %153, %151 : vector<16x32xf32>
    %c3_57 = arith.constant 3 : index
    %c0_58 = arith.constant 0 : index
    %c0_59 = arith.constant 0 : index
    %155 = vector.load %arg7[%c3_57, %c0_58, %c0_59] : memref<4x16x32xf32, #tpu.memory_space<vmem>>, vector<1x16x32xf32>
    %156 = vector.shape_cast %155 : vector<1x16x32xf32> to vector<16x32xf32>
    %157 = vector.shape_cast %154 : vector<16x32xf32> to vector<1x16x32xf32>
    tpu.vector_store %arg7[%c3_57, %c0_58, %c0_59], %157 {strides = array<i32>} : memref<4x16x32xf32, #tpu.memory_space<vmem>>, vector<1x16x32xf32>,
    return
  }
  func.func @transform_0(%arg0: i32) -> (i32, i32, i32) {
    %c0_i32 = arith.constant 0 : i32
    %c0_i32_0 = arith.constant 0 : i32
    %c0_i32_1 = arith.constant 0 : i32
    return %c0_i32, %arg0, %c0_i32_0 : i32, i32, i32
  }
  func.func @transform_1(%arg0: i32) -> (i32, i32, i32) {
    %c0_i32 = arith.constant 0 : i32
    %c0_i32_0 = arith.constant 0 : i32
    %c0_i32_1 = arith.constant 0 : i32
    return %c0_i32, %arg0, %c0_i32_0 : i32, i32, i32
  }
  func.func @transform_2(%arg0: i32) -> (i32, i32) {
    %c0_i32 = arith.constant 0 : i32
    %c0_i32_0 = arith.constant 0 : i32
    %c0_i32_1 = arith.constant 0 : i32
    return %c0_i32, %c0_i32_0 : i32, i32
  }
  func.func @transform_3(%arg0: i32) -> (i32, i32) {
    %c0_i32 = arith.constant 0 : i32
    %c0_i32_0 = arith.constant 0 : i32
    %c0_i32_1 = arith.constant 0 : i32
    return %c0_i32, %c0_i32_0 : i32, i32
  }
  func.func @transform_4(%arg0: i32) -> (i32, i32) {
    %c0_i32 = arith.constant 0 : i32
    %c0_i32_0 = arith.constant 0 : i32
    %c0_i32_1 = arith.constant 0 : i32
    return %c0_i32, %c0_i32_0 : i32, i32
  }
  func.func @transform_5(%arg0: i32) -> (i32, i32) {
    %c0_i32 = arith.constant 0 : i32
    %c0_i32_0 = arith.constant 0 : i32
    %c0_i32_1 = arith.constant 0 : i32
    return %c0_i32, %c0_i32_0 : i32, i32
  }
  func.func @transform_6(%arg0: i32) -> (i32, i32, i32) {
    %c0_i32 = arith.constant 0 : i32
    %c0_i32_0 = arith.constant 0 : i32
    %c0_i32_1 = arith.constant 0 : i32
    return %c0_i32, %arg0, %c0_i32_0 : i32, i32, i32
  }
}

module attributes {stable_mosaic.version = 11 : i64} {
  func.func @_linear_ln_lif_kernel(%arg0: i32, %arg1: memref<4x16x32xf32, #tpu.memory_space<vmem>>, %arg2: memref<32x128xf32, #tpu.memory_space<vmem>>, %arg3: memref<1x128xf32, #tpu.memory_space<vmem>>, %arg4: memref<1x128xf32, #tpu.memory_space<vmem>>, %arg5: memref<1x128xf32, #tpu.memory_space<vmem>>, %arg6: memref<4x16x128xf32, #tpu.memory_space<vmem>>) attributes {dimension_semantics = [#tpu.dimension_semantics<parallel>], iteration_bounds = array<i64: 1>, scalar_prefetch = 0 : i64, scratch_operands = 0 : i64, tpu.core_type = #tpu.core_type<tc>, window_params = [{transform_indices = @transform_0, window_bounds = array<i64: 4, 16, 32>}, {pipeline_mode = #tpu.pipeline_mode<synchronous>, transform_indices = @transform_1, window_bounds = array<i64: 32, 128>}, {pipeline_mode = #tpu.pipeline_mode<synchronous>, transform_indices = @transform_2, window_bounds = array<i64: 1, 128>}, {pipeline_mode = #tpu.pipeline_mode<synchronous>, transform_indices = @transform_3, window_bounds = array<i64: 1, 128>}, {pipeline_mode = #tpu.pipeline_mode<synchronous>, transform_indices = @transform_4, window_bounds = array<i64: 1, 128>}, {transform_indices = @transform_5, window_bounds = array<i64: 4, 16, 128>}]} {
    %c0 = arith.constant 0 : index
    %c0_0 = arith.constant 0 : index
    %c0_1 = arith.constant 0 : index
    %0 = vector.load %arg1[%c0, %c0_0, %c0_1] : memref<4x16x32xf32, #tpu.memory_space<vmem>>, vector<4x16x32xf32>
    %1 = vector.shape_cast %0 : vector<4x16x32xf32> to vector<64x32xf32>
    %c0_2 = arith.constant 0 : index
    %c0_3 = arith.constant 0 : index
    %2 = vector.load %arg2[%c0_2, %c0_3] : memref<32x128xf32, #tpu.memory_space<vmem>>, vector<32x128xf32>
    %cst = arith.constant dense<0.000000e+00> : vector<64x128xf32>
    %3 = tpu.matmul %1, %2, %cst {dimension_numbers = #tpu.dot_dimension_numbers<[1], [0], [0], [1], [0, 0, 1, 1], [], []>} : vector<64x32xf32>, vector<32x128xf32>, vector<64x128xf32> -> vector<64x128xf32>
    %c0_4 = arith.constant 0 : index
    %c0_5 = arith.constant 0 : index
    %4 = vector.load %arg3[%c0_4, %c0_5] : memref<1x128xf32, #tpu.memory_space<vmem>>, vector<1x128xf32>
    %5 = vector.broadcast %4 : vector<1x128xf32> to vector<64x128xf32>
    %6 = arith.addf %3, %5 : vector<64x128xf32>
    %cst_6 = arith.constant dense<0.000000e+00> : vector<64xf32>
    %7 = vector.multi_reduction <add>, %6, %cst_6 [1] : vector<64x128xf32> to vector<64xf32>
    %8 = vector.shape_cast %7 : vector<64xf32> to vector<64x1xf32>
    %cst_7 = arith.constant 1.280000e+02 : f32
    %9 = vector.broadcast %cst_7 : f32 to vector<64x1xf32>
    %10 = arith.divf %8, %9 : vector<64x1xf32>
    %11 = vector.broadcast %10 : vector<64x1xf32> to vector<64x128xf32>
    %12 = arith.subf %6, %11 : vector<64x128xf32>
    %13 = arith.mulf %12, %12 : vector<64x128xf32>
    %cst_8 = arith.constant dense<0.000000e+00> : vector<64xf32>
    %14 = vector.multi_reduction <add>, %13, %cst_8 [1] : vector<64x128xf32> to vector<64xf32>
    %15 = vector.shape_cast %14 : vector<64xf32> to vector<64x1xf32>
    %cst_9 = arith.constant 1.280000e+02 : f32
    %16 = vector.broadcast %cst_9 : f32 to vector<64x1xf32>
    %17 = arith.divf %15, %16 : vector<64x1xf32>
    %18 = vector.broadcast %10 : vector<64x1xf32> to vector<64x128xf32>
    %19 = arith.subf %6, %18 : vector<64x128xf32>
    %cst_10 = arith.constant 9.99999996E-13 : f32
    %20 = vector.broadcast %cst_10 : f32 to vector<64x1xf32>
    %21 = arith.addf %17, %20 : vector<64x1xf32>
    %22 = math.rsqrt %21 : vector<64x1xf32>
    %23 = vector.broadcast %22 : vector<64x1xf32> to vector<64x128xf32>
    %24 = arith.mulf %19, %23 : vector<64x128xf32>
    %c0_11 = arith.constant 0 : index
    %c0_12 = arith.constant 0 : index
    %25 = vector.load %arg4[%c0_11, %c0_12] : memref<1x128xf32, #tpu.memory_space<vmem>>, vector<1x128xf32>
    %26 = vector.broadcast %25 : vector<1x128xf32> to vector<64x128xf32>
    %27 = arith.mulf %24, %26 : vector<64x128xf32>
    %c0_13 = arith.constant 0 : index
    %c0_14 = arith.constant 0 : index
    %28 = vector.load %arg5[%c0_13, %c0_14] : memref<1x128xf32, #tpu.memory_space<vmem>>, vector<1x128xf32>
    %29 = vector.broadcast %28 : vector<1x128xf32> to vector<64x128xf32>
    %30 = arith.addf %27, %29 : vector<64x128xf32>
    %31 = vector.shape_cast %30 : vector<64x128xf32> to vector<4x16x128xf32>
    %cst_15 = arith.constant 0.000000e+00 : f32
    %32 = vector.broadcast %cst_15 : f32 to vector<16x128xf32>
    %33 = vector.extract_strided_slice %31 {offsets = [0, 0, 0], sizes = [1, 16, 128], strides = [1, 1, 1]} : vector<4x16x128xf32> to vector<1x16x128xf32>
    %34 = vector.shape_cast %33 : vector<1x16x128xf32> to vector<16x128xf32>
    %35 = arith.subf %34, %32 : vector<16x128xf32>
    %cst_16 = arith.constant 0.833333313 : f32
    %36 = vector.broadcast %cst_16 : f32 to vector<16x128xf32>
    %37 = arith.mulf %35, %36 : vector<16x128xf32>
    %38 = arith.addf %32, %37 : vector<16x128xf32>
    %cst_17 = arith.constant 1.000000e+00 : f32
    %39 = vector.broadcast %cst_17 : f32 to vector<16x128xf32>
    %40 = arith.cmpf oge, %38, %39 : vector<16x128xf32>
    %41 = arith.extui %40 : vector<16x128xi1> to vector<16x128xi32>
    %42 = arith.sitofp %41 : vector<16x128xi32> to vector<16x128xf32>
    %c0_18 = arith.constant 0 : index
    %c0_19 = arith.constant 0 : index
    %c0_20 = arith.constant 0 : index
    %43 = vector.load %arg6[%c0_18, %c0_19, %c0_20] : memref<4x16x128xf32, #tpu.memory_space<vmem>>, vector<1x16x128xf32>
    %44 = vector.shape_cast %43 : vector<1x16x128xf32> to vector<16x128xf32>
    %45 = vector.shape_cast %42 : vector<16x128xf32> to vector<1x16x128xf32>
    tpu.vector_store %arg6[%c0_18, %c0_19, %c0_20], %45 {strides = array<i32>} : memref<4x16x128xf32, #tpu.memory_space<vmem>>, vector<1x16x128xf32>,
    %cst_21 = arith.constant 1.000000e+00 : f32
    %46 = vector.broadcast %cst_21 : f32 to vector<16x128xf32>
    %47 = arith.subf %46, %42 : vector<16x128xf32>
    %48 = arith.mulf %38, %47 : vector<16x128xf32>
    %49 = vector.extract_strided_slice %31 {offsets = [1, 0, 0], sizes = [1, 16, 128], strides = [1, 1, 1]} : vector<4x16x128xf32> to vector<1x16x128xf32>
    %50 = vector.shape_cast %49 : vector<1x16x128xf32> to vector<16x128xf32>
    %51 = arith.subf %50, %48 : vector<16x128xf32>
    %cst_22 = arith.constant 0.833333313 : f32
    %52 = vector.broadcast %cst_22 : f32 to vector<16x128xf32>
    %53 = arith.mulf %51, %52 : vector<16x128xf32>
    %54 = arith.addf %48, %53 : vector<16x128xf32>
    %cst_23 = arith.constant 1.000000e+00 : f32
    %55 = vector.broadcast %cst_23 : f32 to vector<16x128xf32>
    %56 = arith.cmpf oge, %54, %55 : vector<16x128xf32>
    %57 = arith.extui %56 : vector<16x128xi1> to vector<16x128xi32>
    %58 = arith.sitofp %57 : vector<16x128xi32> to vector<16x128xf32>
    %c1 = arith.constant 1 : index
    %c0_24 = arith.constant 0 : index
    %c0_25 = arith.constant 0 : index
    %59 = vector.load %arg6[%c1, %c0_24, %c0_25] : memref<4x16x128xf32, #tpu.memory_space<vmem>>, vector<1x16x128xf32>
    %60 = vector.shape_cast %59 : vector<1x16x128xf32> to vector<16x128xf32>
    %61 = vector.shape_cast %58 : vector<16x128xf32> to vector<1x16x128xf32>
    tpu.vector_store %arg6[%c1, %c0_24, %c0_25], %61 {strides = array<i32>} : memref<4x16x128xf32, #tpu.memory_space<vmem>>, vector<1x16x128xf32>,
    %cst_26 = arith.constant 1.000000e+00 : f32
    %62 = vector.broadcast %cst_26 : f32 to vector<16x128xf32>
    %63 = arith.subf %62, %58 : vector<16x128xf32>
    %64 = arith.mulf %54, %63 : vector<16x128xf32>
    %65 = vector.extract_strided_slice %31 {offsets = [2, 0, 0], sizes = [1, 16, 128], strides = [1, 1, 1]} : vector<4x16x128xf32> to vector<1x16x128xf32>
    %66 = vector.shape_cast %65 : vector<1x16x128xf32> to vector<16x128xf32>
    %67 = arith.subf %66, %64 : vector<16x128xf32>
    %cst_27 = arith.constant 0.833333313 : f32
    %68 = vector.broadcast %cst_27 : f32 to vector<16x128xf32>
    %69 = arith.mulf %67, %68 : vector<16x128xf32>
    %70 = arith.addf %64, %69 : vector<16x128xf32>
    %cst_28 = arith.constant 1.000000e+00 : f32
    %71 = vector.broadcast %cst_28 : f32 to vector<16x128xf32>
    %72 = arith.cmpf oge, %70, %71 : vector<16x128xf32>
    %73 = arith.extui %72 : vector<16x128xi1> to vector<16x128xi32>
    %74 = arith.sitofp %73 : vector<16x128xi32> to vector<16x128xf32>
    %c2 = arith.constant 2 : index
    %c0_29 = arith.constant 0 : index
    %c0_30 = arith.constant 0 : index
    %75 = vector.load %arg6[%c2, %c0_29, %c0_30] : memref<4x16x128xf32, #tpu.memory_space<vmem>>, vector<1x16x128xf32>
    %76 = vector.shape_cast %75 : vector<1x16x128xf32> to vector<16x128xf32>
    %77 = vector.shape_cast %74 : vector<16x128xf32> to vector<1x16x128xf32>
    tpu.vector_store %arg6[%c2, %c0_29, %c0_30], %77 {strides = array<i32>} : memref<4x16x128xf32, #tpu.memory_space<vmem>>, vector<1x16x128xf32>,
    %cst_31 = arith.constant 1.000000e+00 : f32
    %78 = vector.broadcast %cst_31 : f32 to vector<16x128xf32>
    %79 = arith.subf %78, %74 : vector<16x128xf32>
    %80 = arith.mulf %70, %79 : vector<16x128xf32>
    %81 = vector.extract_strided_slice %31 {offsets = [3, 0, 0], sizes = [1, 16, 128], strides = [1, 1, 1]} : vector<4x16x128xf32> to vector<1x16x128xf32>
    %82 = vector.shape_cast %81 : vector<1x16x128xf32> to vector<16x128xf32>
    %83 = arith.subf %82, %80 : vector<16x128xf32>
    %cst_32 = arith.constant 0.833333313 : f32
    %84 = vector.broadcast %cst_32 : f32 to vector<16x128xf32>
    %85 = arith.mulf %83, %84 : vector<16x128xf32>
    %86 = arith.addf %80, %85 : vector<16x128xf32>
    %cst_33 = arith.constant 1.000000e+00 : f32
    %87 = vector.broadcast %cst_33 : f32 to vector<16x128xf32>
    %88 = arith.cmpf oge, %86, %87 : vector<16x128xf32>
    %89 = arith.extui %88 : vector<16x128xi1> to vector<16x128xi32>
    %90 = arith.sitofp %89 : vector<16x128xi32> to vector<16x128xf32>
    %c3 = arith.constant 3 : index
    %c0_34 = arith.constant 0 : index
    %c0_35 = arith.constant 0 : index
    %91 = vector.load %arg6[%c3, %c0_34, %c0_35] : memref<4x16x128xf32, #tpu.memory_space<vmem>>, vector<1x16x128xf32>
    %92 = vector.shape_cast %91 : vector<1x16x128xf32> to vector<16x128xf32>
    %93 = vector.shape_cast %90 : vector<16x128xf32> to vector<1x16x128xf32>
    tpu.vector_store %arg6[%c3, %c0_34, %c0_35], %93 {strides = array<i32>} : memref<4x16x128xf32, #tpu.memory_space<vmem>>, vector<1x16x128xf32>,
    return
  }
  func.func @transform_0(%arg0: i32) -> (i32, i32, i32) {
    %c0_i32 = arith.constant 0 : i32
    %c0_i32_0 = arith.constant 0 : i32
    %c0_i32_1 = arith.constant 0 : i32
    return %c0_i32, %arg0, %c0_i32_0 : i32, i32, i32
  }
  func.func @transform_1(%arg0: i32) -> (i32, i32) {
    %c0_i32 = arith.constant 0 : i32
    %c0_i32_0 = arith.constant 0 : i32
    %c0_i32_1 = arith.constant 0 : i32
    return %c0_i32, %c0_i32_0 : i32, i32
  }
  func.func @transform_2(%arg0: i32) -> (i32, i32) {
    %c0_i32 = arith.constant 0 : i32
    %c0_i32_0 = arith.constant 0 : i32
    %c0_i32_1 = arith.constant 0 : i32
    return %c0_i32, %c0_i32_0 : i32, i32
  }
  func.func @transform_3(%arg0: i32) -> (i32, i32) {
    %c0_i32 = arith.constant 0 : i32
    %c0_i32_0 = arith.constant 0 : i32
    %c0_i32_1 = arith.constant 0 : i32
    return %c0_i32, %c0_i32_0 : i32, i32
  }
  func.func @transform_4(%arg0: i32) -> (i32, i32) {
    %c0_i32 = arith.constant 0 : i32
    %c0_i32_0 = arith.constant 0 : i32
    %c0_i32_1 = arith.constant 0 : i32
    return %c0_i32, %c0_i32_0 : i32, i32
  }
  func.func @transform_5(%arg0: i32) -> (i32, i32, i32) {
    %c0_i32 = arith.constant 0 : i32
    %c0_i32_0 = arith.constant 0 : i32
    %c0_i32_1 = arith.constant 0 : i32
    return %c0_i32, %arg0, %c0_i32_0 : i32, i32, i32
  }
}

module attributes {stable_mosaic.version = 11 : i64} {
  func.func @_linear_ln_lif_res_kernel(%arg0: i32, %arg1: memref<4x16x128xf32, #tpu.memory_space<vmem>>, %arg2: memref<128x32xf32, #tpu.memory_space<vmem>>, %arg3: memref<1x32xf32, #tpu.memory_space<vmem>>, %arg4: memref<1x32xf32, #tpu.memory_space<vmem>>, %arg5: memref<1x32xf32, #tpu.memory_space<vmem>>, %arg6: memref<4x16x32xf32, #tpu.memory_space<vmem>>, %arg7: memref<4x16x32xf32, #tpu.memory_space<vmem>>) attributes {dimension_semantics = [#tpu.dimension_semantics<parallel>], iteration_bounds = array<i64: 1>, scalar_prefetch = 0 : i64, scratch_operands = 0 : i64, tpu.core_type = #tpu.core_type<tc>, window_params = [{transform_indices = @transform_0, window_bounds = array<i64: 4, 16, 128>}, {pipeline_mode = #tpu.pipeline_mode<synchronous>, transform_indices = @transform_1, window_bounds = array<i64: 128, 32>}, {pipeline_mode = #tpu.pipeline_mode<synchronous>, transform_indices = @transform_2, window_bounds = array<i64: 1, 32>}, {pipeline_mode = #tpu.pipeline_mode<synchronous>, transform_indices = @transform_3, window_bounds = array<i64: 1, 32>}, {pipeline_mode = #tpu.pipeline_mode<synchronous>, transform_indices = @transform_4, window_bounds = array<i64: 1, 32>}, {transform_indices = @transform_5, window_bounds = array<i64: 4, 16, 32>}, {transform_indices = @transform_6, window_bounds = array<i64: 4, 16, 32>}]} {
    %c0 = arith.constant 0 : index
    %c0_0 = arith.constant 0 : index
    %c0_1 = arith.constant 0 : index
    %0 = vector.load %arg1[%c0, %c0_0, %c0_1] : memref<4x16x128xf32, #tpu.memory_space<vmem>>, vector<4x16x128xf32>
    %1 = vector.shape_cast %0 : vector<4x16x128xf32> to vector<64x128xf32>
    %c0_2 = arith.constant 0 : index
    %c0_3 = arith.constant 0 : index
    %2 = vector.load %arg2[%c0_2, %c0_3] : memref<128x32xf32, #tpu.memory_space<vmem>>, vector<128x32xf32>
    %cst = arith.constant dense<0.000000e+00> : vector<64x32xf32>
    %3 = tpu.matmul %1, %2, %cst {dimension_numbers = #tpu.dot_dimension_numbers<[1], [0], [0], [1], [0, 0, 1, 1], [], []>} : vector<64x128xf32>, vector<128x32xf32>, vector<64x32xf32> -> vector<64x32xf32>
    %c0_4 = arith.constant 0 : index
    %c0_5 = arith.constant 0 : index
    %4 = vector.load %arg3[%c0_4, %c0_5] : memref<1x32xf32, #tpu.memory_space<vmem>>, vector<1x32xf32>
    %5 = vector.broadcast %4 : vector<1x32xf32> to vector<64x32xf32>
    %6 = arith.addf %3, %5 : vector<64x32xf32>
    %cst_6 = arith.constant dense<0.000000e+00> : vector<64xf32>
    %7 = vector.multi_reduction <add>, %6, %cst_6 [1] : vector<64x32xf32> to vector<64xf32>
    %8 = vector.shape_cast %7 : vector<64xf32> to vector<64x1xf32>
    %cst_7 = arith.constant 3.200000e+01 : f32
    %9 = vector.broadcast %cst_7 : f32 to vector<64x1xf32>
    %10 = arith.divf %8, %9 : vector<64x1xf32>
    %11 = vector.broadcast %10 : vector<64x1xf32> to vector<64x32xf32>
    %12 = arith.subf %6, %11 : vector<64x32xf32>
    %13 = arith.mulf %12, %12 : vector<64x32xf32>
    %cst_8 = arith.constant dense<0.000000e+00> : vector<64xf32>
    %14 = vector.multi_reduction <add>, %13, %cst_8 [1] : vector<64x32xf32> to vector<64xf32>
    %15 = vector.shape_cast %14 : vector<64xf32> to vector<64x1xf32>
    %cst_9 = arith.constant 3.200000e+01 : f32
    %16 = vector.broadcast %cst_9 : f32 to vector<64x1xf32>
    %17 = arith.divf %15, %16 : vector<64x1xf32>
    %18 = vector.broadcast %10 : vector<64x1xf32> to vector<64x32xf32>
    %19 = arith.subf %6, %18 : vector<64x32xf32>
    %cst_10 = arith.constant 9.99999996E-13 : f32
    %20 = vector.broadcast %cst_10 : f32 to vector<64x1xf32>
    %21 = arith.addf %17, %20 : vector<64x1xf32>
    %22 = math.rsqrt %21 : vector<64x1xf32>
    %23 = vector.broadcast %22 : vector<64x1xf32> to vector<64x32xf32>
    %24 = arith.mulf %19, %23 : vector<64x32xf32>
    %c0_11 = arith.constant 0 : index
    %c0_12 = arith.constant 0 : index
    %25 = vector.load %arg4[%c0_11, %c0_12] : memref<1x32xf32, #tpu.memory_space<vmem>>, vector<1x32xf32>
    %26 = vector.broadcast %25 : vector<1x32xf32> to vector<64x32xf32>
    %27 = arith.mulf %24, %26 : vector<64x32xf32>
    %c0_13 = arith.constant 0 : index
    %c0_14 = arith.constant 0 : index
    %28 = vector.load %arg5[%c0_13, %c0_14] : memref<1x32xf32, #tpu.memory_space<vmem>>, vector<1x32xf32>
    %29 = vector.broadcast %28 : vector<1x32xf32> to vector<64x32xf32>
    %30 = arith.addf %27, %29 : vector<64x32xf32>
    %31 = vector.shape_cast %30 : vector<64x32xf32> to vector<4x16x32xf32>
    %cst_15 = arith.constant 0.000000e+00 : f32
    %32 = vector.broadcast %cst_15 : f32 to vector<16x32xf32>
    %33 = vector.extract_strided_slice %31 {offsets = [0, 0, 0], sizes = [1, 16, 32], strides = [1, 1, 1]} : vector<4x16x32xf32> to vector<1x16x32xf32>
    %34 = vector.shape_cast %33 : vector<1x16x32xf32> to vector<16x32xf32>
    %35 = arith.subf %34, %32 : vector<16x32xf32>
    %cst_16 = arith.constant 0.833333313 : f32
    %36 = vector.broadcast %cst_16 : f32 to vector<16x32xf32>
    %37 = arith.mulf %35, %36 : vector<16x32xf32>
    %38 = arith.addf %32, %37 : vector<16x32xf32>
    %cst_17 = arith.constant 1.000000e+00 : f32
    %39 = vector.broadcast %cst_17 : f32 to vector<16x32xf32>
    %40 = arith.cmpf oge, %38, %39 : vector<16x32xf32>
    %41 = arith.extui %40 : vector<16x32xi1> to vector<16x32xi32>
    %42 = arith.sitofp %41 : vector<16x32xi32> to vector<16x32xf32>
    %c0_18 = arith.constant 0 : index
    %c0_19 = arith.constant 0 : index
    %c0_20 = arith.constant 0 : index
    %43 = vector.load %arg6[%c0_18, %c0_19, %c0_20] : memref<4x16x32xf32, #tpu.memory_space<vmem>>, vector<1x16x32xf32>
    %44 = vector.shape_cast %43 : vector<1x16x32xf32> to vector<16x32xf32>
    %45 = arith.addf %44, %42 : vector<16x32xf32>
    %c0_21 = arith.constant 0 : index
    %c0_22 = arith.constant 0 : index
    %c0_23 = arith.constant 0 : index
    %46 = vector.load %arg7[%c0_21, %c0_22, %c0_23] : memref<4x16x32xf32, #tpu.memory_space<vmem>>, vector<1x16x32xf32>
    %47 = vector.shape_cast %46 : vector<1x16x32xf32> to vector<16x32xf32>
    %48 = vector.shape_cast %45 : vector<16x32xf32> to vector<1x16x32xf32>
    tpu.vector_store %arg7[%c0_21, %c0_22, %c0_23], %48 {strides = array<i32>} : memref<4x16x32xf32, #tpu.memory_space<vmem>>, vector<1x16x32xf32>,
    %cst_24 = arith.constant 1.000000e+00 : f32
    %49 = vector.broadcast %cst_24 : f32 to vector<16x32xf32>
    %50 = arith.subf %49, %42 : vector<16x32xf32>
    %51 = arith.mulf %38, %50 : vector<16x32xf32>
    %52 = vector.extract_strided_slice %31 {offsets = [1, 0, 0], sizes = [1, 16, 32], strides = [1, 1, 1]} : vector<4x16x32xf32> to vector<1x16x32xf32>
    %53 = vector.shape_cast %52 : vector<1x16x32xf32> to vector<16x32xf32>
    %54 = arith.subf %53, %51 : vector<16x32xf32>
    %cst_25 = arith.constant 0.833333313 : f32
    %55 = vector.broadcast %cst_25 : f32 to vector<16x32xf32>
    %56 = arith.mulf %54, %55 : vector<16x32xf32>
    %57 = arith.addf %51, %56 : vector<16x32xf32>
    %cst_26 = arith.constant 1.000000e+00 : f32
    %58 = vector.broadcast %cst_26 : f32 to vector<16x32xf32>
    %59 = arith.cmpf oge, %57, %58 : vector<16x32xf32>
    %60 = arith.extui %59 : vector<16x32xi1> to vector<16x32xi32>
    %61 = arith.sitofp %60 : vector<16x32xi32> to vector<16x32xf32>
    %c1 = arith.constant 1 : index
    %c0_27 = arith.constant 0 : index
    %c0_28 = arith.constant 0 : index
    %62 = vector.load %arg6[%c1, %c0_27, %c0_28] : memref<4x16x32xf32, #tpu.memory_space<vmem>>, vector<1x16x32xf32>
    %63 = vector.shape_cast %62 : vector<1x16x32xf32> to vector<16x32xf32>
    %64 = arith.addf %63, %61 : vector<16x32xf32>
    %c1_29 = arith.constant 1 : index
    %c0_30 = arith.constant 0 : index
    %c0_31 = arith.constant 0 : index
    %65 = vector.load %arg7[%c1_29, %c0_30, %c0_31] : memref<4x16x32xf32, #tpu.memory_space<vmem>>, vector<1x16x32xf32>
    %66 = vector.shape_cast %65 : vector<1x16x32xf32> to vector<16x32xf32>
    %67 = vector.shape_cast %64 : vector<16x32xf32> to vector<1x16x32xf32>
    tpu.vector_store %arg7[%c1_29, %c0_30, %c0_31], %67 {strides = array<i32>} : memref<4x16x32xf32, #tpu.memory_space<vmem>>, vector<1x16x32xf32>,
    %cst_32 = arith.constant 1.000000e+00 : f32
    %68 = vector.broadcast %cst_32 : f32 to vector<16x32xf32>
    %69 = arith.subf %68, %61 : vector<16x32xf32>
    %70 = arith.mulf %57, %69 : vector<16x32xf32>
    %71 = vector.extract_strided_slice %31 {offsets = [2, 0, 0], sizes = [1, 16, 32], strides = [1, 1, 1]} : vector<4x16x32xf32> to vector<1x16x32xf32>
    %72 = vector.shape_cast %71 : vector<1x16x32xf32> to vector<16x32xf32>
    %73 = arith.subf %72, %70 : vector<16x32xf32>
    %cst_33 = arith.constant 0.833333313 : f32
    %74 = vector.broadcast %cst_33 : f32 to vector<16x32xf32>
    %75 = arith.mulf %73, %74 : vector<16x32xf32>
    %76 = arith.addf %70, %75 : vector<16x32xf32>
    %cst_34 = arith.constant 1.000000e+00 : f32
    %77 = vector.broadcast %cst_34 : f32 to vector<16x32xf32>
    %78 = arith.cmpf oge, %76, %77 : vector<16x32xf32>
    %79 = arith.extui %78 : vector<16x32xi1> to vector<16x32xi32>
    %80 = arith.sitofp %79 : vector<16x32xi32> to vector<16x32xf32>
    %c2 = arith.constant 2 : index
    %c0_35 = arith.constant 0 : index
    %c0_36 = arith.constant 0 : index
    %81 = vector.load %arg6[%c2, %c0_35, %c0_36] : memref<4x16x32xf32, #tpu.memory_space<vmem>>, vector<1x16x32xf32>
    %82 = vector.shape_cast %81 : vector<1x16x32xf32> to vector<16x32xf32>
    %83 = arith.addf %82, %80 : vector<16x32xf32>
    %c2_37 = arith.constant 2 : index
    %c0_38 = arith.constant 0 : index
    %c0_39 = arith.constant 0 : index
    %84 = vector.load %arg7[%c2_37, %c0_38, %c0_39] : memref<4x16x32xf32, #tpu.memory_space<vmem>>, vector<1x16x32xf32>
    %85 = vector.shape_cast %84 : vector<1x16x32xf32> to vector<16x32xf32>
    %86 = vector.shape_cast %83 : vector<16x32xf32> to vector<1x16x32xf32>
    tpu.vector_store %arg7[%c2_37, %c0_38, %c0_39], %86 {strides = array<i32>} : memref<4x16x32xf32, #tpu.memory_space<vmem>>, vector<1x16x32xf32>,
    %cst_40 = arith.constant 1.000000e+00 : f32
    %87 = vector.broadcast %cst_40 : f32 to vector<16x32xf32>
    %88 = arith.subf %87, %80 : vector<16x32xf32>
    %89 = arith.mulf %76, %88 : vector<16x32xf32>
    %90 = vector.extract_strided_slice %31 {offsets = [3, 0, 0], sizes = [1, 16, 32], strides = [1, 1, 1]} : vector<4x16x32xf32> to vector<1x16x32xf32>
    %91 = vector.shape_cast %90 : vector<1x16x32xf32> to vector<16x32xf32>
    %92 = arith.subf %91, %89 : vector<16x32xf32>
    %cst_41 = arith.constant 0.833333313 : f32
    %93 = vector.broadcast %cst_41 : f32 to vector<16x32xf32>
    %94 = arith.mulf %92, %93 : vector<16x32xf32>
    %95 = arith.addf %89, %94 : vector<16x32xf32>
    %cst_42 = arith.constant 1.000000e+00 : f32
    %96 = vector.broadcast %cst_42 : f32 to vector<16x32xf32>
    %97 = arith.cmpf oge, %95, %96 : vector<16x32xf32>
    %98 = arith.extui %97 : vector<16x32xi1> to vector<16x32xi32>
    %99 = arith.sitofp %98 : vector<16x32xi32> to vector<16x32xf32>
    %c3 = arith.constant 3 : index
    %c0_43 = arith.constant 0 : index
    %c0_44 = arith.constant 0 : index
    %100 = vector.load %arg6[%c3, %c0_43, %c0_44] : memref<4x16x32xf32, #tpu.memory_space<vmem>>, vector<1x16x32xf32>
    %101 = vector.shape_cast %100 : vector<1x16x32xf32> to vector<16x32xf32>
    %102 = arith.addf %101, %99 : vector<16x32xf32>
    %c3_45 = arith.constant 3 : index
    %c0_46 = arith.constant 0 : index
    %c0_47 = arith.constant 0 : index
    %103 = vector.load %arg7[%c3_45, %c0_46, %c0_47] : memref<4x16x32xf32, #tpu.memory_space<vmem>>, vector<1x16x32xf32>
    %104 = vector.shape_cast %103 : vector<1x16x32xf32> to vector<16x32xf32>
    %105 = vector.shape_cast %102 : vector<16x32xf32> to vector<1x16x32xf32>
    tpu.vector_store %arg7[%c3_45, %c0_46, %c0_47], %105 {strides = array<i32>} : memref<4x16x32xf32, #tpu.memory_space<vmem>>, vector<1x16x32xf32>,
    return
  }
  func.func @transform_0(%arg0: i32) -> (i32, i32, i32) {
    %c0_i32 = arith.constant 0 : i32
    %c0_i32_0 = arith.constant 0 : i32
    %c0_i32_1 = arith.constant 0 : i32
    return %c0_i32, %arg0, %c0_i32_0 : i32, i32, i32
  }
  func.func @transform_1(%arg0: i32) -> (i32, i32) {
    %c0_i32 = arith.constant 0 : i32
    %c0_i32_0 = arith.constant 0 : i32
    %c0_i32_1 = arith.constant 0 : i32
    return %c0_i32, %c0_i32_0 : i32, i32
  }
  func.func @transform_2(%arg0: i32) -> (i32, i32) {
    %c0_i32 = arith.constant 0 : i32
    %c0_i32_0 = arith.constant 0 : i32
    %c0_i32_1 = arith.constant 0 : i32
    return %c0_i32, %c0_i32_0 : i32, i32
  }
  func.func @transform_3(%arg0: i32) -> (i32, i32) {
    %c0_i32 = arith.constant 0 : i32
    %c0_i32_0 = arith.constant 0 : i32
    %c0_i32_1 = arith.constant 0 : i32
    return %c0_i32, %c0_i32_0 : i32, i32
  }
  func.func @transform_4(%arg0: i32) -> (i32, i32) {
    %c0_i32 = arith.constant 0 : i32
    %c0_i32_0 = arith.constant 0 : i32
    %c0_i32_1 = arith.constant 0 : i32
    return %c0_i32, %c0_i32_0 : i32, i32
  }
  func.func @transform_5(%arg0: i32) -> (i32, i32, i32) {
    %c0_i32 = arith.constant 0 : i32
    %c0_i32_0 = arith.constant 0 : i32
    %c0_i32_1 = arith.constant 0 : i32
    return %c0_i32, %arg0, %c0_i32_0 : i32, i32, i32
  }
  func.func @transform_6(%arg0: i32) -> (i32, i32, i32) {
    %c0_i32 = arith.constant 0 : i32
    %c0_i32_0 = arith.constant 0 : i32
    %c0_i32_1 = arith.constant 0 : i32
    return %c0_i32, %arg0, %c0_i32_0 : i32, i32, i32
  }
}

</mosaic_0001>

<bundles_post_ra>
// kernel: tile.19
= control target key start
LH: loop header
LB: loop body
LE: loop exit
PB: predicated region body
PF: predicated region fallthrough
CT: control target
= control target key end

     0   :  { %vm8_vm0 = vcmask 261120   ;;  %s33_s8 = smov 32   ;;  %vm14_vm1 = vcmask 785920   ;;  %vm20_vm2 = vcmask 523520   ;;  %s50_s0 = inlined_call_operand.vmem [shape: f32[3,32], index: 0, kind: input, shape index: {}]   ;;  %s51_s1 = inlined_call_operand.vmem [shape: f32[1,96], index: 1, kind: output, shape index: {}]  }
   0x1   :  { %v5_v0 = vld [vmem:[%s50_s0] sm:$0xf]  ;;  %s32_s0 = smov 64  }
   0x2   :  { %6 = vst [vmem:[#allocation1] sm:$0xf] %v5_v0 }
   0x9   :  { %v11_v1 = vld [vmem:[#allocation1 + $0x2] sm:$0x1]   ;;  %v7_v2 = vld [vmem:[#allocation1] sm:$0x1]   ;;  %v17_v3 = vld [vmem:[#allocation1 + $0x1] sm:$0x1]  }
   0xa   :  { %12 = vrot.lane.b32.xlu0 %v11_v1, %s32_s0  ;;  %9 = vst.msk [vmem:[#allocation0] sm:$0x1] %vm8_vm0, %v7_v2  }
   0xe   :  { %18 = vrot.lane.b32.xlu0 %v17_v3, %s33_s8 }
  0x7c   :  { %v13_v4 = vpop.permute.xlu0 %12  }
  0x7d   :  { %15 = vst.msk [vmem:[#allocation0] sm:$0x1] %vm14_vm1, %v13_v4  }
  0x80   :  { %v19_v5 = vpop.permute.xlu0 %18  }
  0x81   :  { %21 = vst.msk [vmem:[#allocation0] sm:$0x1] %vm20_vm2, %v19_v5  }
  0x88   :  { %v26_v6 = vld [vmem:[#allocation0] sm:$0x1] }
  0x89   :  { %29 = vst [vmem:[%s51_s1] sm:$0x1] %v26_v6 }

// kernel: tile.17
= control target key start
LH: loop header
LB: loop body
LE: loop exit
PB: predicated region body
PF: predicated region fallthrough
CT: control target
= control target key end

     0   :  { %s22_s0 = inlined_call_operand.vmem [shape: f32[32], index: 0, kind: input, shape index: {}]   ;;  %s23_s1 = inlined_call_operand.vmem [shape: f32[3,32], index: 1, kind: output, shape index: {}]  }
   0x1   :  { %v4_v0 = vld [vmem:[%s22_s0] ss:$0 sm:$0xff] }
   0x2   :  { %5 = vst [vmem:[%s23_s1] sm:$0xf] %v4_v0 }

// kernel: block_forward.5
= control target key start
LH: loop header
LB: loop body
LE: loop exit
PB: predicated region body
PF: predicated region fallthrough
CT: control target
= control target key end

     0   :  { %10 = vsyncpa [#allocation3], 0  ;;  %s879_s18 = smov [#allocation2]   ;;  %s1316_s0 = inlined_call_operand.hbm [shape: f32[4,16,32], index: 0, kind: input, shape index: {}]   ;;  %s1317_s1 = inlined_call_operand.vmem [shape: f32[32,96], index: 1, kind: input, shape index: {}]   ;;  %s1318_s2 = inlined_call_operand.vmem [shape: f32[1,96], index: 2, kind: input, shape index: {}]   ;;  %s1319_s3 = inlined_call_operand.vmem [shape: f32[1,96], index: 3, kind: input, shape index: {}]   ;;  %s1320_s4 = inlined_call_operand.vmem [shape: f32[1,96], index: 4, kind: input, shape index: {}]   ;;  %s1321_s5 = inlined_call_operand.vmem [shape: f32[4,16,96], index: 5, kind: output, shape index: {}]  }
   0x1   :  { %s16_s19 = sshll.u32 %s879_s18, 4  ;;  %s17_s19 = int_to_ptr.vmem [resolvable:$true] %s16_s19 }
   0x2   :  { %s865_s20 = scalar_lea.vmem %s17_s19, 1024  ;;  %p870_p1 = scmp.lt.s32.totalorder %s17_s19, %s17_s19 }
   0x3   :  { %p866_p0 = scmp.ne.s32.totalorder %s17_s19, %s865_s20  ;;  %p871_p2 = scmp.lt.s32.totalorder %s865_s20, %s865_s20 }
   0x5   :  { %p872_p3 = por %p871_p2, %p870_p1 }
   0x7   :  { %p873_p4 = pnand %p872_p3, %p866_p0 }
   0x9   :  { %876 = shalt.err (!%p873_p4)
}
   0xa   :  { %s880_s21 = smov 128   ;;  %s881_s22 = smov 8  }
   0xb   :  { %22 = dma.hbm_to_vmem [thread:$0]  %s1316_s0, 1024, %s17_s19, [#allocation3], %s880_s21, %s880_s21, %s881_s22  }
   0xc   :  { %877 = dma.done.wait [#allocation3], 1024  }
   0xd   :  { %878 = vsyncadd [#allocation3], 4294966272  ;;  %v45_v0 = vld [vmem:[%s1317_s1 + $0x18] sm:$0xff]  ;;  %v44_v1 = vld [vmem:[%s1317_s1 + $0x10] sm:$0xff]  ;;  %vm53_vm0 = vcmask 261120   ;;  %s882_s8 = smov 64  }
   0xe   :  { %775 = vmatprep.subr.mxu0 %v45_v0  ;;  %795 = vmatprep.subr.mxu1 %v45_v0  ;;  %v43_v2 = vld [vmem:[%s1317_s1 + $0x8] sm:$0xff]  ;;  %v42_v3 = vld [vmem:[%s1317_s1] sm:$0xff]  ;;  %v36_v7 = vld [vmem:[#allocation2 + $0x10] sm:$0xff]  ;;  %s883_s9 = smov 96   ;;  %vm624_vm1 = vcmask 523264   ;;  %vm673_vm2 = vcmask 785408  }
   0xf   :  { %776 = vmatpush3.msra.mxu0 %v45_v0  ;;  %799 = vmatpush3.msra.mxu1 %v45_v0  ;;  %v34_v4 = vld [vmem:[#allocation2] sm:$0xff]  ;;  %v35_v5 = vld [vmem:[#allocation2 + $0x8] sm:$0xff]  ;;  %v40_v9 = vld [vmem:[#allocation2 + $0x30] sm:$0xff] }
  0x10   :  { %777 = vmatprep.subr.mxu0 %v44_v1  ;;  %796 = vmatprep.subr.mxu1 %v44_v1  ;;  %v38_v6 = vld [vmem:[#allocation2 + $0x20] sm:$0xff]  ;;  %v39_v8 = vld [vmem:[#allocation2 + $0x28] sm:$0xff]  ;;  %v37_v10 = vld [vmem:[#allocation2 + $0x18] sm:$0xff] }
  0x11   :  { %778 = vmatpush3.msra.mxu0 %v44_v1  ;;  %800 = vmatpush3.msra.mxu1 %v44_v1  ;;  %v41_v11 = vld [vmem:[#allocation2 + $0x38] sm:$0xff]  ;;  %v738_v12 = vld [vmem:[%s1318_s2] ss:$0 sm:$0xff] }
  0x12   :  { %779 = vmatprep.subr.mxu0 %v43_v2  ;;  %797 = vmatprep.subr.mxu1 %v43_v2 }
  0x13   :  { %780 = vmatpush3.msra.mxu0 %v43_v2  ;;  %801 = vmatpush3.msra.mxu1 %v43_v2 }
  0x14   :  { %781 = vmatprep.subr.mxu0 %v42_v3  ;;  %783 = vmatprep.mubr.msk.f32.mxu0 %vm53_vm0, %v34_v4 }
  0x15   :  { %782 = vmatpush3.msra.mxu0 %v42_v3  ;;  %798 = vmatprep.subr.mxu1 %v42_v3 }
  0x16   :  { %784 = vmatmul.mubr.msk.f32.vlgmr.msra.gmra.mxu0 %vm53_vm0, %v35_v5  ;;  %802 = vmatpush3.msra.mxu1 %v42_v3 }
  0x17   :  { %789 = vmatprep.mubr.msk.f32.mxu1 %vm53_vm0, %v38_v6  ;;  %786 = vmatprep.mubr.msk.f32.mxu0 %vm53_vm0, %v36_v7 }
  0x18   :  { %790 = vmatmul.mubr.msk.f32.vlgmr.msra.gmra.mxu1 %vm53_vm0, %v39_v8 }
  0x19   :  { %792 = vmatprep.mubr.msk.f32.mxu1 %vm53_vm0, %v40_v9 }
  0x1a   :  { %787 = vmatmul.mubr.msk.f32.gmra.mxu0 %vm53_vm0, %v37_v10 }
  0x1c   :  { %793 = vmatmul.mubr.msk.f32.gmra.mxu1 %vm53_vm0, %v41_v11 }
  0xd6   :  { %v785_v13 = vpop.f32.mrf.mxu0 }
  0xd7   :  { %v941_v14 = vadd.f32 %v785_v13, %v738_v12 }
  0xd8   :  { %v791_v15 = vpop.f32.mrf.mxu1  ;;  %v144_v19 = vpop.f32.mrf.mxu0 }
  0xd9   :  { %v943_v16 = vadd.f32 %v791_v15, %v738_v12  ;;  %458 = vrot.lane.b32.xlu1 %v941_v14, %s882_s8  ;;  %298 = vrot.lane.b32.xlu0 %v941_v14, %s883_s9  ;;  %v186_v17 = vsel %vm53_vm0, %v941_v14, 0.0  ;;  %v957_v20 = vadd.f32 %v738_v12, %v144_v19 }
  0xda   :  { %v164_v21 = vpop.f32.mrf.mxu1  ;;  %v788_v23 = vpop.f32.mrf.mxu0 }
  0xdb   :  { %v198_v18 = vsel %vm53_vm0, %v943_v16, 0.0  ;;  %v961_v22 = vadd.f32 %v738_v12, %v164_v21  ;;  %v969_v24 = vadd.f32 %v788_v23, %v738_v12  ;;  %v183_v27 = vsel %vm53_vm0, %v957_v20, 0.0 }
  0xdc   :  { %v154_v28 = vpop.f32.mrf.mxu0  ;;  %v794_v29 = vpop.f32.mrf.mxu1 }
  0xdd   :  { %306 = vrot.lane.b32.xlu1 %v943_v16, %s883_s9  ;;  %v195_v25 = vsel %vm53_vm0, %v961_v22, 0.0  ;;  %v192_v26 = vsel %vm53_vm0, %v969_v24, 0.0  ;;  %v979_v30 = vadd.f32 %v738_v12, %v154_v28  ;;  %v985_v31 = vadd.f32 %v794_v29, %v738_v12 }
  0xde   :  { %v174_v32 = vpop.f32.mrf.mxu1 }
  0xdf   :  { %v991_v33 = vadd.f32 %v738_v12, %v174_v32  ;;  %v189_v36 = vsel %vm53_vm0, %v979_v30, 0.0 }
  0xe1   :  { %466 = vrot.lane.b32.xlu1 %v943_v16, %s882_s8  ;;  %v201_v35 = vsel %vm53_vm0, %v991_v33, 0.0 }
  0xf8   :  { %187 = vadd.xlane.f32.xlu0 %v186_v17 }
 0x105   :  { %199 = vadd.xlane.f32.xlu1 %v198_v18 }
 0x10e   :  { %296 = vrot.lane.b32.xlu0 %v957_v20, %s883_s9 }
 0x112   :  { %304 = vrot.lane.b32.xlu0 %v961_v22, %s883_s9 }
 0x116   :  { %456 = vrot.lane.b32.xlu1 %v957_v20, %s882_s8  ;;  %464 = vrot.lane.b32.xlu0 %v961_v22, %s882_s8 }
 0x135   :  { %196 = vadd.xlane.f32.xlu0 %v195_v25 }
 0x139   :  { %193 = vadd.xlane.f32.xlu0 %v192_v26 }
 0x13a   :  { %184 = vadd.xlane.f32.xlu1 %v183_v27 }
 0x14b   :  { %302 = vrot.lane.b32.xlu1 %v969_v24, %s883_s9  ;;  %v459_v34 = vpop.permute.xlu1 %458  ;;  %v299_v37 = vpop.permute.xlu0 %298 }
 0x14c   :  { %v483_v39 = vsel %vm53_vm0, %v459_v34, 0.0  ;;  %v323_v40 = vsel %vm53_vm0, %v299_v37, 0.0 }
 0x14f   :  { %300 = vrot.lane.b32.xlu0 %v979_v30, %s883_s9  ;;  %462 = vrot.lane.b32.xlu1 %v969_v24, %s882_s8  ;;  %v307_v38 = vpop.permute.xlu1 %306 }
 0x150   :  { %v335_v42 = vsel %vm53_vm0, %v307_v38, 0.0 }
 0x153   :  { %460 = vrot.lane.b32.xlu0 %v979_v30, %s882_s8  ;;  %310 = vrot.lane.b32.xlu1 %v985_v31, %s883_s9  ;;  %v467_v43 = vpop.permute.xlu1 %466 }
 0x154   :  { %v495_v45 = vsel %vm53_vm0, %v467_v43, 0.0 }
 0x157   :  { %308 = vrot.lane.b32.xlu0 %v991_v33, %s883_s9  ;;  %470 = vrot.lane.b32.xlu1 %v985_v31, %s882_s8 }
 0x15b   :  { %468 = vrot.lane.b32.xlu0 %v991_v33, %s882_s8 }
 0x17a   :  { %202 = vadd.xlane.f32.xlu0 %v201_v35 }
 0x17b   :  { %190 = vadd.xlane.f32.xlu1 %v189_v36 }
 0x17e   :  { %484 = vadd.xlane.f32.xlu0 %v483_v39 }
 0x17f   :  { %324 = vadd.xlane.f32.xlu1 %v323_v40 }
 0x181   :  { %v1005_v41 = vpop.xlane.xlu0 %187 }
 0x182   :  { %336 = vadd.xlane.f32.xlu0 %v335_v42 }
 0x185   :  { %v297_v44 = vpop.permute.xlu0 %296 }
 0x186   :  { %496 = vadd.xlane.f32.xlu0 %v495_v45  ;;  %v320_v47 = vsel %vm53_vm0, %v297_v44, 0.0 }
 0x189   :  { %v305_v46 = vpop.permute.xlu0 %304 }
 0x18a   :  { %321 = vadd.xlane.f32.xlu0 %v320_v47  ;;  %v332_v48 = vsel %vm53_vm0, %v305_v46, 0.0 }
 0x18b   :  { %333 = vadd.xlane.f32.xlu1 %v332_v48 }
 0x18d   :  { %v465_v49 = vpop.permute.xlu0 %464 }
 0x18e   :  { %v1011_v50 = vpop.xlane.xlu1 %199  ;;  %v492_v51 = vsel %vm53_vm0, %v465_v49, 0.0 }
 0x18f   :  { %493 = vadd.xlane.f32.xlu1 %v492_v51 }
 0x192   :  { %v457_v52 = vpop.permute.xlu1 %456 }
 0x193   :  { %v480_v53 = vsel %vm53_vm0, %v457_v52, 0.0 }
 0x194   :  { %481 = vadd.xlane.f32.xlu0 %v480_v53 }
 0x1be   :  { %v1015_v54 = vpop.xlane.xlu0 %196 }
 0x1c2   :  { %v1017_v55 = vpop.xlane.xlu0 %193 }
 0x1c3   :  { %v1019_v56 = vpop.xlane.xlu1 %184 }
 0x1c6   :  { %v301_v57 = vpop.permute.xlu0 %300 }
 0x1c7   :  { %v303_v58 = vpop.permute.xlu1 %302  ;;  %v326_v59 = vsel %vm53_vm0, %v301_v57, 0.0 }
 0x1c8   :  { %327 = vadd.xlane.f32.xlu1 %v326_v59  ;;  %v329_v60 = vsel %vm53_vm0, %v303_v58, 0.0 }
 0x1c9   :  { %330 = vadd.xlane.f32.xlu0 %v329_v60 }
 0x1ca   :  { %v461_v61 = vpop.permute.xlu0 %460 }
 0x1cb   :  { %v463_v62 = vpop.permute.xlu1 %462  ;;  %v486_v63 = vsel %vm53_vm0, %v461_v61, 0.0 }
 0x1cc   :  { %487 = vadd.xlane.f32.xlu1 %v486_v63  ;;  %v489_v0 = vsel %vm53_vm0, %v463_v62, 0.0 }
 0x1cd   :  { %490 = vadd.xlane.f32.xlu0 %v489_v0 }
 0x1ce   :  { %v309_v1 = vpop.permute.xlu0 %308 }
 0x1cf   :  { %v311_v2 = vpop.permute.xlu1 %310  ;;  %v338_v3 = vsel %vm53_vm0, %v309_v1, 0.0 }
 0x1d0   :  { %339 = vadd.xlane.f32.xlu1 %v338_v3  ;;  %v341_v4 = vsel %vm53_vm0, %v311_v2, 0.0  ;;  %v208_v2 = vmul.f32 0.03125, %v1019_v56 }
 0x1d1   :  { %342 = vadd.xlane.f32.xlu0 %v341_v4 }
 0x1d2   :  { %v469_v5 = vpop.permute.xlu0 %468  ;;  %v1095_v3 = vsub.f32 %v957_v20, %v208_v2 }
 0x1d3   :  { %v471_v6 = vpop.permute.xlu1 %470  ;;  %v498_v7 = vsel %vm53_vm0, %v469_v5, 0.0 }
 0x1d4   :  { %499 = vadd.xlane.f32.xlu1 %v498_v7  ;;  %v501_v8 = vsel %vm53_vm0, %v471_v6, 0.0  ;;  %v224_v4 = vmul.f32 %v1095_v3, %v1095_v3  ;;  %v204_v6 = vsel %vm53_vm0, %v985_v31, 0.0 }
 0x1d5   :  { %502 = vadd.xlane.f32.xlu0 %v501_v8 }
 0x1d6   :  { %v232_v5 = vsel %vm53_vm0, %v224_v4, 0.0 }
 0x203   :  { %v1029_v9 = vpop.xlane.xlu0 %202 }
 0x204   :  { %v1031_v10 = vpop.xlane.xlu1 %190 }
 0x207   :  { %v485_v11 = vpop.xlane.xlu0 %484 }
 0x208   :  { %v505_v12 = vmul.f32 0.03125, %v485_v11  ;;  %v325_v13 = vpop.xlane.xlu1 %324 }
 0x209   :  { %v345_v15 = vmul.f32 0.03125, %v325_v13 }
 0x20a   :  { %v1034_v17 = vsub.f32 %v941_v14, %v505_v12 }
 0x20b   :  { %v1037_v18 = vsub.f32 %v941_v14, %v345_v15  ;;  %v337_v19 = vpop.xlane.xlu0 %336 }
 0x20c   :  { %v521_v21 = vmul.f32 %v1034_v17, %v1034_v17  ;;  %v349_v11 = vmul.f32 0.03125, %v337_v19 }
 0x20d   :  { %v361_v23 = vmul.f32 %v1037_v18, %v1037_v18 }
 0x20e   :  { %538 = vrot.lane.b32.xlu1 %v521_v21, %s882_s8  ;;  %v1106_v15 = vsub.f32 %v943_v16, %v349_v11 }
 0x20f   :  { %v497_v25 = vpop.xlane.xlu0 %496  ;;  %378 = vrot.lane.b32.xlu0 %v361_v23, %s883_s9 }
 0x210   :  { %v509_v21 = vmul.f32 0.03125, %v497_v25 }
 0x213   :  { %v322_v26 = vpop.xlane.xlu0 %321 }
 0x214   :  { %v344_v27 = vmul.f32 0.03125, %v322_v26  ;;  %v334_v28 = vpop.xlane.xlu1 %333 }
 0x215   :  { %v348_v29 = vmul.f32 0.03125, %v334_v28  ;;  %v365_v28 = vmul.f32 %v1106_v15, %v1106_v15 }
 0x216   :  { %v1046_v32 = vsub.f32 %v957_v20, %v344_v27  ;;  %v1114_v27 = vsub.f32 %v943_v16, %v509_v21 }
 0x217   :  { %v1049_v34 = vsub.f32 %v961_v22, %v348_v29 }
 0x218   :  { %v494_v35 = vpop.xlane.xlu1 %493  ;;  %v360_v36 = vmul.f32 %v1046_v32, %v1046_v32 }
 0x219   :  { %v508_v37 = vmul.f32 0.03125, %v494_v35  ;;  %v364_v38 = vmul.f32 %v1049_v34, %v1049_v34 }
 0x21a   :  { %376 = vrot.lane.b32.xlu1 %v360_v36, %s883_s9 }
 0x21b   :  { %v1057_v39 = vsub.f32 %v961_v22, %v508_v37  ;;  %384 = vrot.lane.b32.xlu0 %v364_v38, %s883_s9  ;;  %v525_v37 = vmul.f32 %v1114_v27, %v1114_v27 }
 0x21d   :  { %v482_v40 = vpop.xlane.xlu0 %481  ;;  %v524_v42 = vmul.f32 %v1057_v39, %v1057_v39 }
 0x21e   :  { %v504_v43 = vmul.f32 0.03125, %v482_v40 }
 0x21f   :  { %544 = vrot.lane.b32.xlu0 %v524_v42, %s882_s8 }
 0x220   :  { %v1064_v44 = vsub.f32 %v957_v20, %v504_v43 }
 0x222   :  { %v520_v45 = vmul.f32 %v1064_v44, %v1064_v44 }
 0x224   :  { %536 = vrot.lane.b32.xlu1 %v520_v45, %s882_s8  ;;  %v211_v45 = vmul.f32 0.03125, %v1017_v55 }
 0x251   :  { %v328_v46 = vpop.xlane.xlu1 %327 }
 0x252   :  { %v346_v47 = vmul.f32 0.03125, %v328_v46  ;;  %v331_v48 = vpop.xlane.xlu0 %330 }
 0x253   :  { %v347_v49 = vmul.f32 0.03125, %v331_v48  ;;  %v209_v48 = vmul.f32 0.03125, %v1005_v41 }
 0x254   :  { %v1070_v51 = vsub.f32 %v979_v30, %v346_v47 }
 0x255   :  { %v1073_v52 = vsub.f32 %v969_v24, %v347_v49  ;;  %v488_v53 = vpop.xlane.xlu1 %487  ;;  %v1142_v49 = vsub.f32 %v969_v24, %v211_v45 }
 0x256   :  { %v506_v57 = vmul.f32 0.03125, %v488_v53  ;;  %v491_v58 = vpop.xlane.xlu0 %490  ;;  %v362_v59 = vmul.f32 %v1070_v51, %v1070_v51 }
 0x257   :  { %v507_v60 = vmul.f32 0.03125, %v491_v58  ;;  %v363_v61 = vmul.f32 %v1073_v52, %v1073_v52  ;;  %v1146_v58 = vsub.f32 %v941_v14, %v209_v48 }
 0x258   :  { %v1080_v62 = vsub.f32 %v979_v30, %v506_v57  ;;  %380 = vrot.lane.b32.xlu0 %v362_v59, %s883_s9  ;;  %v210_v59 = vmul.f32 0.03125, %v1031_v10 }
 0x259   :  { %v1084_v63 = vsub.f32 %v969_v24, %v507_v60  ;;  %382 = vrot.lane.b32.xlu1 %v363_v61, %s883_s9  ;;  %v340_v7 = vpop.xlane.xlu1 %339  ;;  %v227_v60 = vmul.f32 %v1142_v49, %v1142_v49  ;;  %v225_v24 = vmul.f32 %v1146_v58, %v1146_v58 }
 0x25a   :  { %v522_v0 = vmul.f32 %v1080_v62, %v1080_v62  ;;  %v350_v8 = vmul.f32 0.03125, %v340_v7  ;;  %v343_v56 = vpop.xlane.xlu0 %342  ;;  %v1153_v41 = vsub.f32 %v979_v30, %v210_v59  ;;  %v213_v30 = vmul.f32 0.03125, %v1011_v50 }
 0x25b   :  { %v523_v1 = vmul.f32 %v1084_v63, %v1084_v63  ;;  %v351_v19 = vmul.f32 0.03125, %v343_v56  ;;  %v241_v61 = vsel %vm53_vm0, %v227_v60, 0.0  ;;  %v235_v14 = vsel %vm53_vm0, %v225_v24, 0.0 }
 0x25c   :  { %540 = vrot.lane.b32.xlu0 %v522_v0, %s882_s8  ;;  %v1103_v13 = vsub.f32 %v991_v33, %v350_v8  ;;  %v226_v10 = vmul.f32 %v1153_v41, %v1153_v41  ;;  %v1166_v11 = vsub.f32 %v943_v16, %v213_v30 }
 0x25d   :  { %542 = vrot.lane.b32.xlu1 %v523_v1, %s882_s8  ;;  %v500_v12 = vpop.xlane.xlu1 %499  ;;  %v1123_v35 = vsub.f32 %v985_v31, %v351_v19 }
 0x25e   :  { %v510_v20 = vmul.f32 0.03125, %v500_v12  ;;  %v366_v26 = vmul.f32 %v1103_v13, %v1103_v13  ;;  %v503_v29 = vpop.xlane.xlu0 %502  ;;  %v238_v1 = vsel %vm53_vm0, %v226_v10, 0.0 }
 0x25f   :  { %v511_v36 = vmul.f32 0.03125, %v503_v29  ;;  %v367_v40 = vmul.f32 %v1123_v35, %v1123_v35 }
 0x260   :  { %v1109_v23 = vsub.f32 %v991_v33, %v510_v20 }
 0x261   :  { %v1130_v38 = vsub.f32 %v985_v31, %v511_v36 }
 0x262   :  { %v526_v25 = vmul.f32 %v1109_v23, %v1109_v23 }
 0x263   :  { %v527_v42 = vmul.f32 %v1130_v38, %v1130_v38 }
 0x27b   :  { %233 = vadd.xlane.f32.xlu0 %v232_v5  ;;  %v212_v5 = vmul.f32 0.03125, %v1015_v54 }
 0x27d   :  { %v1170_v56 = vsub.f32 %v961_v22, %v212_v5 }
 0x27f   :  { %v228_v19 = vmul.f32 %v1170_v56, %v1170_v56 }
 0x280   :  { %v539_v47 = vpop.permute.xlu1 %538 }
 0x281   :  { %205 = vadd.xlane.f32.xlu1 %v204_v6  ;;  %v379_v43 = vpop.permute.xlu0 %378  ;;  %v563_v53 = vsel %vm53_vm0, %v539_v47, 0.0  ;;  %v244_v29 = vsel %vm53_vm0, %v228_v19, 0.0 }
 0x282   :  { %v403_v46 = vsel %vm53_vm0, %v379_v43, 0.0 }
 0x28c   :  { %v377_v57 = vpop.permute.xlu1 %376 }
 0x28d   :  { %v400_v55 = vsel %vm53_vm0, %v377_v57, 0.0  ;;  %v385_v0 = vpop.permute.xlu0 %384 }
 0x28e   :  { %v412_v36 = vsel %vm53_vm0, %v385_v0, 0.0 }
 0x291   :  { %388 = vrot.lane.b32.xlu0 %v366_v26, %s883_s9  ;;  %v545_v2 = vpop.permute.xlu0 %544  ;;  %v229_v26 = vmul.f32 %v1166_v11, %v1166_v11 }
 0x292   :  { %386 = vrot.lane.b32.xlu1 %v365_v28, %s883_s9  ;;  %v214_v28 = vmul.f32 0.03125, %v1029_v9 }
 0x293   :  { %v247_v22 = vsel %vm53_vm0, %v229_v26, 0.0 }
 0x295   :  { %548 = vrot.lane.b32.xlu0 %v526_v25, %s882_s8  ;;  %v1183_v25 = vsub.f32 %v991_v33, %v214_v28 }
 0x296   :  { %546 = vrot.lane.b32.xlu1 %v525_v37, %s882_s8  ;;  %v537_v4 = vpop.permute.xlu1 %536  ;;  %v572_v37 = vsel %vm53_vm0, %v545_v2, 0.0 }
 0x297   :  { %v560_v6 = vsel %vm53_vm0, %v537_v4, 0.0 }
 0x29a   :  { %390 = vrot.lane.b32.xlu1 %v367_v40, %s883_s9  ;;  %v230_v40 = vmul.f32 %v1183_v25, %v1183_v25 }
 0x29e   :  { %550 = vrot.lane.b32.xlu1 %v527_v42, %s882_s8  ;;  %v250_v42 = vsel %vm53_vm0, %v230_v40, 0.0 }
 0x2b4   :  { %404 = vadd.xlane.f32.xlu0 %v403_v46 }
 0x2b8   :  { %564 = vadd.xlane.f32.xlu0 %v563_v53 }
 0x2bc   :  { %401 = vadd.xlane.f32.xlu0 %v400_v55 }
 0x2c0   :  { %242 = vadd.xlane.f32.xlu0 %v241_v61 }
 0x2c2   :  { %236 = vadd.xlane.f32.xlu1 %v235_v14 }
 0x2c6   :  { %239 = vadd.xlane.f32.xlu1 %v238_v1 }
 0x2ca   :  { %v381_v7 = vpop.permute.xlu0 %380  ;;  %561 = vadd.xlane.f32.xlu1 %v560_v6 }
 0x2cb   :  { %v383_v8 = vpop.permute.xlu1 %382  ;;  %v406_v20 = vsel %vm53_vm0, %v381_v7, 0.0 }
 0x2cc   :  { %v409_v12 = vsel %vm53_vm0, %v383_v8, 0.0 }
 0x2cd   :  { %410 = vadd.xlane.f32.xlu0 %v409_v12 }
 0x2ce   :  { %v541_v21 = vpop.permute.xlu0 %540  ;;  %407 = vadd.xlane.f32.xlu1 %v406_v20 }
 0x2cf   :  { %v543_v50 = vpop.permute.xlu1 %542  ;;  %v566_v16 = vsel %vm53_vm0, %v541_v21, 0.0 }
 0x2d0   :  { %v569_v54 = vsel %vm53_vm0, %v543_v50, 0.0 }
 0x2d1   :  { %570 = vadd.xlane.f32.xlu0 %v569_v54 }
 0x2d2   :  { %567 = vadd.xlane.f32.xlu1 %v566_v16 }
 0x2d5   :  { %248 = vadd.xlane.f32.xlu0 %v247_v22 }
 0x2d6   :  { %245 = vadd.xlane.f32.xlu1 %v244_v29 }
 0x2da   :  { %413 = vadd.xlane.f32.xlu1 %v412_v36 }
 0x2de   :  { %573 = vadd.xlane.f32.xlu1 %v572_v37 }
 0x2e2   :  { %251 = vadd.xlane.f32.xlu1 %v250_v42 }
 0x304   :  { %v234_v9 = vpop.xlane.xlu0 %233 }
 0x305   :  { %v256_v21 = vmul.f32 0.03125, %v234_v9 }
 0x307   :  { %v264_v19 = vadd.f32 1e-12, %v256_v21 }
 0x308   :  { %v389_v43 = vpop.permute.xlu0 %388 }
 0x309   :  { %v418_v45 = vsel %vm53_vm0, %v389_v43, 0.0 }
 0x30a   :  { %419 = vadd.xlane.f32.xlu1 %v418_v45  ;;  %v206_v46 = vpop.xlane.xlu1 %205 }
 0x30b   :  { %v215_v33 = vmul.f32 0.03125, %v206_v46 }
 0x30c   :  { %v549_v47 = vpop.permute.xlu0 %548 }
 0x30d   :  { %v578_v48 = vsel %vm53_vm0, %v549_v47, 0.0  ;;  %v1193_v57 = vsub.f32 %v985_v31, %v215_v33 }
 0x30e   :  { %579 = vadd.xlane.f32.xlu1 %v578_v48  ;;  %v387_v53 = vpop.permute.xlu1 %386 }
 0x30f   :  { %v415_v59 = vsel %vm53_vm0, %v387_v53, 0.0  ;;  %v231_v24 = vmul.f32 %v1193_v57, %v1193_v57 }
 0x310   :  { %416 = vadd.xlane.f32.xlu0 %v415_v59 }
 0x311   :  { %v253_v0 = vsel %vm53_vm0, %v231_v24, 0.0 }
 0x312   :  { %v547_v55 = vpop.permute.xlu1 %546 }
 0x313   :  { %v575_v60 = vsel %vm53_vm0, %v547_v55, 0.0 }
 0x314   :  { %576 = vadd.xlane.f32.xlu0 %v575_v60 }
 0x316   :  { %v391_v61 = vpop.permute.xlu1 %390 }
 0x317   :  { %v421_v14 = vsel %vm53_vm0, %v391_v61, 0.0 }
 0x318   :  { %254 = vadd.xlane.f32.xlu0 %v253_v0 }
 0x31a   :  { %v551_v10 = vpop.permute.xlu1 %550 }
 0x31b   :  { %v581_v31 = vsel %vm53_vm0, %v551_v10, 0.0 }
 0x31c   :  { %422 = vadd.xlane.f32.xlu0 %v421_v14 }
 0x320   :  { %582 = vadd.xlane.f32.xlu0 %v581_v31 }
 0x33d   :  { %v405_v1 = vpop.xlane.xlu0 %404 }
 0x33e   :  { %v425_v4 = vmul.f32 0.03125, %v405_v1 }
 0x340   :  { %v433_v6 = vadd.f32 1e-12, %v425_v4 }
 0x341   :  { %v565_v2 = vpop.xlane.xlu0 %564 }
 0x342   :  { %v585_v30 = vmul.f32 0.03125, %v565_v2  ;;  %809 = vrsqrt.f32 %v433_v6  ;;  %v1208_v2 = vld [vmem:[%s1319_s3] ss:$0 sm:$0xff] }
 0x344   :  { %v593_v7 = vadd.f32 1e-12, %v585_v30 }
 0x345   :  { %v402_v5 = vpop.xlane.xlu0 %401 }
 0x346   :  { %v424_v8 = vmul.f32 0.03125, %v402_v5  ;;  %811 = vrsqrt.f32 %v593_v7 }
 0x348   :  { %v432_v54 = vadd.f32 1e-12, %v424_v8 }
 0x349   :  { %v243_v26 = vpop.xlane.xlu0 %242 }
 0x34a   :  { %v259_v22 = vmul.f32 0.03125, %v243_v26 }
 0x34b   :  { %v237_v12 = vpop.xlane.xlu1 %236 }
 0x34c   :  { %v257_v20 = vmul.f32 0.03125, %v237_v12  ;;  %v267_v37 = vadd.f32 1e-12, %v259_v22 }
 0x34e   :  { %v265_v50 = vadd.f32 1e-12, %v257_v20 }
 0x34f   :  { %v240_v16 = vpop.xlane.xlu1 %239  ;;  %v810_v53 = vpop.eup %809 }
 0x350   :  { %813 = vrsqrt.f32 %v265_v50  ;;  %v258_v36 = vmul.f32 0.03125, %v240_v16  ;;  %v449_v14 = vmul.f32 %v810_v53, %v1037_v18  ;;  %v1214_v18 = vld [vmem:[%s1320_s4] ss:$0 sm:$0xff] }
 0x351   :  { %815 = vrsqrt.f32 %v432_v54 }
 0x352   :  { %817 = vrsqrt.f32 %v264_v19  ;;  %v266_v46 = vadd.f32 1e-12, %v258_v36 }
 0x353   :  { %v562_v28 = vpop.xlane.xlu1 %561  ;;  %v812_v60 = vpop.eup %811 }
 0x354   :  { %v584_v29 = vmul.f32 0.03125, %v562_v28  ;;  %v609_v1 = vmul.f32 %v812_v60, %v1034_v17 }
 0x356   :  { %v592_v40 = vadd.f32 1e-12, %v584_v29  ;;  %v411_v42 = vpop.xlane.xlu0 %410 }
 0x357   :  { %v427_v43 = vmul.f32 0.03125, %v411_v42  ;;  %v408_v45 = vpop.xlane.xlu1 %407 }
 0x358   :  { %819 = vrsqrt.f32 %v592_v40  ;;  %v426_v9 = vmul.f32 0.03125, %v408_v45 }
 0x359   :  { %v435_v33 = vadd.f32 1e-12, %v427_v43  ;;  %821 = vrsqrt.f32 %v267_v37  ;;  %v884_v43 = vmov 0.0  }
 0x35a   :  { %v434_v47 = vadd.f32 1e-12, %v426_v9  ;;  %v571_v48 = vpop.xlane.xlu0 %570 }
 0x35b   :  { %823 = vrsqrt.f32 %v435_v33  ;;  %v587_v59 = vmul.f32 0.03125, %v571_v48  ;;  %v568_v55 = vpop.xlane.xlu1 %567 }
 0x35c   :  { %825 = vrsqrt.f32 %v434_v47  ;;  %v586_v24 = vmul.f32 0.03125, %v568_v55 }
 0x35d   :  { %v814_v61 = vpop.eup %813  ;;  %827 = vrsqrt.f32 %v266_v46  ;;  %v595_v0 = vadd.f32 1e-12, %v587_v59 }
 0x35e   :  { %v281_v10 = vmul.f32 %v814_v61, %v1146_v58  ;;  %v594_v31 = vadd.f32 1e-12, %v586_v24  ;;  %v816_v30 = vpop.eup %815 }
 0x35f   :  { %829 = vrsqrt.f32 %v595_v0  ;;  %v246_v4 = vpop.xlane.xlu1 %245  ;;  %v818_v17 = vpop.eup %817  ;;  %v448_v8 = vmul.f32 %v816_v30, %v1046_v32 }
 0x360   :  { %v617_v5 = vsel %vm53_vm0, %v281_v10, %v449_v14  ;;  %831 = vrsqrt.f32 %v594_v31  ;;  %v260_v6 = vmul.f32 0.03125, %v246_v4  ;;  %v280_v54 = vmul.f32 %v818_v17, %v1095_v3 }
 0x361   :  { %v626_v58 = vsel %vm624_vm1, %v617_v5, %v609_v1 }
 0x362   :  { %v641_v7 = vmul.f32 %v1208_v2, %v626_v58  ;;  %v268_v26 = vadd.f32 1e-12, %v260_v6  ;;  %v616_v29 = vsel %vm53_vm0, %v280_v54, %v448_v8 }
 0x363   :  { %v414_v12 = vpop.xlane.xlu1 %413 }
 0x364   :  { %v656_v20 = vadd.f32 %v1214_v18, %v641_v7  ;;  %v428_v21 = vmul.f32 0.03125, %v414_v12 }
 0x365   :  { %v820_v50 = vpop.eup %819 }
 0x366   :  { %v664_v16 = vmul.f32 0.8333333, %v656_v20  ;;  %v608_v19 = vmul.f32 %v820_v50, %v1064_v44  ;;  %v436_v22 = vadd.f32 1e-12, %v428_v21  ;;  %v822_v28 = vpop.eup %821 }
 0x367   :  { %v574_v36 = vpop.xlane.xlu1 %573  ;;  %v283_v53 = vmul.f32 %v822_v28, %v1142_v49 }
 0x368   :  { %v824_v37 = vpop.eup %823  ;;  %vm668_vm3 = vcmp.ge.f32.partialorder %v664_v16, 1.0  ;;  %v625_v32 = vsel %vm624_vm1, %v616_v29, %v608_v19  ;;  %833 = vrsqrt.f32 %v436_v22  ;;  %v588_v40 = vmul.f32 0.03125, %v574_v36 }
 0x369   :  { %v826_v42 = vpop.eup %825  ;;  %v750_v3 = vsel %vm668_vm3, 1.0, %v884_v43  ;;  %v640_v45 = vmul.f32 %v1208_v2, %v625_v32  ;;  %835 = vrsqrt.f32 %v268_v26  ;;  %v451_v9 = vmul.f32 %v824_v37, %v1073_v52 }
 0x36a   :  { %v828_v44 = vpop.eup %827  ;;  %675 = vst.msk [vmem:[%s1321_s5 + $0x8] sm:$0xff] %vm673_vm2, %v750_v3  ;;  %v596_v46 = vadd.f32 1e-12, %v588_v40  ;;  %v450_v47 = vmul.f32 %v826_v42, %v1070_v51  ;;  %v677_v0 = vsub.f32 1.0, %v750_v3 }
 0x36b   :  { %v655_v33 = vadd.f32 %v1214_v18, %v640_v45  ;;  %v282_v55 = vmul.f32 %v828_v44, %v1153_v41  ;;  %v619_v61 = vsel %vm53_vm0, %v283_v53, %v451_v9  ;;  %v252_v42 = vpop.xlane.xlu1 %251  ;;  %v249_v44 = vpop.xlane.xlu0 %248 }
 0x36c   :  { %v830_v48 = vpop.eup %829  ;;  %837 = vrsqrt.f32 %v596_v46  ;;  %v679_v1 = vmul.f32 %v677_v0, %v664_v16  ;;  %v262_v3 = vmul.f32 0.03125, %v252_v42 }
 0x36d   :  { %v832_v59 = vpop.eup %831  ;;  %v663_v60 = vmul.f32 0.8333333, %v655_v33  ;;  %v611_v24 = vmul.f32 %v830_v48, %v1084_v63  ;;  %v618_v14 = vsel %vm53_vm0, %v282_v55, %v450_v47  ;;  %v261_v47 = vmul.f32 0.03125, %v249_v44 }
 0x36e   :  { %v610_v52 = vmul.f32 %v832_v59, %v1080_v62  ;;  %v270_v46 = vadd.f32 1e-12, %v262_v3 }
 0x36f   :  { %vm667_vm4 = vcmp.ge.f32.partialorder %v663_v60, 1.0  ;;  %v628_v51 = vsel %vm624_vm1, %v619_v61, %v611_v24  ;;  %v269_v24 = vadd.f32 1e-12, %v261_v47 }
 0x370   :  { %v749_v10 = vsel %vm667_vm4, 1.0, %v884_v43  ;;  %v643_v49 = vmul.f32 %v1208_v2, %v628_v51  ;;  %v627_v31 = vsel %vm624_vm1, %v618_v14, %v610_v52 }
 0x371   :  { %674 = vst.msk [vmem:[%s1321_s5] sm:$0xff] %vm673_vm2, %v749_v10  ;;  %v676_v63 = vsub.f32 1.0, %v749_v10  ;;  %v642_v41 = vmul.f32 %v1208_v2, %v627_v31 }
 0x372   :  { %v658_v62 = vadd.f32 %v1214_v18, %v643_v49 }
 0x373   :  { %v678_v4 = vmul.f32 %v676_v63, %v663_v60  ;;  %v657_v30 = vadd.f32 %v1214_v18, %v642_v41 }
 0x374   :  { %v681_v5 = vsub.f32 %v658_v62, %v679_v1 }
 0x375   :  { %v834_v58 = vpop.eup %833  ;;  %v680_v6 = vsub.f32 %v657_v30, %v678_v4 }
 0x376   :  { %v836_v17 = vpop.eup %835  ;;  %v683_v7 = vmul.f32 0.8333333, %v681_v5  ;;  %v452_v12 = vmul.f32 %v834_v58, %v1049_v34 }
 0x377   :  { %v682_v8 = vmul.f32 0.8333333, %v680_v6  ;;  %v284_v54 = vmul.f32 %v836_v17, %v1170_v56 }
 0x378   :  { %v1251_v20 = vadd.f32 %v683_v7, %v679_v1 }
 0x379   :  { %v838_v21 = vpop.eup %837  ;;  %v684_v50 = vadd.f32 %v682_v8, %v678_v4  ;;  %v620_v16 = vsel %vm53_vm0, %v284_v54, %v452_v12 }
 0x37a   :  { %vm687_vm5 = vcmp.ge.f32.partialorder %v1251_v20, 1.0  ;;  %v612_v26 = vmul.f32 %v838_v21, %v1057_v39 }
 0x37b   :  { %vm686_vm6 = vcmp.ge.f32.partialorder %v684_v50, 1.0  ;;  %v1258_v19 = vsel %vm687_vm5, 1.0, %v884_v43 }
 0x37c   :  { %v751_v22 = vsel %vm686_vm6, 1.0, %v884_v43  ;;  %v629_v34 = vsel %vm624_vm1, %v620_v16, %v612_v26  ;;  %754 = vst.msk [vmem:[%s1321_s5 + $0x18] sm:$0xff] %vm673_vm2, %v1258_v19 }
 0x37d   :  { %753 = vst.msk [vmem:[%s1321_s5 + $0x10] sm:$0xff] %vm673_vm2, %v751_v22  ;;  %v695_v39 = vsub.f32 1.0, %v751_v22  ;;  %v644_v56 = vmul.f32 %v1208_v2, %v629_v34 }
 0x37f   :  { %v697_v28 = vmul.f32 %v695_v39, %v684_v50  ;;  %v659_v29 = vadd.f32 %v1214_v18, %v644_v56 }
 0x381   :  { %v699_v36 = vsub.f32 %v659_v29, %v697_v28 }
 0x383   :  { %v701_v37 = vmul.f32 0.8333333, %v699_v36 }
 0x385   :  { %v703_v32 = vadd.f32 %v701_v37, %v697_v28  ;;  %v696_v28 = vsub.f32 1.0, %v1258_v19 }
 0x387   :  { %vm705_vm7 = vcmp.ge.f32.partialorder %v703_v32, 1.0 }
 0x388   :  { %v755_v40 = vsel %vm705_vm7, 1.0, %v884_v43 }
 0x389   :  { %757 = vst.msk [vmem:[%s1321_s5 + $0x20] sm:$0xff] %vm673_vm2, %v755_v40  ;;  %v714_v12 = vsub.f32 1.0, %v755_v40 }
 0x393   :  { %v420_v45 = vpop.xlane.xlu1 %419 }
 0x394   :  { %v430_v9 = vmul.f32 0.03125, %v420_v45 }
 0x396   :  { %v438_v33 = vadd.f32 1e-12, %v430_v9 }
 0x397   :  { %v580_v48 = vpop.xlane.xlu1 %579 }
 0x398   :  { %839 = vrsqrt.f32 %v438_v33  ;;  %v590_v53 = vmul.f32 0.03125, %v580_v48 }
 0x399   :  { %841 = vrsqrt.f32 %v270_v46  ;;  %v417_v59 = vpop.xlane.xlu0 %416 }
 0x39a   :  { %v598_v55 = vadd.f32 1e-12, %v590_v53  ;;  %v429_v60 = vmul.f32 0.03125, %v417_v59 }
 0x39c   :  { %843 = vrsqrt.f32 %v598_v55  ;;  %v437_v61 = vadd.f32 1e-12, %v429_v60 }
 0x39d   :  { %v577_v0 = vpop.xlane.xlu0 %576 }
 0x39e   :  { %845 = vrsqrt.f32 %v437_v61  ;;  %v589_v52 = vmul.f32 0.03125, %v577_v0 }
 0x39f   :  { %847 = vrsqrt.f32 %v269_v24 }
 0x3a0   :  { %v597_v14 = vadd.f32 1e-12, %v589_v52 }
 0x3a1   :  { %v255_v51 = vpop.xlane.xlu0 %254 }
 0x3a2   :  { %849 = vrsqrt.f32 %v597_v14  ;;  %v263_v10 = vmul.f32 0.03125, %v255_v51 }
 0x3a4   :  { %v271_v1 = vadd.f32 1e-12, %v263_v10 }
 0x3a5   :  { %v840_v49 = vpop.eup %839  ;;  %v423_v31 = vpop.xlane.xlu0 %422 }
 0x3a6   :  { %v842_v63 = vpop.eup %841  ;;  %v431_v41 = vmul.f32 0.03125, %v423_v31  ;;  %v454_v62 = vmul.f32 %v840_v49, %v1103_v13 }
 0x3a7   :  { %v286_v5 = vmul.f32 %v842_v63, %v1183_v25 }
 0x3a8   :  { %v439_v4 = vadd.f32 1e-12, %v431_v41 }
 0x3a9   :  { %v844_v30 = vpop.eup %843  ;;  %v583_v58 = vpop.xlane.xlu0 %582  ;;  %v622_v8 = vsel %vm53_vm0, %v286_v5, %v454_v62 }
 0x3aa   :  { %v614_v6 = vmul.f32 %v844_v30, %v1109_v23  ;;  %851 = vrsqrt.f32 %v439_v4  ;;  %v591_v17 = vmul.f32 0.03125, %v583_v58  ;;  %v716_v23 = vmul.f32 %v714_v12, %v703_v32 }
 0x3ab   :  { %v846_v7 = vpop.eup %845  ;;  %853 = vrsqrt.f32 %v271_v1 }
 0x3ac   :  { %v848_v21 = vpop.eup %847  ;;  %v631_v50 = vsel %vm624_vm1, %v622_v8, %v614_v6  ;;  %v599_v54 = vadd.f32 1e-12, %v591_v17  ;;  %v453_v26 = vmul.f32 %v846_v7, %v1106_v15 }
 0x3ad   :  { %v646_v13 = vmul.f32 %v1208_v2, %v631_v50  ;;  %v285_v16 = vmul.f32 %v848_v21, %v1166_v11  ;;  %v698_v11 = vmul.f32 %v696_v28, %v1251_v20 }
 0x3ae   :  { %855 = vrsqrt.f32 %v599_v54 }
 0x3af   :  { %v850_v25 = vpop.eup %849  ;;  %v661_v22 = vadd.f32 %v1214_v18, %v646_v13  ;;  %v621_v56 = vsel %vm53_vm0, %v285_v16, %v453_v26 }
 0x3b0   :  { %v613_v34 = vmul.f32 %v850_v25, %v1114_v27 }
 0x3b1   :  { %v718_v39 = vsub.f32 %v661_v22, %v716_v23 }
 0x3b2   :  { %v630_v29 = vsel %vm624_vm1, %v621_v56, %v613_v34 }
 0x3b3   :  { %v720_v36 = vmul.f32 0.8333333, %v718_v39  ;;  %v645_v37 = vmul.f32 %v1208_v2, %v630_v29 }
 0x3b5   :  { %v722_v15 = vadd.f32 %v720_v36, %v716_v23  ;;  %v660_v40 = vadd.f32 %v1214_v18, %v645_v37 }
 0x3b7   :  { %v852_v32 = vpop.eup %851  ;;  %vm724_vm8 = vcmp.ge.f32.partialorder %v722_v15, 1.0  ;;  %v700_v42 = vsub.f32 %v660_v40, %v698_v11 }
 0x3b8   :  { %v854_v3 = vpop.eup %853  ;;  %v759_v27 = vsel %vm724_vm8, 1.0, %v884_v43  ;;  %v455_v45 = vmul.f32 %v852_v32, %v1123_v35 }
 0x3b9   :  { %761 = vst.msk [vmem:[%s1321_s5 + $0x30] sm:$0xff] %vm673_vm2, %v759_v27  ;;  %v702_v19 = vmul.f32 0.8333333, %v700_v42  ;;  %v287_v46 = vmul.f32 %v854_v3, %v1193_v57 }
 0x3bb   :  { %v856_v44 = vpop.eup %855  ;;  %v704_v9 = vadd.f32 %v702_v19, %v698_v11  ;;  %v623_v33 = vsel %vm53_vm0, %v287_v46, %v455_v45 }
 0x3bc   :  { %v615_v20 = vmul.f32 %v856_v44, %v1130_v38 }
 0x3bd   :  { %vm706_vm9 = vcmp.ge.f32.partialorder %v704_v9, 1.0 }
 0x3be   :  { %v632_v47 = vsel %vm624_vm1, %v623_v33, %v615_v20  ;;  %v756_v48 = vsel %vm706_vm9, 1.0, %v884_v43 }
 0x3bf   :  { %v647_v53 = vmul.f32 %v1208_v2, %v632_v47  ;;  %758 = vst.msk [vmem:[%s1321_s5 + $0x28] sm:$0xff] %vm673_vm2, %v756_v48  ;;  %v715_v35 = vsub.f32 1.0, %v756_v48 }
 0x3c1   :  { %v662_v59 = vadd.f32 %v1214_v18, %v647_v53  ;;  %v717_v57 = vmul.f32 %v715_v35, %v704_v9 }
 0x3c3   :  { %v719_v55 = vsub.f32 %v662_v59, %v717_v57 }
 0x3c5   :  { %v721_v38 = vmul.f32 0.8333333, %v719_v55 }
 0x3c7   :  { %v723_v60 = vadd.f32 %v721_v38, %v717_v57 }
 0x3c9   :  { %vm725_vm10 = vcmp.ge.f32.partialorder %v723_v60, 1.0 }
 0x3ca   :  { %v760_v24 = vsel %vm725_vm10, 1.0, %v884_v43 }
 0x3cb   :  { %762 = vst.msk [vmem:[%s1321_s5 + $0x38] sm:$0xff] %vm673_vm2, %v760_v24 }
 0x3cc   :  { %737 = vsyncpa [#allocation3], 1 }

// kernel: block_forward.7
= control target key start
LH: loop header
LB: loop body
LE: loop exit
PB: predicated region body
PF: predicated region fallthrough
CT: control target
= control target key end

     0   :  { %vm42_vm0 = vcmask 261120   ;;  %v559_v8 = vmov 0.0   ;;  %s804_s2 = inlined_call_operand.vmem [shape: f32[32,32], index: 2, kind: input, shape index: {}]   ;;  %s805_s0 = inlined_call_operand.vmem [shape: f32[4,16,32], index: 0, kind: input, shape index: {}]   ;;  %s806_s3 = inlined_call_operand.vmem [shape: f32[1,32], index: 3, kind: input, shape index: {}]   ;;  %s807_s4 = inlined_call_operand.vmem [shape: f32[1,32], index: 4, kind: input, shape index: {}]   ;;  %s808_s5 = inlined_call_operand.vmem [shape: f32[1,32], index: 5, kind: input, shape index: {}]   ;;  %s809_s1 = inlined_call_operand.vmem [shape: f32[4,16,32], index: 1, kind: input, shape index: {}]   ;;  %s810_s6 = inlined_call_operand.vmem [shape: f32[4,16,32], index: 6, kind: output, shape index: {}]  }
   0x1   :  { %v34_v0 = vld [vmem:[%s804_s2 + $0x18] sm:$0xff]  ;;  %v33_v1 = vld [vmem:[%s804_s2 + $0x10] sm:$0xff]  ;;  %v23_v2 = vld [vmem:[%s805_s0] sm:$0xff] }
   0x2   :  { %514 = vmatprep.subr.mxu0 %v34_v0  ;;  %534 = vmatprep.subr.mxu1 %v34_v0  ;;  %v24_v3 = vld [vmem:[%s805_s0 + $0x8] sm:$0xff]  ;;  %v307_v5 = vmul.f32 0.8333333, %v23_v2  ;;  %v31_v7 = vld [vmem:[%s804_s2] sm:$0xff]  ;;  %v25_v13 = vld [vmem:[%s805_s0 + $0x10] sm:$0xff] }
   0x3   :  { %515 = vmatpush3.msra.mxu0 %v34_v0  ;;  %v32_v4 = vld [vmem:[%s804_s2 + $0x8] sm:$0xff]  ;;  %522 = vmatprep.mubr.msk.f32.mxu0 %vm42_vm0, %v23_v2  ;;  %v308_v6 = vmul.f32 0.8333333, %v24_v3  ;;  %v27_v14 = vld [vmem:[%s805_s0 + $0x20] sm:$0xff]  ;;  %v26_v18 = vld [vmem:[%s805_s0 + $0x18] sm:$0xff] }
   0x4   :  { %516 = vmatprep.subr.mxu0 %v33_v1  ;;  %538 = vmatpush3.msra.mxu1 %v34_v0  ;;  %vm311_vm1 = vcmp.ge.f32.partialorder %v307_v5, 0.5  ;;  %v28_v17 = vld [vmem:[%s805_s0 + $0x28] sm:$0xff]  ;;  %v29_v19 = vld [vmem:[%s805_s0 + $0x30] sm:$0xff]  ;;  %v30_v24 = vld [vmem:[%s805_s0 + $0x38] sm:$0xff] }
   0x5   :  { %517 = vmatpush3.msra.mxu0 %v33_v1  ;;  %vm312_vm2 = vcmp.ge.f32.partialorder %v308_v6, 0.5  ;;  %535 = vmatprep.subr.mxu1 %v33_v1  ;;  %v474_v9 = vsel %vm311_vm1, 1.0, %v559_v8  ;;  %v463_v52 = vld [vmem:[%s806_s3] ss:$0 sm:$0xff] }
   0x6   :  { %518 = vmatprep.subr.mxu0 %v32_v4  ;;  %v475_v10 = vsel %vm312_vm2, 1.0, %v559_v8  ;;  %539 = vmatpush3.msra.mxu1 %v33_v1  ;;  %v317_v11 = vsub.f32 1.0, %v474_v9 }
   0x7   :  { %519 = vmatpush3.msra.mxu0 %v32_v4  ;;  %v318_v12 = vsub.f32 1.0, %v475_v10  ;;  %536 = vmatprep.subr.mxu1 %v32_v4 }
   0x8   :  { %520 = vmatprep.subr.mxu0 %v31_v7  ;;  %540 = vmatpush3.msra.mxu1 %v32_v4  ;;  %v319_v15 = vmul.f32 %v317_v11, %v307_v5 }
   0x9   :  { %521 = vmatpush3.msra.mxu0 %v31_v7  ;;  %v320_v16 = vmul.f32 %v318_v12, %v308_v6  ;;  %537 = vmatprep.subr.mxu1 %v31_v7 }
   0xa   :  { %523 = vmatmul.mubr.msk.f32.vlgmr.msra.gmra.mxu0 %vm42_vm0, %v24_v3  ;;  %541 = vmatpush3.msra.mxu1 %v31_v7  ;;  %v321_v20 = vsub.f32 %v25_v13, %v319_v15 }
   0xb   :  { %525 = vmatprep.mubr.msk.f32.mxu0 %vm42_vm0, %v25_v13  ;;  %v322_v21 = vsub.f32 %v26_v18, %v320_v16  ;;  %528 = vmatprep.mubr.msk.f32.mxu1 %vm42_vm0, %v27_v14 }
   0xc   :  { %529 = vmatmul.mubr.msk.f32.vlgmr.msra.gmra.mxu1 %vm42_vm0, %v28_v17  ;;  %v323_v22 = vmul.f32 0.8333333, %v321_v20 }
   0xd   :  { %v324_v23 = vmul.f32 0.8333333, %v322_v21  ;;  %531 = vmatprep.mubr.msk.f32.mxu1 %vm42_vm0, %v29_v19 }
   0xe   :  { %526 = vmatmul.mubr.msk.f32.gmra.mxu0 %vm42_vm0, %v26_v18  ;;  %v325_v26 = vadd.f32 %v323_v22, %v319_v15 }
   0xf   :  { %v326_v25 = vadd.f32 %v324_v23, %v320_v16 }
  0x10   :  { %532 = vmatmul.mubr.msk.f32.gmra.mxu1 %vm42_vm0, %v30_v24  ;;  %vm327_vm4 = vcmp.ge.f32.partialorder %v325_v26, 0.5 }
  0x11   :  { %vm328_vm3 = vcmp.ge.f32.partialorder %v326_v25, 0.5  ;;  %v476_v27 = vsel %vm327_vm4, 1.0, %v559_v8 }
  0x12   :  { %v477_v28 = vsel %vm328_vm3, 1.0, %v559_v8  ;;  %v333_v29 = vsub.f32 1.0, %v476_v27 }
  0x13   :  { %v334_v30 = vsub.f32 1.0, %v477_v28 }
  0x14   :  { %v335_v31 = vmul.f32 %v333_v29, %v325_v26 }
  0x15   :  { %v336_v32 = vmul.f32 %v334_v30, %v326_v25 }
  0x16   :  { %v337_v33 = vsub.f32 %v27_v14, %v335_v31 }
  0x17   :  { %v338_v34 = vsub.f32 %v28_v17, %v336_v32 }
  0x18   :  { %v339_v35 = vmul.f32 0.8333333, %v337_v33 }
  0x19   :  { %v340_v36 = vmul.f32 0.8333333, %v338_v34 }
  0x1a   :  { %v341_v37 = vadd.f32 %v339_v35, %v335_v31 }
  0x1b   :  { %v342_v38 = vadd.f32 %v340_v36, %v336_v32 }
  0x1c   :  { %vm343_vm5 = vcmp.ge.f32.partialorder %v341_v37, 0.5 }
  0x1d   :  { %vm344_vm6 = vcmp.ge.f32.partialorder %v342_v38, 0.5  ;;  %v478_v39 = vsel %vm343_vm5, 1.0, %v559_v8 }
  0x1e   :  { %v479_v40 = vsel %vm344_vm6, 1.0, %v559_v8  ;;  %v349_v41 = vsub.f32 1.0, %v478_v39 }
  0x1f   :  { %v350_v42 = vsub.f32 1.0, %v479_v40 }
  0x20   :  { %v351_v43 = vmul.f32 %v349_v41, %v341_v37 }
  0x21   :  { %v352_v44 = vmul.f32 %v350_v42, %v342_v38 }
  0x22   :  { %v353_v45 = vsub.f32 %v29_v19, %v351_v43 }
  0x23   :  { %v354_v46 = vsub.f32 %v30_v24, %v352_v44 }
  0x24   :  { %v355_v47 = vmul.f32 0.8333333, %v353_v45 }
  0x25   :  { %v356_v48 = vmul.f32 0.8333333, %v354_v46 }
  0x26   :  { %v645_v49 = vadd.f32 %v355_v47, %v351_v43 }
  0x27   :  { %v647_v50 = vadd.f32 %v356_v48, %v352_v44 }
  0x28   :  { %vm359_vm7 = vcmp.ge.f32.partialorder %v645_v49, 0.5 }
  0x29   :  { %vm360_vm8 = vcmp.ge.f32.partialorder %v647_v50, 0.5 }
  0xca   :  { %v524_v51 = vpop.f32.mrf.mxu0 }
  0xcb   :  { %v139_v58 = vadd.f32 %v524_v51, %v463_v52 }
  0xcc   :  { %v133_v53 = vpop.f32.mrf.mxu0  ;;  %v530_v54 = vpop.f32.mrf.mxu1 }
  0xcd   :  { %v134_v55 = vadd.f32 %v463_v52, %v133_v53  ;;  %v175_v3 = vsel %vm42_vm0, %v139_v58, 0.0  ;;  %v159_v4 = vadd.f32 %v530_v54, %v463_v52 }
  0xce   :  { %v527_v56 = vpop.f32.mrf.mxu0  ;;  %v153_v57 = vpop.f32.mrf.mxu1 }
  0xcf   :  { %v172_v59 = vsel %vm42_vm0, %v134_v55, 0.0  ;;  %v149_v62 = vadd.f32 %v527_v56, %v463_v52  ;;  %v154_v0 = vadd.f32 %v463_v52, %v153_v57  ;;  %v187_v10 = vsel %vm42_vm0, %v159_v4, 0.0 }
  0xd0   :  { %v143_v60 = vpop.f32.mrf.mxu0  ;;  %173 = vadd.xlane.f32.xlu0 %v172_v59  ;;  %v533_v61 = vpop.f32.mrf.mxu1 }
  0xd1   :  { %v144_v63 = vadd.f32 %v463_v52, %v143_v60  ;;  %v181_v6 = vsel %vm42_vm0, %v149_v62, 0.0  ;;  %v184_v7 = vsel %vm42_vm0, %v154_v0, 0.0  ;;  %v169_v9 = vadd.f32 %v533_v61, %v463_v52 }
  0xd2   :  { %v163_v1 = vpop.f32.mrf.mxu1 }
  0xd3   :  { %v178_v2 = vsel %vm42_vm0, %v144_v63, 0.0  ;;  %v164_v5 = vadd.f32 %v463_v52, %v163_v1  ;;  %v193_v12 = vsel %vm42_vm0, %v169_v9, 0.0 }
  0xd4   :  { %179 = vadd.xlane.f32.xlu1 %v178_v2  ;;  %176 = vadd.xlane.f32.xlu0 %v175_v3 }
  0xd5   :  { %v190_v11 = vsel %vm42_vm0, %v164_v5, 0.0 }
  0xd8   :  { %182 = vadd.xlane.f32.xlu1 %v181_v6  ;;  %185 = vadd.xlane.f32.xlu0 %v184_v7 }
  0xdc   :  { %188 = vadd.xlane.f32.xlu1 %v187_v10  ;;  %191 = vadd.xlane.f32.xlu0 %v190_v11  ;;  %v481_v10 = vsel %vm360_vm8, 1.0, %v559_v8  ;;  %v707_v11 = vld [vmem:[%s807_s4] ss:$0 sm:$0xff] }
  0xe0   :  { %194 = vadd.xlane.f32.xlu1 %v193_v12 }
 0x159   :  { %v174_v13 = vpop.xlane.xlu0 %173 }
 0x15a   :  { %v197_v14 = vmul.f32 0.03125, %v174_v13 }
 0x15c   :  { %v660_v15 = vsub.f32 %v134_v55, %v197_v14 }
 0x15d   :  { %v180_v16 = vpop.xlane.xlu1 %179  ;;  %v177_v17 = vpop.xlane.xlu0 %176 }
 0x15e   :  { %v199_v18 = vmul.f32 0.03125, %v180_v16  ;;  %v198_v19 = vmul.f32 0.03125, %v177_v17  ;;  %v213_v20 = vmul.f32 %v660_v15, %v660_v15  ;;  %v713_v16 = vld [vmem:[%s808_s5] ss:$0 sm:$0xff] }
 0x160   :  { %v664_v21 = vsub.f32 %v144_v63, %v199_v18  ;;  %v666_v22 = vsub.f32 %v139_v58, %v198_v19  ;;  %v221_v23 = vsel %vm42_vm0, %v213_v20, 0.0  ;;  %v366_v18 = vsub.f32 1.0, %v481_v10 }
 0x161   :  { %v183_v24 = vpop.xlane.xlu1 %182  ;;  %222 = vadd.xlane.f32.xlu0 %v221_v23  ;;  %v186_v25 = vpop.xlane.xlu0 %185 }
 0x162   :  { %v200_v26 = vmul.f32 0.03125, %v183_v24  ;;  %v201_v27 = vmul.f32 0.03125, %v186_v25  ;;  %v215_v28 = vmul.f32 %v664_v21, %v664_v21  ;;  %v214_v29 = vmul.f32 %v666_v22, %v666_v22 }
 0x164   :  { %v673_v30 = vsub.f32 %v149_v62, %v200_v26  ;;  %v675_v31 = vsub.f32 %v154_v0, %v201_v27  ;;  %v227_v32 = vsel %vm42_vm0, %v215_v28, 0.0  ;;  %v224_v33 = vsel %vm42_vm0, %v214_v29, 0.0 }
 0x165   :  { %v189_v34 = vpop.xlane.xlu1 %188  ;;  %228 = vadd.xlane.f32.xlu0 %v227_v32  ;;  %225 = vadd.xlane.f32.xlu1 %v224_v33  ;;  %v192_v35 = vpop.xlane.xlu0 %191  ;;  %v368_v27 = vmul.f32 %v366_v18, %v647_v50 }
 0x166   :  { %v202_v36 = vmul.f32 0.03125, %v189_v34  ;;  %v203_v37 = vmul.f32 0.03125, %v192_v35  ;;  %v216_v38 = vmul.f32 %v673_v30, %v673_v30  ;;  %v217_v39 = vmul.f32 %v675_v31, %v675_v31 }
 0x168   :  { %v683_v40 = vsub.f32 %v159_v4, %v202_v36  ;;  %v685_v41 = vsub.f32 %v164_v5, %v203_v37  ;;  %v230_v42 = vsel %vm42_vm0, %v216_v38, 0.0  ;;  %v233_v43 = vsel %vm42_vm0, %v217_v39, 0.0  ;;  %v381_v38 = vld [vmem:[%s809_s1] sm:$0xff] }
 0x169   :  { %v195_v44 = vpop.xlane.xlu1 %194  ;;  %231 = vadd.xlane.f32.xlu1 %v230_v42  ;;  %234 = vadd.xlane.f32.xlu0 %v233_v43  ;;  %v480_v4 = vsel %vm359_vm7, 1.0, %v559_v8 }
 0x16a   :  { %v204_v45 = vmul.f32 0.03125, %v195_v44  ;;  %v218_v46 = vmul.f32 %v683_v40, %v683_v40  ;;  %v219_v47 = vmul.f32 %v685_v41, %v685_v41  ;;  %v365_v7 = vsub.f32 1.0, %v480_v4 }
 0x16c   :  { %v693_v48 = vsub.f32 %v169_v9, %v204_v45  ;;  %v236_v51 = vsel %vm42_vm0, %v218_v46, 0.0  ;;  %v239_v52 = vsel %vm42_vm0, %v219_v47, 0.0  ;;  %v367_v17 = vmul.f32 %v365_v7, %v645_v49 }
 0x16d   :  { %237 = vadd.xlane.f32.xlu1 %v236_v51  ;;  %240 = vadd.xlane.f32.xlu0 %v239_v52  ;;  %v382_v51 = vld [vmem:[%s809_s1 + $0x8] sm:$0xff] }
 0x16e   :  { %v220_v53 = vmul.f32 %v693_v48, %v693_v48 }
 0x170   :  { %v242_v54 = vsel %vm42_vm0, %v220_v53, 0.0 }
 0x171   :  { %243 = vadd.xlane.f32.xlu1 %v242_v54 }
 0x1ea   :  { %v223_v55 = vpop.xlane.xlu0 %222 }
 0x1eb   :  { %v245_v56 = vmul.f32 0.03125, %v223_v55 }
 0x1ed   :  { %v253_v57 = vadd.f32 1e-12, %v245_v56 }
 0x1ee   :  { %v226_v58 = vpop.xlane.xlu1 %225  ;;  %v229_v59 = vpop.xlane.xlu0 %228 }
 0x1ef   :  { %543 = vrsqrt.f32 %v253_v57  ;;  %v246_v60 = vmul.f32 0.03125, %v226_v58  ;;  %v247_v61 = vmul.f32 0.03125, %v229_v59 }
 0x1f1   :  { %v254_v62 = vadd.f32 1e-12, %v246_v60  ;;  %v255_v63 = vadd.f32 1e-12, %v247_v61 }
 0x1f2   :  { %v232_v0 = vpop.xlane.xlu1 %231  ;;  %v235_v3 = vpop.xlane.xlu0 %234 }
 0x1f3   :  { %545 = vrsqrt.f32 %v254_v62  ;;  %v248_v1 = vmul.f32 0.03125, %v232_v0  ;;  %v249_v5 = vmul.f32 0.03125, %v235_v3  ;;  %v486_v3 = vld [vmem:[%s809_s1 + $0x10] sm:$0xff] }
 0x1f4   :  { %547 = vrsqrt.f32 %v255_v63 }
 0x1f5   :  { %v256_v2 = vadd.f32 1e-12, %v248_v1  ;;  %v257_v13 = vadd.f32 1e-12, %v249_v5 }
 0x1f6   :  { %v238_v6 = vpop.xlane.xlu1 %237 }
 0x1f7   :  { %549 = vrsqrt.f32 %v256_v2  ;;  %v250_v14 = vmul.f32 0.03125, %v238_v6 }
 0x1f8   :  { %551 = vrsqrt.f32 %v257_v13 }
 0x1f9   :  { %v258_v25 = vadd.f32 1e-12, %v250_v14 }
 0x1fa   :  { %v244_v35 = vpop.xlane.xlu1 %243 }
 0x1fb   :  { %553 = vrsqrt.f32 %v258_v25  ;;  %v252_v50 = vmul.f32 0.03125, %v244_v35 }
 0x1fc   :  { %v544_v9 = vpop.eup %543 }
 0x1fd   :  { %v269_v12 = vmul.f32 %v544_v9, %v660_v15  ;;  %v241_v15 = vpop.xlane.xlu0 %240  ;;  %v260_v52 = vadd.f32 1e-12, %v252_v50 }
 0x1fe   :  { %v251_v32 = vmul.f32 0.03125, %v241_v15 }
 0x1ff   :  { %v284_v19 = vmul.f32 %v707_v11, %v269_v12 }
 0x200   :  { %v546_v20 = vpop.eup %545  ;;  %v259_v39 = vadd.f32 1e-12, %v251_v32  ;;  %v492_v32 = vld [vmem:[%s809_s1 + $0x20] sm:$0xff] }
 0x201   :  { %v299_v23 = vadd.f32 %v713_v16, %v284_v19  ;;  %v270_v24 = vmul.f32 %v546_v20, %v666_v22  ;;  %v548_v26 = vpop.eup %547 }
 0x202   :  { %v271_v34 = vmul.f32 %v548_v26, %v664_v21  ;;  %555 = vrsqrt.f32 %v259_v39 }
 0x203   :  { %v369_v28 = vsub.f32 %v299_v23, %v367_v17  ;;  %v285_v29 = vmul.f32 %v707_v11, %v270_v24  ;;  %557 = vrsqrt.f32 %v260_v52 }
 0x204   :  { %v550_v36 = vpop.eup %549  ;;  %v286_v43 = vmul.f32 %v707_v11, %v271_v34 }
 0x205   :  { %v371_v33 = vmul.f32 0.8333333, %v369_v28  ;;  %v300_v49 = vadd.f32 %v713_v16, %v285_v29  ;;  %v272_v44 = vmul.f32 %v550_v36, %v673_v30  ;;  %v552_v55 = vpop.eup %551 }
 0x206   :  { %v301_v30 = vadd.f32 %v713_v16, %v286_v43  ;;  %v273_v63 = vmul.f32 %v552_v55, %v675_v31  ;;  %v487_v31 = vld [vmem:[%s809_s1 + $0x18] sm:$0xff] }
 0x207   :  { %v373_v37 = vadd.f32 %v371_v33, %v367_v17  ;;  %v370_v22 = vsub.f32 %v300_v49, %v368_v27  ;;  %v287_v54 = vmul.f32 %v707_v11, %v272_v44  ;;  %v499_v55 = vld [vmem:[%s809_s1 + $0x38] sm:$0xff] }
 0x208   :  { %v554_v0 = vpop.eup %553  ;;  %v288_v5 = vmul.f32 %v707_v11, %v273_v63 }
 0x209   :  { %vm375_vm9 = vcmp.ge.f32.partialorder %v373_v37, 0.5  ;;  %v372_v42 = vmul.f32 0.8333333, %v370_v22  ;;  %v302_v62 = vadd.f32 %v713_v16, %v287_v54  ;;  %v274_v6 = vmul.f32 %v554_v0, %v683_v40 }
 0x20a   :  { %v482_v45 = vsel %vm375_vm9, 1.0, %v559_v8  ;;  %v303_v17 = vadd.f32 %v713_v16, %v288_v5 }
 0x20b   :  { %v374_v21 = vadd.f32 %v372_v42, %v368_v27  ;;  %v383_v46 = vadd.f32 %v482_v45, %v381_v38  ;;  %v387_v47 = vsub.f32 1.0, %v482_v45  ;;  %v289_v40 = vmul.f32 %v707_v11, %v274_v6 }
 0x20d   :  { %vm376_vm10 = vcmp.ge.f32.partialorder %v374_v21, 0.5  ;;  %385 = vst.msk [vmem:[%s810_s6] sm:$0xff] %vm42_vm0, %v383_v46  ;;  %v389_v53 = vmul.f32 %v387_v47, %v373_v37  ;;  %v304_v26 = vadd.f32 %v713_v16, %v289_v40 }
 0x20e   :  { %v483_v56 = vsel %vm376_vm10, 1.0, %v559_v8 }
 0x20f   :  { %v391_v57 = vsub.f32 %v301_v30, %v389_v53  ;;  %v384_v58 = vadd.f32 %v483_v56, %v382_v51  ;;  %v388_v59 = vsub.f32 1.0, %v483_v56  ;;  %v556_v13 = vpop.eup %555 }
 0x210   :  { %v558_v24 = vpop.eup %557  ;;  %v275_v27 = vmul.f32 %v556_v13, %v685_v41  ;;  %v493_v41 = vld [vmem:[%s809_s1 + $0x28] sm:$0xff] }
 0x211   :  { %v393_v60 = vmul.f32 0.8333333, %v391_v57  ;;  %386 = vst.msk [vmem:[%s810_s6 + $0x8] sm:$0xff] %vm42_vm0, %v384_v58  ;;  %v390_v61 = vmul.f32 %v388_v59, %v374_v21  ;;  %v276_v34 = vmul.f32 %v558_v24, %v693_v48 }
 0x212   :  { %v290_v49 = vmul.f32 %v707_v11, %v275_v27 }
 0x213   :  { %v395_v1 = vadd.f32 %v393_v60, %v389_v53  ;;  %v392_v2 = vsub.f32 %v302_v62, %v390_v61  ;;  %v291_v48 = vmul.f32 %v707_v11, %v276_v34  ;;  %v498_v11 = vld [vmem:[%s809_s1 + $0x30] sm:$0xff] }
 0x214   :  { %v305_v39 = vadd.f32 %v713_v16, %v290_v49 }
 0x215   :  { %vm397_vm11 = vcmp.ge.f32.partialorder %v395_v1, 0.5  ;;  %v394_v4 = vmul.f32 0.8333333, %v392_v2  ;;  %v306_v46 = vadd.f32 %v713_v16, %v291_v48 }
 0x216   :  { %v484_v7 = vsel %vm397_vm11, 1.0, %v559_v8 }
 0x217   :  { %v396_v9 = vadd.f32 %v394_v4, %v390_v61  ;;  %v406_v10 = vadd.f32 %v486_v3, %v484_v7  ;;  %v411_v12 = vsub.f32 1.0, %v484_v7 }
 0x219   :  { %vm398_vm12 = vcmp.ge.f32.partialorder %v396_v9, 0.5  ;;  %488 = vst.msk [vmem:[%s810_s6 + $0x10] sm:$0xff] %vm42_vm0, %v406_v10  ;;  %v413_v14 = vmul.f32 %v411_v12, %v395_v1 }
 0x21a   :  { %v485_v18 = vsel %vm398_vm12, 1.0, %v559_v8 }
 0x21b   :  { %v415_v19 = vsub.f32 %v303_v17, %v413_v14  ;;  %v407_v20 = vadd.f32 %v487_v31, %v485_v18  ;;  %v412_v23 = vsub.f32 1.0, %v485_v18 }
 0x21d   :  { %v417_v25 = vmul.f32 0.8333333, %v415_v19  ;;  %489 = vst.msk [vmem:[%s810_s6 + $0x18] sm:$0xff] %vm42_vm0, %v407_v20  ;;  %v414_v15 = vmul.f32 %v412_v23, %v396_v9 }
 0x21f   :  { %v419_v28 = vadd.f32 %v417_v25, %v413_v14  ;;  %v416_v29 = vsub.f32 %v304_v26, %v414_v15 }
 0x221   :  { %vm421_vm13 = vcmp.ge.f32.partialorder %v419_v28, 0.5  ;;  %v418_v33 = vmul.f32 0.8333333, %v416_v29 }
 0x222   :  { %v490_v35 = vsel %vm421_vm13, 1.0, %v559_v8 }
 0x223   :  { %v420_v36 = vadd.f32 %v418_v33, %v414_v15  ;;  %v430_v37 = vadd.f32 %v492_v32, %v490_v35  ;;  %v435_v22 = vsub.f32 1.0, %v490_v35 }
 0x225   :  { %vm422_vm14 = vcmp.ge.f32.partialorder %v420_v36, 0.5  ;;  %494 = vst.msk [vmem:[%s810_s6 + $0x20] sm:$0xff] %vm42_vm0, %v430_v37  ;;  %v437_v38 = vmul.f32 %v435_v22, %v419_v28 }
 0x226   :  { %v491_v50 = vsel %vm422_vm14, 1.0, %v559_v8 }
 0x227   :  { %v439_v42 = vsub.f32 %v305_v39, %v437_v38  ;;  %v431_v43 = vadd.f32 %v493_v41, %v491_v50  ;;  %v436_v44 = vsub.f32 1.0, %v491_v50 }
 0x229   :  { %v441_v45 = vmul.f32 0.8333333, %v439_v42  ;;  %495 = vst.msk [vmem:[%s810_s6 + $0x28] sm:$0xff] %vm42_vm0, %v431_v43  ;;  %v438_v21 = vmul.f32 %v436_v44, %v420_v36 }
 0x22b   :  { %v443_v47 = vadd.f32 %v441_v45, %v437_v38  ;;  %v440_v51 = vsub.f32 %v306_v46, %v438_v21 }
 0x22d   :  { %vm445_vm15 = vcmp.ge.f32.partialorder %v443_v47, 0.5  ;;  %v442_v52 = vmul.f32 0.8333333, %v440_v51 }
 0x22e   :  { %v496_v53 = vsel %vm445_vm15, 1.0, %v559_v8 }
 0x22f   :  { %v454_v30 = vadd.f32 %v498_v11, %v496_v53  ;;  %v444_v54 = vadd.f32 %v442_v52, %v438_v21 }
 0x231   :  { %500 = vst.msk [vmem:[%s810_s6 + $0x30] sm:$0xff] %vm42_vm0, %v454_v30  ;;  %vm446_vm1 = vcmp.ge.f32.partialorder %v444_v54, 0.5 }
 0x232   :  { %v497_v16 = vsel %vm446_vm1, 1.0, %v559_v8 }
 0x233   :  { %v455_v56 = vadd.f32 %v499_v55, %v497_v16 }
 0x235   :  { %501 = vst.msk [vmem:[%s810_s6 + $0x38] sm:$0xff] %vm42_vm0, %v455_v56 }

// kernel: block_forward.8
= control target key start
LH: loop header
LB: loop body
LE: loop exit
PB: predicated region body
PF: predicated region fallthrough
CT: control target
= control target key end

     0   :  { %vm39_vm0 = vcmask 261120   ;;  %s619_s1 = inlined_call_operand.vmem [shape: f32[32,128], index: 1, kind: input, shape index: {}]   ;;  %s620_s0 = inlined_call_operand.vmem [shape: f32[4,16,32], index: 0, kind: input, shape index: {}]   ;;  %s621_s2 = inlined_call_operand.vmem [shape: f32[1,128], index: 2, kind: input, shape index: {}]   ;;  %s622_s3 = inlined_call_operand.vmem [shape: f32[1,128], index: 3, kind: input, shape index: {}]   ;;  %s623_s4 = inlined_call_operand.vmem [shape: f32[1,128], index: 4, kind: input, shape index: {}]   ;;  %s624_s5 = inlined_call_operand.vmem [shape: f32[4,16,128], index: 5, kind: output, shape index: {}]  }
   0x1   :  { %v31_v0 = vld [vmem:[%s619_s1 + $0x18] sm:$0xff]  ;;  %v30_v1 = vld [vmem:[%s619_s1 + $0x10] sm:$0xff]  ;;  %v20_v2 = vld [vmem:[%s620_s0] sm:$0xff] }
   0x2   :  { %398 = vmatprep.subr.mxu0 %v31_v0  ;;  %418 = vmatprep.subr.mxu1 %v31_v0  ;;  %v29_v3 = vld [vmem:[%s619_s1 + $0x8] sm:$0xff]  ;;  %v28_v4 = vld [vmem:[%s619_s1] sm:$0xff]  ;;  %v22_v6 = vld [vmem:[%s620_s0 + $0x10] sm:$0xff] }
   0x3   :  { %399 = vmatpush3.msra.mxu0 %v31_v0  ;;  %406 = vmatprep.mubr.msk.f32.mxu0 %vm39_vm0, %v20_v2  ;;  %v21_v5 = vld [vmem:[%s620_s0 + $0x8] sm:$0xff]  ;;  %v24_v7 = vld [vmem:[%s620_s0 + $0x20] sm:$0xff]  ;;  %v26_v9 = vld [vmem:[%s620_s0 + $0x30] sm:$0xff] }
   0x4   :  { %400 = vmatprep.subr.mxu0 %v30_v1  ;;  %422 = vmatpush3.msra.mxu1 %v31_v0  ;;  %v25_v8 = vld [vmem:[%s620_s0 + $0x28] sm:$0xff]  ;;  %v23_v10 = vld [vmem:[%s620_s0 + $0x18] sm:$0xff]  ;;  %v361_v13 = vld [vmem:[%s621_s2] ss:$0 sm:$0xff] }
   0x5   :  { %401 = vmatpush3.msra.mxu0 %v30_v1  ;;  %419 = vmatprep.subr.mxu1 %v30_v1  ;;  %v27_v11 = vld [vmem:[%s620_s0 + $0x38] sm:$0xff] }
   0x6   :  { %402 = vmatprep.subr.mxu0 %v29_v3  ;;  %423 = vmatpush3.msra.mxu1 %v30_v1 }
   0x7   :  { %403 = vmatpush3.msra.mxu0 %v29_v3  ;;  %420 = vmatprep.subr.mxu1 %v29_v3 }
   0x8   :  { %404 = vmatprep.subr.mxu0 %v28_v4  ;;  %424 = vmatpush3.msra.mxu1 %v29_v3 }
   0x9   :  { %405 = vmatpush3.msra.mxu0 %v28_v4  ;;  %421 = vmatprep.subr.mxu1 %v28_v4 }
   0xa   :  { %407 = vmatmul.mubr.msk.f32.vlgmr.msra.gmra.mxu0 %vm39_vm0, %v21_v5  ;;  %425 = vmatpush3.msra.mxu1 %v28_v4 }
   0xb   :  { %409 = vmatprep.mubr.msk.f32.mxu0 %vm39_vm0, %v22_v6  ;;  %412 = vmatprep.mubr.msk.f32.mxu1 %vm39_vm0, %v24_v7 }
   0xc   :  { %413 = vmatmul.mubr.msk.f32.vlgmr.msra.gmra.mxu1 %vm39_vm0, %v25_v8 }
   0xd   :  { %415 = vmatprep.mubr.msk.f32.mxu1 %vm39_vm0, %v26_v9 }
   0xe   :  { %410 = vmatmul.mubr.msk.f32.gmra.mxu0 %vm39_vm0, %v23_v10 }
  0x10   :  { %416 = vmatmul.mubr.msk.f32.gmra.mxu1 %vm39_vm0, %v27_v11 }
  0xca   :  { %v408_v12 = vpop.f32.mrf.mxu0 }
  0xcb   :  { %v136_v21 = vadd.f32 %v408_v12, %v361_v13 }
  0xcc   :  { %v130_v14 = vpop.f32.mrf.mxu0  ;;  %v414_v15 = vpop.f32.mrf.mxu1 }
  0xcd   :  { %v131_v16 = vadd.f32 %v361_v13, %v130_v14  ;;  %v156_v26 = vadd.f32 %v414_v15, %v361_v13  ;;  %v556_v15 = vld [vmem:[%s622_s3] ss:$0 sm:$0xff] }
  0xce   :  { %v411_v17 = vpop.f32.mrf.mxu0  ;;  %v150_v18 = vpop.f32.mrf.mxu1 }
  0xcf   :  { %169 = vadd.xlane.f32.xlu0 %v131_v16  ;;  %v151_v23 = vadd.f32 %v361_v13, %v150_v18  ;;  %v146_v25 = vadd.f32 %v411_v17, %v361_v13 }
  0xd0   :  { %v140_v19 = vpop.f32.mrf.mxu0  ;;  %v417_v20 = vpop.f32.mrf.mxu1 }
  0xd1   :  { %v141_v22 = vadd.f32 %v361_v13, %v140_v19  ;;  %v166_v28 = vadd.f32 %v417_v20, %v361_v13  ;;  %v562_v19 = vld [vmem:[%s623_s4] ss:$0 sm:$0xff] }
  0xd2   :  { %v160_v24 = vpop.f32.mrf.mxu1 }
  0xd3   :  { %173 = vadd.xlane.f32.xlu1 %v141_v22  ;;  %171 = vadd.xlane.f32.xlu0 %v136_v21  ;;  %v161_v27 = vadd.f32 %v361_v13, %v160_v24 }
  0xd7   :  { %175 = vadd.xlane.f32.xlu1 %v146_v25  ;;  %177 = vadd.xlane.f32.xlu0 %v151_v23 }
  0xdb   :  { %179 = vadd.xlane.f32.xlu1 %v156_v26  ;;  %181 = vadd.xlane.f32.xlu0 %v161_v27 }
  0xdf   :  { %183 = vadd.xlane.f32.xlu1 %v166_v28 }
 0x158   :  { %v170_v29 = vpop.xlane.xlu0 %169 }
 0x159   :  { %v186_v30 = vmul.f32 0.0078125, %v170_v29 }
 0x15b   :  { %v521_v31 = vsub.f32 %v131_v16, %v186_v30 }
 0x15c   :  { %v174_v32 = vpop.xlane.xlu1 %173  ;;  %v172_v33 = vpop.xlane.xlu0 %171 }
 0x15d   :  { %v188_v34 = vmul.f32 0.0078125, %v174_v32  ;;  %v187_v35 = vmul.f32 0.0078125, %v172_v33  ;;  %v202_v36 = vmul.f32 %v521_v31, %v521_v31 }
 0x15f   :  { %v525_v37 = vsub.f32 %v141_v22, %v188_v34  ;;  %v527_v38 = vsub.f32 %v136_v21, %v187_v35  ;;  %210 = vadd.xlane.f32.xlu0 %v202_v36  ;;  %v443_v36 = vmov 0.0  }
 0x160   :  { %v176_v39 = vpop.xlane.xlu1 %175  ;;  %v178_v40 = vpop.xlane.xlu0 %177 }
 0x161   :  { %v189_v41 = vmul.f32 0.0078125, %v176_v39  ;;  %v190_v42 = vmul.f32 0.0078125, %v178_v40  ;;  %v204_v43 = vmul.f32 %v525_v37, %v525_v37  ;;  %v203_v44 = vmul.f32 %v527_v38, %v527_v38 }
 0x163   :  { %v533_v45 = vsub.f32 %v146_v25, %v189_v41  ;;  %v535_v46 = vsub.f32 %v151_v23, %v190_v42  ;;  %214 = vadd.xlane.f32.xlu0 %v204_v43  ;;  %212 = vadd.xlane.f32.xlu1 %v203_v44 }
 0x164   :  { %v180_v47 = vpop.xlane.xlu1 %179  ;;  %v182_v48 = vpop.xlane.xlu0 %181 }
 0x165   :  { %v191_v49 = vmul.f32 0.0078125, %v180_v47  ;;  %v192_v50 = vmul.f32 0.0078125, %v182_v48  ;;  %v205_v51 = vmul.f32 %v533_v45, %v533_v45  ;;  %v206_v52 = vmul.f32 %v535_v46, %v535_v46 }
 0x167   :  { %v541_v53 = vsub.f32 %v156_v26, %v191_v49  ;;  %v543_v54 = vsub.f32 %v161_v27, %v192_v50  ;;  %216 = vadd.xlane.f32.xlu1 %v205_v51  ;;  %218 = vadd.xlane.f32.xlu0 %v206_v52 }
 0x168   :  { %v184_v55 = vpop.xlane.xlu1 %183 }
 0x169   :  { %v193_v56 = vmul.f32 0.0078125, %v184_v55  ;;  %v207_v57 = vmul.f32 %v541_v53, %v541_v53  ;;  %v208_v58 = vmul.f32 %v543_v54, %v543_v54 }
 0x16b   :  { %v549_v59 = vsub.f32 %v166_v28, %v193_v56  ;;  %220 = vadd.xlane.f32.xlu1 %v207_v57  ;;  %222 = vadd.xlane.f32.xlu0 %v208_v58 }
 0x16d   :  { %v209_v60 = vmul.f32 %v549_v59, %v549_v59 }
 0x16f   :  { %224 = vadd.xlane.f32.xlu1 %v209_v60 }
 0x1e8   :  { %v211_v61 = vpop.xlane.xlu0 %210 }
 0x1e9   :  { %v226_v62 = vmul.f32 0.0078125, %v211_v61 }
 0x1eb   :  { %v234_v63 = vadd.f32 1e-12, %v226_v62 }
 0x1ec   :  { %v213_v0 = vpop.xlane.xlu1 %212  ;;  %v215_v1 = vpop.xlane.xlu0 %214 }
 0x1ed   :  { %427 = vrsqrt.f32 %v234_v63  ;;  %v227_v2 = vmul.f32 0.0078125, %v213_v0  ;;  %v228_v3 = vmul.f32 0.0078125, %v215_v1 }
 0x1ef   :  { %v235_v4 = vadd.f32 1e-12, %v227_v2  ;;  %v236_v5 = vadd.f32 1e-12, %v228_v3 }
 0x1f0   :  { %v217_v6 = vpop.xlane.xlu1 %216  ;;  %v219_v7 = vpop.xlane.xlu0 %218 }
 0x1f1   :  { %429 = vrsqrt.f32 %v235_v4  ;;  %v229_v8 = vmul.f32 0.0078125, %v217_v6  ;;  %v230_v10 = vmul.f32 0.0078125, %v219_v7 }
 0x1f2   :  { %431 = vrsqrt.f32 %v236_v5 }
 0x1f3   :  { %v237_v9 = vadd.f32 1e-12, %v229_v8  ;;  %v238_v12 = vadd.f32 1e-12, %v230_v10 }
 0x1f4   :  { %v221_v11 = vpop.xlane.xlu1 %220  ;;  %v223_v18 = vpop.xlane.xlu0 %222 }
 0x1f5   :  { %433 = vrsqrt.f32 %v237_v9  ;;  %v231_v13 = vmul.f32 0.0078125, %v221_v11  ;;  %v232_v22 = vmul.f32 0.0078125, %v223_v18 }
 0x1f6   :  { %435 = vrsqrt.f32 %v238_v12 }
 0x1f7   :  { %v239_v17 = vadd.f32 1e-12, %v231_v13 }
 0x1f8   :  { %v225_v26 = vpop.xlane.xlu1 %224 }
 0x1f9   :  { %437 = vrsqrt.f32 %v239_v17  ;;  %v233_v32 = vmul.f32 0.0078125, %v225_v26 }
 0x1fa   :  { %v428_v14 = vpop.eup %427 }
 0x1fb   :  { %v250_v16 = vmul.f32 %v428_v14, %v521_v31  ;;  %v240_v31 = vadd.f32 1e-12, %v232_v22  ;;  %v241_v40 = vadd.f32 1e-12, %v233_v32 }
 0x1fd   :  { %v265_v20 = vmul.f32 %v556_v15, %v250_v16  ;;  %439 = vrsqrt.f32 %v240_v31 }
 0x1fe   :  { %v430_v21 = vpop.eup %429  ;;  %441 = vrsqrt.f32 %v241_v40 }
 0x1ff   :  { %v432_v23 = vpop.eup %431  ;;  %v280_v24 = vadd.f32 %v562_v19, %v265_v20  ;;  %v251_v25 = vmul.f32 %v430_v21, %v527_v38 }
 0x200   :  { %v252_v27 = vmul.f32 %v432_v23, %v525_v37 }
 0x201   :  { %v288_v28 = vmul.f32 0.8333333, %v280_v24  ;;  %v266_v29 = vmul.f32 %v556_v15, %v251_v25 }
 0x202   :  { %v434_v30 = vpop.eup %433  ;;  %v267_v34 = vmul.f32 %v556_v15, %v252_v27 }
 0x203   :  { %vm292_vm1 = vcmp.ge.f32.partialorder %v288_v28, 1.0  ;;  %v281_v33 = vadd.f32 %v562_v19, %v266_v29  ;;  %v253_v35 = vmul.f32 %v434_v30, %v533_v45  ;;  %v436_v44 = vpop.eup %435 }
 0x204   :  { %v372_v38 = vsel %vm292_vm1, 1.0, %v443_v36  ;;  %v282_v42 = vadd.f32 %v562_v19, %v267_v34  ;;  %v254_v52 = vmul.f32 %v436_v44, %v535_v46 }
 0x205   :  { %298 = vst [vmem:[%s624_s5] sm:$0xff] %v372_v38  ;;  %v300_v37 = vsub.f32 1.0, %v372_v38  ;;  %v289_v39 = vmul.f32 0.8333333, %v281_v33  ;;  %v268_v43 = vmul.f32 %v556_v15, %v253_v35 }
 0x206   :  { %v438_v55 = vpop.eup %437  ;;  %v269_v60 = vmul.f32 %v556_v15, %v254_v52 }
 0x207   :  { %v302_v41 = vmul.f32 %v300_v37, %v288_v28  ;;  %vm293_vm2 = vcmp.ge.f32.partialorder %v289_v39, 1.0  ;;  %v283_v51 = vadd.f32 %v562_v19, %v268_v43  ;;  %v255_v61 = vmul.f32 %v438_v55, %v541_v53 }
 0x208   :  { %v373_v45 = vsel %vm293_vm2, 1.0, %v443_v36  ;;  %v284_v2 = vadd.f32 %v562_v19, %v269_v60 }
 0x209   :  { %299 = vst [vmem:[%s624_s5 + $0x8] sm:$0xff] %v373_v45  ;;  %v301_v47 = vsub.f32 1.0, %v373_v45  ;;  %v304_v48 = vsub.f32 %v282_v42, %v302_v41  ;;  %v270_v3 = vmul.f32 %v556_v15, %v255_v61 }
 0x20a   :  { %v440_v1 = vpop.eup %439 }
 0x20b   :  { %v303_v49 = vmul.f32 %v301_v47, %v289_v39  ;;  %v306_v50 = vmul.f32 0.8333333, %v304_v48  ;;  %v442_v6 = vpop.eup %441  ;;  %v285_v9 = vadd.f32 %v562_v19, %v270_v3  ;;  %v256_v10 = vmul.f32 %v440_v1, %v543_v54 }
 0x20c   :  { %v257_v16 = vmul.f32 %v442_v6, %v549_v59 }
 0x20d   :  { %v308_v56 = vadd.f32 %v306_v50, %v302_v41  ;;  %v305_v57 = vsub.f32 %v283_v51, %v303_v49  ;;  %v271_v14 = vmul.f32 %v556_v15, %v256_v10 }
 0x20e   :  { %v272_v22 = vmul.f32 %v556_v15, %v257_v16 }
 0x20f   :  { %vm310_vm3 = vcmp.ge.f32.partialorder %v308_v56, 1.0  ;;  %v307_v58 = vmul.f32 0.8333333, %v305_v57  ;;  %v286_v54 = vadd.f32 %v562_v19, %v271_v14 }
 0x210   :  { %v374_v62 = vsel %vm310_vm3, 1.0, %v443_v36  ;;  %v287_v27 = vadd.f32 %v562_v19, %v272_v22 }
 0x211   :  { %v309_v63 = vadd.f32 %v307_v58, %v303_v49  ;;  %376 = vst [vmem:[%s624_s5 + $0x10] sm:$0xff] %v374_v62  ;;  %v319_v0 = vsub.f32 1.0, %v374_v62 }
 0x213   :  { %vm311_vm4 = vcmp.ge.f32.partialorder %v309_v63, 1.0  ;;  %v321_v46 = vmul.f32 %v319_v0, %v308_v56 }
 0x214   :  { %v375_v4 = vsel %vm311_vm4, 1.0, %v443_v36 }
 0x215   :  { %v323_v5 = vsub.f32 %v284_v2, %v321_v46  ;;  %377 = vst [vmem:[%s624_s5 + $0x18] sm:$0xff] %v375_v4  ;;  %v320_v53 = vsub.f32 1.0, %v375_v4 }
 0x217   :  { %v325_v7 = vmul.f32 0.8333333, %v323_v5  ;;  %v322_v8 = vmul.f32 %v320_v53, %v309_v63 }
 0x219   :  { %v327_v11 = vadd.f32 %v325_v7, %v321_v46  ;;  %v324_v12 = vsub.f32 %v285_v9, %v322_v8 }
 0x21b   :  { %vm329_vm5 = vcmp.ge.f32.partialorder %v327_v11, 1.0  ;;  %v326_v13 = vmul.f32 0.8333333, %v324_v12 }
 0x21c   :  { %v378_v17 = vsel %vm329_vm5, 1.0, %v443_v36 }
 0x21d   :  { %v328_v18 = vadd.f32 %v326_v13, %v322_v8  ;;  %380 = vst [vmem:[%s624_s5 + $0x20] sm:$0xff] %v378_v17  ;;  %v338_v20 = vsub.f32 1.0, %v378_v17 }
 0x21f   :  { %vm330_vm6 = vcmp.ge.f32.partialorder %v328_v18, 1.0  ;;  %v340_v21 = vmul.f32 %v338_v20, %v327_v11 }
 0x220   :  { %v379_v23 = vsel %vm330_vm6, 1.0, %v443_v36 }
 0x221   :  { %v342_v24 = vsub.f32 %v286_v54, %v340_v21  ;;  %381 = vst [vmem:[%s624_s5 + $0x28] sm:$0xff] %v379_v23  ;;  %v339_v59 = vsub.f32 1.0, %v379_v23 }
 0x223   :  { %v344_v25 = vmul.f32 0.8333333, %v342_v24  ;;  %v341_v26 = vmul.f32 %v339_v59, %v328_v18 }
 0x225   :  { %v346_v28 = vadd.f32 %v344_v25, %v340_v21  ;;  %v343_v29 = vsub.f32 %v287_v27, %v341_v26 }
 0x227   :  { %vm348_vm7 = vcmp.ge.f32.partialorder %v346_v28, 1.0  ;;  %v345_v30 = vmul.f32 0.8333333, %v343_v29 }
 0x228   :  { %v382_v31 = vsel %vm348_vm7, 1.0, %v443_v36 }
 0x229   :  { %384 = vst [vmem:[%s624_s5 + $0x30] sm:$0xff] %v382_v31  ;;  %v347_v15 = vadd.f32 %v345_v30, %v341_v26 }
 0x22b   :  { %vm349_vm8 = vcmp.ge.f32.partialorder %v347_v15, 1.0 }
 0x22c   :  { %v383_v32 = vsel %vm349_vm8, 1.0, %v443_v36 }
 0x22d   :  { %385 = vst [vmem:[%s624_s5 + $0x38] sm:$0xff] %v383_v32 }

// kernel: block_forward.9
= control target key start
LH: loop header
LB: loop body
LE: loop exit
PB: predicated region body
PF: predicated region fallthrough
CT: control target
= control target key end

     0   :  { %s798_s0 = inlined_call_operand.vmem [shape: f32[4,16,128], index: 0, kind: input, shape index: {}]   ;;  %s799_s1 = inlined_call_operand.vmem [shape: f32[128,32], index: 1, kind: input, shape index: {}]   ;;  %s800_s2 = inlined_call_operand.vmem [shape: f32[1,32], index: 2, kind: input, shape index: {}]   ;;  %s801_s3 = inlined_call_operand.vmem [shape: f32[1,32], index: 3, kind: input, shape index: {}]   ;;  %s802_s4 = inlined_call_operand.vmem [shape: f32[1,32], index: 4, kind: input, shape index: {}]   ;;  %s803_s5 = inlined_call_operand.vmem [shape: f32[4,16,32], index: 5, kind: input, shape index: {}]   ;;  %s804_s6 = inlined_call_operand.hbm [shape: f32[4,16,32], index: 6, kind: output, shape index: {}]  }
   0x1   :  { %v47_v0 = vld [vmem:[%s799_s1 + $0x78] sm:$0xff]  ;;  %v46_v1 = vld [vmem:[%s799_s1 + $0x70] sm:$0xff]  ;;  %v45_v2 = vld [vmem:[%s799_s1 + $0x68] sm:$0xff] }
   0x2   :  { %441 = vmatprep.subr.mxu0 %v47_v0  ;;  %485 = vmatprep.subr.mxu1 %v47_v0  ;;  %v44_v3 = vld [vmem:[%s799_s1 + $0x60] sm:$0xff]  ;;  %v43_v4 = vld [vmem:[%s799_s1 + $0x58] sm:$0xff]  ;;  %v42_v5 = vld [vmem:[%s799_s1 + $0x50] sm:$0xff] }
   0x3   :  { %442 = vmatpush3.msra.mxu0 %v47_v0  ;;  %501 = vmatpush3.msra.mxu1 %v47_v0 }
   0x4   :  { %443 = vmatprep.subr.mxu0 %v46_v1  ;;  %486 = vmatprep.subr.mxu1 %v46_v1 }
   0x5   :  { %444 = vmatpush3.msra.mxu0 %v46_v1  ;;  %502 = vmatpush3.msra.mxu1 %v46_v1 }
   0x6   :  { %445 = vmatprep.subr.mxu0 %v45_v2  ;;  %487 = vmatprep.subr.mxu1 %v45_v2 }
   0x7   :  { %446 = vmatpush3.msra.mxu0 %v45_v2  ;;  %503 = vmatpush3.msra.mxu1 %v45_v2 }
   0x8   :  { %447 = vmatprep.subr.mxu0 %v44_v3  ;;  %488 = vmatprep.subr.mxu1 %v44_v3 }
   0x9   :  { %448 = vmatpush3.msra.mxu0 %v44_v3  ;;  %504 = vmatpush3.msra.mxu1 %v44_v3 }
   0xa   :  { %11 = vsyncpa [#allocation3], 0  ;;  %449 = vmatprep.subr.mxu0 %v43_v4  ;;  %489 = vmatprep.subr.mxu1 %v43_v4  ;;  %v41_v6 = vld [vmem:[%s799_s1 + $0x48] sm:$0xff]  ;;  %v40_v7 = vld [vmem:[%s799_s1 + $0x40] sm:$0xff]  ;;  %vm160_vm0 = vcmask 261120   ;;  %s560_s13 = smov [#allocation2]  }
   0xb   :  { %450 = vmatpush3.msra.mxu0 %v43_v4  ;;  %505 = vmatpush3.msra.mxu1 %v43_v4  ;;  %v39_v8 = vld [vmem:[%s799_s1 + $0x38] sm:$0xff]  ;;  %v38_v9 = vld [vmem:[%s799_s1 + $0x30] sm:$0xff]  ;;  %v37_v10 = vld [vmem:[%s799_s1 + $0x28] sm:$0xff]  ;;  %s389_s14 = sshll.u32 %s560_s13, 4  ;;  %s390_s14 = int_to_ptr.vmem [resolvable:$true] %s389_s14 }
   0xc   :  { %451 = vmatprep.subr.mxu0 %v42_v5  ;;  %490 = vmatprep.subr.mxu1 %v42_v5  ;;  %v36_v11 = vld [vmem:[%s799_s1 + $0x20] sm:$0xff]  ;;  %v35_v12 = vld [vmem:[%s799_s1 + $0x18] sm:$0xff]  ;;  %v34_v14 = vld [vmem:[%s799_s1 + $0x10] sm:$0xff]  ;;  %s537_s15 = scalar_lea.vmem %s390_s14, 1024  ;;  %p542_p1 = scmp.lt.s32.totalorder %s390_s14, %s390_s14 }
   0xd   :  { %452 = vmatpush3.msra.mxu0 %v42_v5  ;;  %506 = vmatpush3.msra.mxu1 %v42_v5  ;;  %v24_v13 = vld [vmem:[%s798_s0] sm:$0xff]  ;;  %v33_v15 = vld [vmem:[%s799_s1 + $0x8] sm:$0xff]  ;;  %v26_v18 = vld [vmem:[%s798_s0 + $0x10] sm:$0xff]  ;;  %p538_p0 = scmp.ne.s32.totalorder %s390_s14, %s537_s15  ;;  %p543_p2 = scmp.lt.s32.totalorder %s537_s15, %s537_s15 }
   0xe   :  { %453 = vmatprep.subr.mxu0 %v41_v6  ;;  %491 = vmatprep.subr.mxu1 %v41_v6  ;;  %v32_v16 = vld [vmem:[%s799_s1] sm:$0xff]  ;;  %v25_v17 = vld [vmem:[%s798_s0 + $0x8] sm:$0xff]  ;;  %v30_v21 = vld [vmem:[%s798_s0 + $0x30] sm:$0xff] }
   0xf   :  { %454 = vmatpush3.msra.mxu0 %v41_v6  ;;  %507 = vmatpush3.msra.mxu1 %v41_v6  ;;  %v28_v19 = vld [vmem:[%s798_s0 + $0x20] sm:$0xff]  ;;  %v29_v20 = vld [vmem:[%s798_s0 + $0x28] sm:$0xff]  ;;  %v27_v22 = vld [vmem:[%s798_s0 + $0x18] sm:$0xff]  ;;  %p544_p3 = por %p543_p2, %p542_p1 }
  0x10   :  { %455 = vmatprep.subr.mxu0 %v40_v7  ;;  %492 = vmatprep.subr.mxu1 %v40_v7  ;;  %v31_v23 = vld [vmem:[%s798_s0 + $0x38] sm:$0xff]  ;;  %v400_v25 = vld [vmem:[%s800_s2] ss:$0 sm:$0xff] }
  0x11   :  { %456 = vmatpush3.msra.mxu0 %v40_v7  ;;  %508 = vmatpush3.msra.mxu1 %v40_v7  ;;  %p545_p4 = pnand %p544_p3, %p538_p0 }
  0x12   :  { %457 = vmatprep.subr.mxu0 %v39_v8  ;;  %493 = vmatprep.subr.mxu1 %v39_v8 }
  0x13   :  { %458 = vmatpush3.msra.mxu0 %v39_v8  ;;  %509 = vmatpush3.msra.mxu1 %v39_v8 }
  0x14   :  { %459 = vmatprep.subr.mxu0 %v38_v9  ;;  %494 = vmatprep.subr.mxu1 %v38_v9 }
  0x15   :  { %460 = vmatpush3.msra.mxu0 %v38_v9  ;;  %510 = vmatpush3.msra.mxu1 %v38_v9 }
  0x16   :  { %461 = vmatprep.subr.mxu0 %v37_v10  ;;  %495 = vmatprep.subr.mxu1 %v37_v10 }
  0x17   :  { %462 = vmatpush3.msra.mxu0 %v37_v10  ;;  %511 = vmatpush3.msra.mxu1 %v37_v10 }
  0x18   :  { %463 = vmatprep.subr.mxu0 %v36_v11  ;;  %496 = vmatprep.subr.mxu1 %v36_v11 }
  0x19   :  { %464 = vmatpush3.msra.mxu0 %v36_v11  ;;  %512 = vmatpush3.msra.mxu1 %v36_v11 }
  0x1a   :  { %465 = vmatprep.subr.mxu0 %v35_v12  ;;  %473 = vmatprep.mubr.f32.mxu0 %v24_v13 }
  0x1b   :  { %466 = vmatpush3.msra.mxu0 %v35_v12  ;;  %497 = vmatprep.subr.mxu1 %v35_v12 }
  0x1c   :  { %467 = vmatprep.subr.mxu0 %v34_v14  ;;  %513 = vmatpush3.msra.mxu1 %v35_v12 }
  0x1d   :  { %468 = vmatpush3.msra.mxu0 %v34_v14  ;;  %498 = vmatprep.subr.mxu1 %v34_v14 }
  0x1e   :  { %469 = vmatprep.subr.mxu0 %v33_v15  ;;  %514 = vmatpush3.msra.mxu1 %v34_v14 }
  0x1f   :  { %470 = vmatpush3.msra.mxu0 %v33_v15  ;;  %499 = vmatprep.subr.mxu1 %v33_v15 }
  0x20   :  { %471 = vmatprep.subr.mxu0 %v32_v16  ;;  %515 = vmatpush3.msra.mxu1 %v33_v15 }
  0x21   :  { %472 = vmatpush3.msra.mxu0 %v32_v16  ;;  %500 = vmatprep.subr.mxu1 %v32_v16 }
  0x22   :  { %474 = vmatmul.mubr.f32.vlgmr.msra.gmra.mxu0 %v25_v17  ;;  %516 = vmatpush3.msra.mxu1 %v32_v16 }
  0x23   :  { %476 = vmatprep.mubr.f32.mxu0 %v26_v18  ;;  %479 = vmatprep.mubr.f32.mxu1 %v28_v19 }
  0x24   :  { %480 = vmatmul.mubr.f32.vlgmr.msra.gmra.mxu1 %v29_v20 }
  0x25   :  { %482 = vmatprep.mubr.f32.mxu1 %v30_v21 }
  0x26   :  { %477 = vmatmul.mubr.f32.gmra.mxu0 %v27_v22 }
  0x28   :  { %483 = vmatmul.mubr.f32.gmra.mxu1 %v31_v23 }
  0xe2   :  { %v475_v24 = vpop.f32.mrf.mxu0 }
  0xe3   :  { %v127_v31 = vadd.f32 %v475_v24, %v400_v25 }
  0xe4   :  { %v121_v26 = vpop.f32.mrf.mxu0  ;;  %v481_v27 = vpop.f32.mrf.mxu1 }
  0xe5   :  { %v122_v28 = vadd.f32 %v400_v25, %v121_v26  ;;  %v164_v40 = vsel %vm160_vm0, %v127_v31, 0.0  ;;  %v147_v41 = vadd.f32 %v481_v27, %v400_v25 }
  0xe6   :  { %v478_v29 = vpop.f32.mrf.mxu0  ;;  %v141_v30 = vpop.f32.mrf.mxu1 }
  0xe7   :  { %v161_v32 = vsel %vm160_vm0, %v122_v28, 0.0  ;;  %v142_v36 = vadd.f32 %v400_v25, %v141_v30  ;;  %v137_v38 = vadd.f32 %v478_v29, %v400_v25  ;;  %v176_v46 = vsel %vm160_vm0, %v147_v41, 0.0 }
  0xe8   :  { %v131_v33 = vpop.f32.mrf.mxu0  ;;  %162 = vadd.xlane.f32.xlu0 %v161_v32  ;;  %v484_v34 = vpop.f32.mrf.mxu1 }
  0xe9   :  { %v132_v35 = vadd.f32 %v400_v25, %v131_v33  ;;  %v173_v43 = vsel %vm160_vm0, %v142_v36, 0.0  ;;  %v170_v44 = vsel %vm160_vm0, %v137_v38, 0.0  ;;  %v157_v45 = vadd.f32 %v484_v34, %v400_v25 }
  0xea   :  { %v151_v37 = vpop.f32.mrf.mxu1 }
  0xeb   :  { %v167_v39 = vsel %vm160_vm0, %v132_v35, 0.0  ;;  %v152_v42 = vadd.f32 %v400_v25, %v151_v37  ;;  %v182_v48 = vsel %vm160_vm0, %v157_v45, 0.0 }
  0xec   :  { %168 = vadd.xlane.f32.xlu1 %v167_v39  ;;  %165 = vadd.xlane.f32.xlu0 %v164_v40 }
  0xed   :  { %v179_v47 = vsel %vm160_vm0, %v152_v42, 0.0 }
  0xf0   :  { %171 = vadd.xlane.f32.xlu1 %v170_v44  ;;  %174 = vadd.xlane.f32.xlu0 %v173_v43  ;;  %v724_v43 = vld [vmem:[%s801_s3] ss:$0 sm:$0xff] }
  0xf4   :  { %177 = vadd.xlane.f32.xlu1 %v176_v46  ;;  %180 = vadd.xlane.f32.xlu0 %v179_v47  ;;  %v730_v47 = vld [vmem:[%s802_s4] ss:$0 sm:$0xff] }
  0xf8   :  { %183 = vadd.xlane.f32.xlu1 %v182_v48 }
 0x171   :  { %v163_v49 = vpop.xlane.xlu0 %162 }
 0x172   :  { %v186_v50 = vmul.f32 0.03125, %v163_v49 }
 0x174   :  { %v681_v51 = vsub.f32 %v122_v28, %v186_v50 }
 0x175   :  { %v169_v52 = vpop.xlane.xlu1 %168  ;;  %v166_v53 = vpop.xlane.xlu0 %165 }
 0x176   :  { %v188_v54 = vmul.f32 0.03125, %v169_v52  ;;  %v187_v55 = vmul.f32 0.03125, %v166_v53  ;;  %v202_v56 = vmul.f32 %v681_v51, %v681_v51 }
 0x178   :  { %v685_v57 = vsub.f32 %v132_v35, %v188_v54  ;;  %v687_v58 = vsub.f32 %v127_v31, %v187_v55  ;;  %v210_v59 = vsel %vm160_vm0, %v202_v56, 0.0 }
 0x179   :  { %v172_v60 = vpop.xlane.xlu1 %171  ;;  %211 = vadd.xlane.f32.xlu0 %v210_v59  ;;  %v175_v61 = vpop.xlane.xlu0 %174 }
 0x17a   :  { %v189_v62 = vmul.f32 0.03125, %v172_v60  ;;  %v190_v63 = vmul.f32 0.03125, %v175_v61  ;;  %v204_v0 = vmul.f32 %v685_v57, %v685_v57  ;;  %v203_v1 = vmul.f32 %v687_v58, %v687_v58  ;;  %v306_v61 = vld [vmem:[%s803_s5] sm:$0xff] }
 0x17c   :  { %v694_v2 = vsub.f32 %v137_v38, %v189_v62  ;;  %v696_v3 = vsub.f32 %v142_v36, %v190_v63  ;;  %v216_v4 = vsel %vm160_vm0, %v204_v0, 0.0  ;;  %v213_v5 = vsel %vm160_vm0, %v203_v1, 0.0 }
 0x17d   :  { %v178_v6 = vpop.xlane.xlu1 %177  ;;  %217 = vadd.xlane.f32.xlu0 %v216_v4  ;;  %214 = vadd.xlane.f32.xlu1 %v213_v5  ;;  %v181_v7 = vpop.xlane.xlu0 %180  ;;  %v559_v4 = vmov 0.0  }
 0x17e   :  { %v191_v8 = vmul.f32 0.03125, %v178_v6  ;;  %v192_v9 = vmul.f32 0.03125, %v181_v7  ;;  %v205_v10 = vmul.f32 %v694_v2, %v694_v2  ;;  %v206_v11 = vmul.f32 %v696_v3, %v696_v3 }
 0x180   :  { %v704_v12 = vsub.f32 %v147_v41, %v191_v8  ;;  %v706_v13 = vsub.f32 %v152_v42, %v192_v9  ;;  %v219_v14 = vsel %vm160_vm0, %v205_v10, 0.0  ;;  %v222_v15 = vsel %vm160_vm0, %v206_v11, 0.0  ;;  %v307_v8 = vld [vmem:[%s803_s5 + $0x8] sm:$0xff] }
 0x181   :  { %v184_v16 = vpop.xlane.xlu1 %183  ;;  %220 = vadd.xlane.f32.xlu1 %v219_v14  ;;  %223 = vadd.xlane.f32.xlu0 %v222_v15 }
 0x182   :  { %v193_v17 = vmul.f32 0.03125, %v184_v16  ;;  %v207_v18 = vmul.f32 %v704_v12, %v704_v12  ;;  %v208_v19 = vmul.f32 %v706_v13, %v706_v13 }
 0x184   :  { %v714_v20 = vsub.f32 %v157_v45, %v193_v17  ;;  %v225_v21 = vsel %vm160_vm0, %v207_v18, 0.0  ;;  %v228_v22 = vsel %vm160_vm0, %v208_v19, 0.0 }
 0x185   :  { %226 = vadd.xlane.f32.xlu1 %v225_v21  ;;  %229 = vadd.xlane.f32.xlu0 %v228_v22 }
 0x186   :  { %v209_v23 = vmul.f32 %v714_v20, %v714_v20 }
 0x188   :  { %v231_v24 = vsel %vm160_vm0, %v209_v23, 0.0 }
 0x189   :  { %232 = vadd.xlane.f32.xlu1 %v231_v24 }
 0x202   :  { %v212_v25 = vpop.xlane.xlu0 %211 }
 0x203   :  { %v234_v26 = vmul.f32 0.03125, %v212_v25 }
 0x205   :  { %v242_v27 = vadd.f32 1e-12, %v234_v26 }
 0x206   :  { %v215_v28 = vpop.xlane.xlu1 %214  ;;  %v218_v29 = vpop.xlane.xlu0 %217 }
 0x207   :  { %521 = vrsqrt.f32 %v242_v27  ;;  %v235_v30 = vmul.f32 0.03125, %v215_v28  ;;  %v236_v31 = vmul.f32 0.03125, %v218_v29  ;;  %v407_v27 = vld [vmem:[%s803_s5 + $0x10] sm:$0xff] }
 0x209   :  { %v243_v32 = vadd.f32 1e-12, %v235_v30  ;;  %v244_v33 = vadd.f32 1e-12, %v236_v31 }
 0x20a   :  { %v221_v34 = vpop.xlane.xlu1 %220  ;;  %v224_v35 = vpop.xlane.xlu0 %223 }
 0x20b   :  { %523 = vrsqrt.f32 %v243_v32  ;;  %v237_v36 = vmul.f32 0.03125, %v221_v34  ;;  %v238_v38 = vmul.f32 0.03125, %v224_v35 }
 0x20c   :  { %525 = vrsqrt.f32 %v244_v33 }
 0x20d   :  { %v245_v37 = vadd.f32 1e-12, %v237_v36  ;;  %v246_v40 = vadd.f32 1e-12, %v238_v38 }
 0x20e   :  { %v227_v39 = vpop.xlane.xlu1 %226  ;;  %v230_v46 = vpop.xlane.xlu0 %229 }
 0x20f   :  { %527 = vrsqrt.f32 %v245_v37  ;;  %v239_v41 = vmul.f32 0.03125, %v227_v39  ;;  %v240_v50 = vmul.f32 0.03125, %v230_v46 }
 0x210   :  { %529 = vrsqrt.f32 %v246_v40 }
 0x211   :  { %v247_v45 = vadd.f32 1e-12, %v239_v41  ;;  %v248_v62 = vadd.f32 1e-12, %v240_v50 }
 0x212   :  { %v233_v55 = vpop.xlane.xlu1 %232 }
 0x213   :  { %531 = vrsqrt.f32 %v247_v45  ;;  %v241_v63 = vmul.f32 0.03125, %v233_v55 }
 0x214   :  { %v522_v42 = vpop.eup %521  ;;  %533 = vrsqrt.f32 %v248_v62 }
 0x215   :  { %v258_v44 = vmul.f32 %v522_v42, %v681_v51  ;;  %v249_v9 = vadd.f32 1e-12, %v241_v63 }
 0x217   :  { %v273_v48 = vmul.f32 %v724_v43, %v258_v44  ;;  %535 = vrsqrt.f32 %v249_v9  ;;  %v415_v9 = vld [vmem:[%s803_s5 + $0x30] sm:$0xff] }
 0x218   :  { %v524_v49 = vpop.eup %523 }
 0x219   :  { %v526_v52 = vpop.eup %525  ;;  %v288_v53 = vadd.f32 %v730_v47, %v273_v48  ;;  %v259_v54 = vmul.f32 %v524_v49, %v687_v58 }
 0x21a   :  { %v260_v51 = vmul.f32 %v526_v52, %v685_v57  ;;  %v411_v52 = vld [vmem:[%s803_s5 + $0x20] sm:$0xff] }
 0x21b   :  { %v296_v56 = vmul.f32 0.8333333, %v288_v53  ;;  %v274_v59 = vmul.f32 %v724_v43, %v259_v54 }
 0x21c   :  { %v528_v60 = vpop.eup %527  ;;  %v275_v1 = vmul.f32 %v724_v43, %v260_v51 }
 0x21d   :  { %vm300_vm1 = vcmp.ge.f32.partialorder %v296_v56, 1.0  ;;  %v289_v0 = vadd.f32 %v730_v47, %v274_v59  ;;  %v261_v58 = vmul.f32 %v528_v60, %v694_v2  ;;  %v530_v14 = vpop.eup %529 }
 0x21e   :  { %v403_v57 = vsel %vm300_vm1, 1.0, %v559_v4  ;;  %v290_v11 = vadd.f32 %v730_v47, %v275_v1  ;;  %v262_v23 = vmul.f32 %v530_v14, %v696_v3  ;;  %v408_v3 = vld [vmem:[%s803_s5 + $0x18] sm:$0xff] }
 0x21f   :  { %v308_v5 = vadd.f32 %v403_v57, %v306_v61  ;;  %v312_v6 = vsub.f32 1.0, %v403_v57  ;;  %v297_v7 = vmul.f32 0.8333333, %v289_v0  ;;  %v276_v2 = vmul.f32 %v724_v43, %v261_v58  ;;  %v416_v14 = vld [vmem:[%s803_s5 + $0x38] sm:$0xff] }
 0x220   :  { %v532_v24 = vpop.eup %531  ;;  %v277_v29 = vmul.f32 %v724_v43, %v262_v23 }
 0x221   :  { %310 = vst.msk [vmem:[#allocation2] sm:$0xff] %vm160_vm0, %v308_v5  ;;  %v314_v10 = vmul.f32 %v312_v6, %v296_v56  ;;  %vm301_vm2 = vcmp.ge.f32.partialorder %v297_v7, 1.0  ;;  %v291_v22 = vadd.f32 %v730_v47, %v276_v2  ;;  %v263_v30 = vmul.f32 %v532_v24, %v704_v12  ;;  %v534_v35 = vpop.eup %533 }
 0x222   :  { %v404_v15 = vsel %vm301_vm2, 1.0, %v559_v4  ;;  %v292_v37 = vadd.f32 %v730_v47, %v277_v29  ;;  %v264_v48 = vmul.f32 %v534_v35, %v706_v13  ;;  %v412_v13 = vld [vmem:[%s803_s5 + $0x28] sm:$0xff] }
 0x223   :  { %v309_v16 = vadd.f32 %v404_v15, %v307_v8  ;;  %v313_v17 = vsub.f32 1.0, %v404_v15  ;;  %v316_v18 = vsub.f32 %v290_v11, %v314_v10  ;;  %v278_v38 = vmul.f32 %v724_v43, %v263_v30 }
 0x224   :  { %v536_v42 = vpop.eup %535  ;;  %v279_v54 = vmul.f32 %v724_v43, %v264_v48 }
 0x225   :  { %311 = vst.msk [vmem:[#allocation2 + $0x8] sm:$0xff] %vm160_vm0, %v309_v16  ;;  %v315_v19 = vmul.f32 %v313_v17, %v297_v7  ;;  %v318_v21 = vmul.f32 0.8333333, %v316_v18  ;;  %v293_v46 = vadd.f32 %v730_v47, %v278_v38  ;;  %v265_v55 = vmul.f32 %v536_v42, %v714_v20 }
 0x226   :  { %v294_v62 = vadd.f32 %v730_v47, %v279_v54 }
 0x227   :  { %v320_v25 = vadd.f32 %v318_v21, %v314_v10  ;;  %v317_v26 = vsub.f32 %v291_v22, %v315_v19  ;;  %v280_v63 = vmul.f32 %v724_v43, %v265_v55 }
 0x229   :  { %vm322_vm3 = vcmp.ge.f32.partialorder %v320_v25, 1.0  ;;  %v319_v28 = vmul.f32 0.8333333, %v317_v26  ;;  %v295_v6 = vadd.f32 %v730_v47, %v280_v63 }
 0x22a   :  { %v405_v31 = vsel %vm322_vm3, 1.0, %v559_v4 }
 0x22b   :  { %v321_v32 = vadd.f32 %v319_v28, %v315_v19  ;;  %v331_v33 = vadd.f32 %v407_v27, %v405_v31  ;;  %v336_v34 = vsub.f32 1.0, %v405_v31 }
 0x22d   :  { %vm323_vm4 = vcmp.ge.f32.partialorder %v321_v32, 1.0  ;;  %334 = vst.msk [vmem:[#allocation2 + $0x10] sm:$0xff] %vm160_vm0, %v331_v33  ;;  %v338_v36 = vmul.f32 %v336_v34, %v320_v25 }
 0x22e   :  { %v406_v12 = vsel %vm323_vm4, 1.0, %v559_v4 }
 0x22f   :  { %v340_v39 = vsub.f32 %v292_v37, %v338_v36  ;;  %v332_v40 = vadd.f32 %v408_v3, %v406_v12  ;;  %v337_v41 = vsub.f32 1.0, %v406_v12 }
 0x231   :  { %v342_v44 = vmul.f32 0.8333333, %v340_v39  ;;  %335 = vst.msk [vmem:[#allocation2 + $0x18] sm:$0xff] %vm160_vm0, %v332_v40  ;;  %v339_v45 = vmul.f32 %v337_v41, %v321_v32 }
 0x233   :  { %v344_v49 = vadd.f32 %v342_v44, %v338_v36  ;;  %v341_v50 = vsub.f32 %v293_v46, %v339_v45 }
 0x235   :  { %vm346_vm5 = vcmp.ge.f32.partialorder %v344_v49, 1.0  ;;  %v343_v53 = vmul.f32 0.8333333, %v341_v50 }
 0x236   :  { %v409_v51 = vsel %vm346_vm5, 1.0, %v559_v4 }
 0x237   :  { %v345_v56 = vadd.f32 %v343_v53, %v339_v45  ;;  %v355_v59 = vadd.f32 %v411_v52, %v409_v51  ;;  %v360_v60 = vsub.f32 1.0, %v409_v51 }
 0x239   :  { %vm347_vm6 = vcmp.ge.f32.partialorder %v345_v56, 1.0  ;;  %358 = vst.msk [vmem:[#allocation2 + $0x20] sm:$0xff] %vm160_vm0, %v355_v59  ;;  %v362_v61 = vmul.f32 %v360_v60, %v344_v49 }
 0x23a   :  { %v410_v0 = vsel %vm347_vm6, 1.0, %v559_v4 }
 0x23b   :  { %v364_v20 = vsub.f32 %v294_v62, %v362_v61  ;;  %v356_v1 = vadd.f32 %v412_v13, %v410_v0  ;;  %v361_v58 = vsub.f32 1.0, %v410_v0 }
 0x23d   :  { %v366_v57 = vmul.f32 0.8333333, %v364_v20  ;;  %359 = vst.msk [vmem:[#allocation2 + $0x28] sm:$0xff] %vm160_vm0, %v356_v1  ;;  %v363_v5 = vmul.f32 %v361_v58, %v345_v56 }
 0x23f   :  { %v368_v7 = vadd.f32 %v366_v57, %v362_v61  ;;  %v365_v8 = vsub.f32 %v295_v6, %v363_v5 }
 0x241   :  { %vm370_vm7 = vcmp.ge.f32.partialorder %v368_v7, 1.0  ;;  %v367_v10 = vmul.f32 0.8333333, %v365_v8 }
 0x242   :  { %v413_v43 = vsel %vm370_vm7, 1.0, %v559_v4 }
 0x243   :  { %v379_v11 = vadd.f32 %v415_v9, %v413_v43  ;;  %v369_v2 = vadd.f32 %v367_v10, %v363_v5 }
 0x245   :  { %382 = vst.msk [vmem:[#allocation2 + $0x30] sm:$0xff] %vm160_vm0, %v379_v11  ;;  %vm371_vm8 = vcmp.ge.f32.partialorder %v369_v2, 1.0 }
 0x246   :  { %v414_v47 = vsel %vm371_vm8, 1.0, %v559_v4 }
 0x247   :  { %v380_v15 = vadd.f32 %v416_v14, %v414_v47 }
 0x249   :  { %383 = vst.msk [vmem:[#allocation2 + $0x38] sm:$0xff] %vm160_vm0, %v380_v15 }
 0x24a   :  { %548 = shalt.err (!%p545_p4)
}
 0x24b   :  { %s561_s16 = smov 128   ;;  %s562_s5 = smov 8  }
 0x24c   :  { %395 = dma.vmem_to_hbm [thread:$0]  %s390_s14, 1024, %s804_s6, [#allocation3], %s561_s16, %s561_s16, %s562_s5  }
 0x24d   :  { %557 = dma.done.wait [#allocation3], 1024  }
 0x24e   :  { %558 = vsyncadd [#allocation3], 4294966272 }
 0x24f   :  { %399 = vsyncpa [#allocation3], 1 }

// kernel: block_forward.6
= control target key start
LH: loop header
LB: loop body
LE: loop exit
PB: predicated region body
PF: predicated region fallthrough
CT: control target
= control target key end

     0   :  { %v5703_v2 = vmov 0.0   ;;  %vm5704_vm0 = vmmov 0   ;;  %s5705_s10 = smov 96   ;;  %s5706_s23 = smov 64   ;;  %vm24_vm1 = vcmask 64512   ;;  %v16_v27 = vlaneseq  ;;  %s6388_s0 = inlined_call_operand.vmem [shape: f32[8,8,96], index: 0, kind: input, shape index: {}]   ;;  %s6389_s1 = inlined_call_operand.vmem [shape: f32[8,8,32], index: 1, kind: output, shape index: {}]  }
   0x1   :  { %v5732_v0 = vld [vmem:[%s6388_s0] sm:$0xff]  ;;  %v5737_v1 = vld [vmem:[%s6388_s0 + $0x10] sm:$0xff]  ;;  %5367 = vmatprep.subr.mxu0 %v5703_v2  ;;  %5369 = vmatprep.mubr.msk.f32.mxu0 %vm5704_vm0, %v5703_v2  ;;  %v5747_v3 = vld [vmem:[%s6388_s0 + $0x8] sm:$0xff]  ;;  %s5708_s24 = smov 120   ;;  %s5709_s25 = smov 56   ;;  %vm5112_vm3 = vcmask 130048  }
   0x2   :  { %22 = vrot.lane.b32.xlu0 %v5732_v0, %s5705_s10  ;;  %177 = vrot.lane.b32.xlu1 %v5737_v1, %s5705_s10  ;;  %v5752_v4 = vld [vmem:[%s6388_s0 + $0x18] sm:$0xff]  ;;  %v5762_v5 = vld [vmem:[%s6388_s0 + $0x20] sm:$0xff]  ;;  %s5710_s26 = smov 80   ;;  %s5711_s27 = smov 112   ;;  %v17_v29 = vshrl.u32 %v16_v27, 7  ;;  %v19_v30 = vand.u32 127, %v16_v27 }
   0x3   :  { %5372 = vmatprep.subr.mxu1 %v5703_v2  ;;  %5374 = vmatprep.mubr.msk.f32.mxu1 %vm5704_vm0, %v5703_v2  ;;  %v5767_v6 = vld [vmem:[%s6388_s0 + $0x28] sm:$0xff]  ;;  %v5774_v7 = vld [vmem:[%s6388_s0 + $0x30] sm:$0xff]  ;;  %v5779_v8 = vld [vmem:[%s6388_s0 + $0x38] sm:$0xff]  ;;  %s5707_s0 = smov 88   ;;  %s5712_s28 = smov 48   ;;  %vm5121_vm4 = vcmask 195584  }
   0x4   :  { %vm5893_vm2 = vcmp.le.s32.totalorder %v19_v30, %v17_v29  ;;  %s5713_s29 = smov 72   ;;  %s5714_s30 = smov 104   ;;  %vm5130_vm5 = vcmask 261120  }
   0x5   :  { %s5715_s2 = smov 40   ;;  %s5716_s3 = smov 8  }
   0x6   :  { %100 = vrot.lane.b32.xlu0 %v5747_v3, %s5705_s10  ;;  %254 = vrot.lane.b32.xlu1 %v5752_v4, %s5705_s10  ;;  %s5717_s4 = smov 16   ;;  %s5718_s5 = smov 24  }
   0xa   :  { %331 = vrot.lane.b32.xlu0 %v5762_v5, %s5705_s10  ;;  %408 = vrot.lane.b32.xlu1 %v5767_v6, %s5705_s10 }
   0xe   :  { %485 = vrot.lane.b32.xlu0 %v5774_v7, %s5705_s10  ;;  %562 = vrot.lane.b32.xlu1 %v5779_v8, %s5705_s10 }
  0x12   :  { %656 = vrot.lane.b32.xlu0 %v5732_v0, %s5706_s23  ;;  %732 = vrot.lane.b32.xlu1 %v5747_v3, %s5706_s23 }
  0x16   :  { %808 = vrot.lane.b32.xlu0 %v5737_v1, %s5706_s23  ;;  %884 = vrot.lane.b32.xlu1 %v5752_v4, %s5706_s23 }
  0x1a   :  { %960 = vrot.lane.b32.xlu0 %v5762_v5, %s5706_s23  ;;  %1036 = vrot.lane.b32.xlu1 %v5767_v6, %s5706_s23 }
  0x1e   :  { %1112 = vrot.lane.b32.xlu0 %v5774_v7, %s5706_s23  ;;  %1188 = vrot.lane.b32.xlu1 %v5779_v8, %s5706_s23 }
  0x22   :  { %1266 = vrot.lane.b32.xlu0 %v5732_v0, %s5707_s0  ;;  %1344 = vrot.lane.b32.xlu1 %v5747_v3, %s5707_s0 }
  0x26   :  { %1264 = vrot.lane.b32.xlu0 %v5732_v0, %s5708_s24  ;;  %1342 = vrot.lane.b32.xlu1 %v5747_v3, %s5708_s24 }
  0x2a   :  { %1422 = vrot.lane.b32.xlu0 %v5737_v1, %s5707_s0  ;;  %1500 = vrot.lane.b32.xlu1 %v5752_v4, %s5707_s0 }
  0x2e   :  { %1420 = vrot.lane.b32.xlu0 %v5737_v1, %s5708_s24  ;;  %1498 = vrot.lane.b32.xlu1 %v5752_v4, %s5708_s24 }
  0x32   :  { %1578 = vrot.lane.b32.xlu0 %v5762_v5, %s5707_s0  ;;  %1656 = vrot.lane.b32.xlu1 %v5767_v6, %s5707_s0 }
  0x36   :  { %1576 = vrot.lane.b32.xlu0 %v5762_v5, %s5708_s24  ;;  %1654 = vrot.lane.b32.xlu1 %v5767_v6, %s5708_s24 }
  0x3a   :  { %1734 = vrot.lane.b32.xlu0 %v5774_v7, %s5707_s0  ;;  %1812 = vrot.lane.b32.xlu1 %v5779_v8, %s5707_s0 }
  0x3e   :  { %1732 = vrot.lane.b32.xlu0 %v5774_v7, %s5708_s24  ;;  %1810 = vrot.lane.b32.xlu1 %v5779_v8, %s5708_s24 }
  0x42   :  { %1904 = vrot.lane.b32.xlu0 %v5732_v0, %s5709_s25  ;;  %1980 = vrot.lane.b32.xlu1 %v5747_v3, %s5709_s25 }
  0x46   :  { %2056 = vrot.lane.b32.xlu0 %v5737_v1, %s5709_s25  ;;  %2132 = vrot.lane.b32.xlu1 %v5752_v4, %s5709_s25 }
  0x4a   :  { %2208 = vrot.lane.b32.xlu0 %v5762_v5, %s5709_s25  ;;  %2284 = vrot.lane.b32.xlu1 %v5767_v6, %s5709_s25 }
  0x4e   :  { %2360 = vrot.lane.b32.xlu0 %v5774_v7, %s5709_s25  ;;  %2436 = vrot.lane.b32.xlu1 %v5779_v8, %s5709_s25 }
  0x52   :  { %2514 = vrot.lane.b32.xlu0 %v5732_v0, %s5710_s26  ;;  %2592 = vrot.lane.b32.xlu1 %v5747_v3, %s5710_s26 }
  0x56   :  { %2512 = vrot.lane.b32.xlu0 %v5732_v0, %s5711_s27  ;;  %2590 = vrot.lane.b32.xlu1 %v5747_v3, %s5711_s27 }
  0x5a   :  { %2670 = vrot.lane.b32.xlu0 %v5737_v1, %s5710_s26  ;;  %2748 = vrot.lane.b32.xlu1 %v5752_v4, %s5710_s26 }
  0x5e   :  { %2668 = vrot.lane.b32.xlu0 %v5737_v1, %s5711_s27  ;;  %2746 = vrot.lane.b32.xlu1 %v5752_v4, %s5711_s27 }
  0x62   :  { %2826 = vrot.lane.b32.xlu0 %v5762_v5, %s5710_s26  ;;  %2904 = vrot.lane.b32.xlu1 %v5767_v6, %s5710_s26 }
  0x66   :  { %2824 = vrot.lane.b32.xlu0 %v5762_v5, %s5711_s27  ;;  %2902 = vrot.lane.b32.xlu1 %v5767_v6, %s5711_s27 }
  0x6a   :  { %2982 = vrot.lane.b32.xlu0 %v5774_v7, %s5710_s26  ;;  %3060 = vrot.lane.b32.xlu1 %v5779_v8, %s5710_s26 }
  0x6e   :  { %2980 = vrot.lane.b32.xlu0 %v5774_v7, %s5711_s27  ;;  %3058 = vrot.lane.b32.xlu1 %v5779_v8, %s5711_s27 }
  0x72   :  { %3152 = vrot.lane.b32.xlu0 %v5732_v0, %s5712_s28  ;;  %3228 = vrot.lane.b32.xlu1 %v5747_v3, %s5712_s28 }
  0x74   :  { %v23_v9 = vpop.permute.xlu0 %22  ;;  %v178_v10 = vpop.permute.xlu1 %177 }
  0x75   :  { %5368 = vmatpush3.xpose.msk.msra.mxu0 %vm24_vm1, %v23_v9 }
  0x76   :  { %5377 = vmatprep.subr.mxu0 %v5703_v2  ;;  %3304 = vrot.lane.b32.xlu0 %v5737_v1, %s5712_s28 }
  0x77   :  { %3380 = vrot.lane.b32.xlu1 %v5752_v4, %s5712_s28 }
  0x78   :  { %5370 = vmatmul.mubr.msk.f32.vlgmr.msra.gmra.mxu0 %vm24_vm1, %v5732_v0  ;;  %v101_v11 = vpop.permute.xlu0 %100  ;;  %v255_v12 = vpop.permute.xlu1 %254 }
  0x79   :  { %5373 = vmatpush3.xpose.msk.msra.mxu1 %vm24_vm1, %v101_v11  ;;  %5378 = vmatpush3.xpose.msk.msra.mxu0 %vm24_vm1, %v178_v10 }
  0x7a   :  { %5379 = vmatprep.mubr.msk.f32.mxu0 %vm5704_vm0, %v5703_v2  ;;  %5382 = vmatprep.subr.mxu1 %v5703_v2 }
  0x7b   :  { %5387 = vmatprep.subr.mxu0 %v5703_v2  ;;  %3456 = vrot.lane.b32.xlu0 %v5762_v5, %s5712_s28 }
  0x7c   :  { %5375 = vmatmul.mubr.msk.f32.vlgmr.msra.gmra.mxu1 %vm24_vm1, %v5747_v3  ;;  %5380 = vmatmul.mubr.msk.f32.vlgmr.msra.gmra.mxu0 %vm24_vm1, %v5737_v1  ;;  %v332_v13 = vpop.permute.xlu0 %331  ;;  %v409_v14 = vpop.permute.xlu1 %408 }
  0x7d   :  { %5383 = vmatpush3.xpose.msk.msra.mxu1 %vm24_vm1, %v255_v12  ;;  %5388 = vmatpush3.xpose.msk.msra.mxu0 %vm24_vm1, %v332_v13 }
  0x7e   :  { %5384 = vmatprep.mubr.msk.f32.mxu1 %vm5704_vm0, %v5703_v2  ;;  %5389 = vmatprep.mubr.msk.f32.mxu0 %vm5704_vm0, %v5703_v2 }
  0x7f   :  { %5392 = vmatprep.subr.mxu1 %v5703_v2  ;;  %5397 = vmatprep.subr.mxu0 %v5703_v2 }
  0x80   :  { %5385 = vmatmul.mubr.msk.f32.vlgmr.msra.gmra.mxu1 %vm24_vm1, %v5752_v4  ;;  %5390 = vmatmul.mubr.msk.f32.vlgmr.msra.gmra.mxu0 %vm24_vm1, %v5762_v5  ;;  %v486_v15 = vpop.permute.xlu0 %485  ;;  %v563_v16 = vpop.permute.xlu1 %562 }
  0x81   :  { %5393 = vmatpush3.xpose.msk.msra.mxu1 %vm24_vm1, %v409_v14  ;;  %5398 = vmatpush3.xpose.msk.msra.mxu0 %vm24_vm1, %v486_v15 }
  0x82   :  { %5394 = vmatprep.mubr.msk.f32.mxu1 %vm5704_vm0, %v5703_v2  ;;  %5399 = vmatprep.mubr.msk.f32.mxu0 %vm5704_vm0, %v5703_v2 }
  0x83   :  { %5402 = vmatprep.subr.mxu1 %v5703_v2  ;;  %5407 = vmatprep.subr.mxu0 %v5703_v2 }
  0x84   :  { %5395 = vmatmul.mubr.msk.f32.vlgmr.msra.gmra.mxu1 %vm24_vm1, %v5767_v6  ;;  %5400 = vmatmul.mubr.msk.f32.vlgmr.msra.gmra.mxu0 %vm24_vm1, %v5774_v7  ;;  %v657_v17 = vpop.permute.xlu0 %656  ;;  %v733_v18 = vpop.permute.xlu1 %732 }
  0x85   :  { %5403 = vmatpush3.xpose.msk.msra.mxu1 %vm24_vm1, %v563_v16  ;;  %5404 = vmatprep.mubr.msk.f32.mxu1 %vm5704_vm0, %v5703_v2 }
  0x86   :  { %5412 = vmatprep.subr.mxu1 %v5703_v2  ;;  %5408 = vmatpush3.msra.mxu0 %v657_v17 }
  0x87   :  { %5409 = vmatprep.mubr.msk.f32.mxu0 %vm5704_vm0, %v5703_v2  ;;  %5417 = vmatprep.subr.mxu0 %v5703_v2 }
  0x88   :  { %5405 = vmatmul.mubr.msk.f32.vlgmr.msra.gmra.mxu1 %vm24_vm1, %v5779_v8  ;;  %v809_v19 = vpop.permute.xlu0 %808  ;;  %v885_v20 = vpop.permute.xlu1 %884  ;;  %3532 = vrot.lane.b32.xlu1 %v5767_v6, %s5712_s28 }
  0x89   :  { %5413 = vmatpush3.msra.mxu1 %v733_v18  ;;  %5414 = vmatprep.mubr.msk.f32.mxu1 %vm5704_vm0, %v5703_v2 }
  0x8a   :  { %5422 = vmatprep.subr.mxu1 %v5703_v2  ;;  %3608 = vrot.lane.b32.xlu0 %v5774_v7, %s5712_s28 }
  0x8c   :  { %v961_v21 = vpop.permute.xlu0 %960  ;;  %v1037_v22 = vpop.permute.xlu1 %1036  ;;  %3684 = vrot.lane.b32.xlu1 %v5779_v8, %s5712_s28 }
  0x8e   :  { %3762 = vrot.lane.b32.xlu0 %v5732_v0, %s5713_s29 }
  0x90   :  { %v1113_v23 = vpop.permute.xlu0 %1112  ;;  %v5881_v24 = vpop.permute.xlu1 %1188  ;;  %3840 = vrot.lane.b32.xlu1 %v5747_v3, %s5713_s29 }
  0x92   :  { %3760 = vrot.lane.b32.xlu0 %v5732_v0, %s5714_s30 }
  0x94   :  { %v5883_v25 = vpop.permute.xlu0 %1266  ;;  %v5885_v26 = vpop.permute.xlu1 %1344  ;;  %3838 = vrot.lane.b32.xlu1 %v5747_v3, %s5714_s30 }
  0x96   :  { %3918 = vrot.lane.b32.xlu0 %v5737_v1, %s5713_s29 }
  0x98   :  { %v5887_v28 = vpop.permute.xlu0 %1264  ;;  %v5889_v31 = vpop.permute.xlu1 %1342  ;;  %3996 = vrot.lane.b32.xlu1 %v5752_v4, %s5713_s29 }
  0x9a   :  { %3916 = vrot.lane.b32.xlu0 %v5737_v1, %s5714_s30 }
  0x9c   :  { %v5891_v32 = vpop.permute.xlu0 %1422  ;;  %v5899_v38 = vpop.permute.xlu1 %1500  ;;  %3994 = vrot.lane.b32.xlu1 %v5752_v4, %s5714_s30 }
  0x9e   :  { %4074 = vrot.lane.b32.xlu0 %v5762_v5, %s5713_s29 }
  0xa0   :  { %v5904_v43 = vpop.permute.xlu0 %1420  ;;  %v1499_v52 = vpop.permute.xlu1 %1498  ;;  %4152 = vrot.lane.b32.xlu1 %v5767_v6, %s5713_s29 }
  0xa2   :  { %4072 = vrot.lane.b32.xlu0 %v5762_v5, %s5714_s30 }
  0xa4   :  { %v1579_v57 = vpop.permute.xlu0 %1578  ;;  %v1657_v11 = vpop.permute.xlu1 %1656  ;;  %4150 = vrot.lane.b32.xlu1 %v5767_v6, %s5714_s30 }
  0xa6   :  { %4230 = vrot.lane.b32.xlu0 %v5774_v7, %s5713_s29 }
  0xa8   :  { %v1577_v14 = vpop.permute.xlu0 %1576  ;;  %v1655_v17 = vpop.permute.xlu1 %1654  ;;  %4308 = vrot.lane.b32.xlu1 %v5779_v8, %s5713_s29 }
  0xaa   :  { %4228 = vrot.lane.b32.xlu0 %v5774_v7, %s5714_s30 }
  0xac   :  { %v1735_v18 = vpop.permute.xlu0 %1734  ;;  %4306 = vrot.lane.b32.xlu1 %v5779_v8, %s5714_s30 }
  0xae   :  { %4400 = vrot.lane.b32.xlu0 %v5732_v0, %s5715_s2 }
  0xb0   :  { %4476 = vrot.lane.b32.xlu1 %v5747_v3, %s5715_s2 }
  0xb2   :  { %4552 = vrot.lane.b32.xlu0 %v5737_v1, %s5715_s2 }
  0xb4   :  { %4628 = vrot.lane.b32.xlu1 %v5752_v4, %s5715_s2 }
  0xb6   :  { %4704 = vrot.lane.b32.xlu0 %v5762_v5, %s5715_s2 }
  0xb8   :  { %4780 = vrot.lane.b32.xlu1 %v5767_v6, %s5715_s2 }
  0xba   :  { %4856 = vrot.lane.b32.xlu0 %v5774_v7, %s5715_s2 }
  0xbc   :  { %4932 = vrot.lane.b32.xlu1 %v5779_v8, %s5715_s2 }
 0x138   :  { %v95_v34 = vpop.f32.mrf.mxu0 }
 0x139   :  { %v638_v35 = vmul.f32 0.125, %v95_v34 }
 0x13a   :  { %v5371_v36 = vpop.f32.mrf.mxu0 }
 0x13b   :  { %v648_v37 = vsel %vm5893_vm2, %v638_v35, 0.0 }
 0x13c   :  { %v172_v39 = vpop.f32.mrf.mxu1  ;;  %v249_v40 = vpop.f32.mrf.mxu0  ;;  %5410 = vmatmul.mubr.msk.f32.vlgmr.msra.gmra.mxu0 %vm24_vm1, %v648_v37 }
 0x13d   :  { %v639_v41 = vmul.f32 0.125, %v172_v39  ;;  %v640_v42 = vmul.f32 0.125, %v249_v40  ;;  %5418 = vmatpush3.msra.mxu0 %v809_v19  ;;  %5419 = vmatprep.mubr.msk.f32.mxu0 %vm5704_vm0, %v5703_v2  ;;  %v1813_v19 = vpop.permute.xlu1 %1812 }
 0x13e   :  { %v5376_v44 = vpop.f32.mrf.mxu1  ;;  %v5381_v45 = vpop.f32.mrf.mxu0  ;;  %5427 = vmatprep.subr.mxu0 %v5703_v2 }
 0x13f   :  { %v649_v46 = vsel %vm5893_vm2, %v639_v41, 0.0  ;;  %v650_v47 = vsel %vm5893_vm2, %v640_v42, 0.0 }
 0x140   :  { %v326_v48 = vpop.f32.mrf.mxu1  ;;  %v403_v49 = vpop.f32.mrf.mxu0  ;;  %5415 = vmatmul.mubr.msk.f32.vlgmr.msra.gmra.mxu1 %vm24_vm1, %v649_v46  ;;  %5420 = vmatmul.mubr.msk.f32.vlgmr.msra.gmra.mxu0 %vm24_vm1, %v650_v47 }
 0x141   :  { %v641_v50 = vmul.f32 0.125, %v326_v48  ;;  %v642_v51 = vmul.f32 0.125, %v403_v49  ;;  %5423 = vmatpush3.msra.mxu1 %v885_v20  ;;  %5428 = vmatpush3.msra.mxu0 %v961_v21  ;;  %v1733_v20 = vpop.permute.xlu0 %1732  ;;  %v1811_v21 = vpop.permute.xlu1 %1810 }
 0x142   :  { %v5386_v53 = vpop.f32.mrf.mxu1  ;;  %v5391_v54 = vpop.f32.mrf.mxu0  ;;  %5424 = vmatprep.mubr.msk.f32.mxu1 %vm5704_vm0, %v5703_v2  ;;  %5429 = vmatprep.mubr.msk.f32.mxu0 %vm5704_vm0, %v5703_v2 }
 0x143   :  { %v651_v55 = vsel %vm5893_vm2, %v641_v50, 0.0  ;;  %v652_v56 = vsel %vm5893_vm2, %v642_v51, 0.0  ;;  %5432 = vmatprep.subr.mxu1 %v5703_v2  ;;  %5437 = vmatprep.subr.mxu0 %v5703_v2 }
 0x144   :  { %v480_v58 = vpop.f32.mrf.mxu1  ;;  %v557_v59 = vpop.f32.mrf.mxu0  ;;  %5425 = vmatmul.mubr.msk.f32.vlgmr.msra.gmra.mxu1 %vm24_vm1, %v651_v55  ;;  %5430 = vmatmul.mubr.msk.f32.vlgmr.msra.gmra.mxu0 %vm24_vm1, %v652_v56 }
 0x145   :  { %v643_v60 = vmul.f32 0.125, %v480_v58  ;;  %v644_v61 = vmul.f32 0.125, %v557_v59  ;;  %5433 = vmatpush3.msra.mxu1 %v1037_v22  ;;  %5438 = vmatpush3.msra.mxu0 %v1113_v23  ;;  %v1905_v22 = vpop.permute.xlu0 %1904  ;;  %v1981_v23 = vpop.permute.xlu1 %1980 }
 0x146   :  { %v5396_v62 = vpop.f32.mrf.mxu1  ;;  %5434 = vmatprep.mubr.msk.f32.mxu1 %vm5704_vm0, %v5703_v2  ;;  %5439 = vmatprep.mubr.msk.f32.mxu0 %vm5704_vm0, %v5703_v2  ;;  %v5401_v63 = vpop.f32.mrf.mxu0 }
 0x147   :  { %v653_v9 = vsel %vm5893_vm2, %v643_v60, 0.0  ;;  %v654_v10 = vsel %vm5893_vm2, %v644_v61, 0.0  ;;  %5442 = vmatprep.subr.mxu1 %v5703_v2  ;;  %5447 = vmatprep.subr.mxu0 %v5703_v2 }
 0x148   :  { %v634_v12 = vpop.f32.mrf.mxu1  ;;  %5435 = vmatmul.mubr.msk.f32.vlgmr.msra.gmra.mxu1 %vm24_vm1, %v653_v9  ;;  %5440 = vmatmul.mubr.msk.f32.vlgmr.msra.gmra.mxu0 %vm24_vm1, %v654_v10 }
 0x149   :  { %v645_v13 = vmul.f32 0.125, %v634_v12  ;;  %5443 = vmatpush3.msra.mxu1 %v5881_v24  ;;  %5448 = vmatpush3.xpose.msk.msra.mxu0 %vm24_vm1, %v5883_v25  ;;  %v2057_v24 = vpop.permute.xlu0 %2056  ;;  %v2133_v25 = vpop.permute.xlu1 %2132 }
 0x14a   :  { %v5406_v15 = vpop.f32.mrf.mxu1  ;;  %5444 = vmatprep.mubr.msk.f32.mxu1 %vm5704_vm0, %v5703_v2  ;;  %5449 = vmatprep.mubr.msk.f32.mxu0 %vm5704_vm0, %v5703_v2 }
 0x14b   :  { %v655_v16 = vsel %vm5893_vm2, %v645_v13, 0.0  ;;  %5452 = vmatprep.subr.mxu1 %v5703_v2  ;;  %5457 = vmatprep.subr.mxu0 %v5703_v2 }
 0x14c   :  { %5445 = vmatmul.mubr.msk.f32.vlgmr.msra.gmra.mxu1 %vm24_vm1, %v655_v16  ;;  %5450 = vmatmul.mubr.msk.f32.vlgmr.msra.gmra.mxu0 %vm24_vm1, %v5887_v28 }
 0x14d   :  { %5453 = vmatpush3.xpose.msk.msra.mxu1 %vm24_vm1, %v5885_v26  ;;  %5458 = vmatpush3.xpose.msk.msra.mxu0 %vm24_vm1, %v5891_v32  ;;  %v2209_v26 = vpop.permute.xlu0 %2208  ;;  %v6029_v27 = vpop.permute.xlu1 %2284 }
 0x14e   :  { %5454 = vmatprep.mubr.msk.f32.mxu1 %vm5704_vm0, %v5703_v2  ;;  %5459 = vmatprep.mubr.msk.f32.mxu0 %vm5704_vm0, %v5703_v2 }
 0x14f   :  { %5462 = vmatprep.subr.mxu1 %v5703_v2  ;;  %5467 = vmatprep.subr.mxu0 %v5703_v2 }
 0x150   :  { %5455 = vmatmul.mubr.msk.f32.vlgmr.msra.gmra.mxu1 %vm24_vm1, %v5889_v31  ;;  %5460 = vmatmul.mubr.msk.f32.vlgmr.msra.gmra.mxu0 %vm24_vm1, %v5904_v43 }
 0x151   :  { %5463 = vmatpush3.xpose.msk.msra.mxu1 %vm24_vm1, %v5899_v38  ;;  %5468 = vmatpush3.xpose.msk.msra.mxu0 %vm24_vm1, %v1579_v57  ;;  %v6031_v0 = vpop.permute.xlu0 %2360  ;;  %v6035_v1 = vpop.permute.xlu1 %2436 }
 0x152   :  { %5464 = vmatprep.mubr.msk.f32.mxu1 %vm5704_vm0, %v5703_v2  ;;  %5469 = vmatprep.mubr.msk.f32.mxu0 %vm5704_vm0, %v5703_v2 }
 0x153   :  { %5472 = vmatprep.subr.mxu1 %v5703_v2  ;;  %5477 = vmatprep.subr.mxu0 %v5703_v2 }
 0x154   :  { %5465 = vmatmul.mubr.msk.f32.vlgmr.msra.gmra.mxu1 %vm24_vm1, %v1499_v52  ;;  %5470 = vmatmul.mubr.msk.f32.vlgmr.msra.gmra.mxu0 %vm24_vm1, %v1577_v14 }
 0x155   :  { %5473 = vmatpush3.xpose.msk.msra.mxu1 %vm24_vm1, %v1657_v11  ;;  %5478 = vmatpush3.xpose.msk.msra.mxu0 %vm24_vm1, %v1735_v18  ;;  %v6037_v28 = vpop.permute.xlu0 %2514  ;;  %v6043_v8 = vpop.permute.xlu1 %2592 }
 0x156   :  { %5474 = vmatprep.mubr.msk.f32.mxu1 %vm5704_vm0, %v5703_v2  ;;  %5479 = vmatprep.mubr.msk.f32.mxu0 %vm5704_vm0, %v5703_v2 }
 0x157   :  { %5482 = vmatprep.subr.mxu1 %v5703_v2  ;;  %5487 = vmatprep.subr.mxu0 %v5703_v2 }
 0x158   :  { %5475 = vmatmul.mubr.msk.f32.vlgmr.msra.gmra.mxu1 %vm24_vm1, %v1655_v17  ;;  %5480 = vmatmul.mubr.msk.f32.vlgmr.msra.gmra.mxu0 %vm24_vm1, %v1733_v20 }
 0x159   :  { %5483 = vmatpush3.xpose.msk.msra.mxu1 %vm24_vm1, %v1813_v19  ;;  %5484 = vmatprep.mubr.msk.f32.mxu1 %vm5704_vm0, %v5703_v2  ;;  %v6049_v32 = vpop.permute.xlu0 %2512  ;;  %v6055_v38 = vpop.permute.xlu1 %2590 }
 0x15a   :  { %5492 = vmatprep.subr.mxu1 %v5703_v2  ;;  %5489 = vmatprep.mubr.msk.f32.mxu0 %vm5704_vm0, %v5703_v2 }
 0x15b   :  { %5488 = vmatpush3.msra.mxu0 %v1905_v22 }
 0x15c   :  { %5485 = vmatmul.mubr.msk.f32.vlgmr.msra.gmra.mxu1 %vm24_vm1, %v1811_v21  ;;  %5497 = vmatprep.subr.mxu0 %v5703_v2 }
 0x15d   :  { %5494 = vmatprep.mubr.msk.f32.mxu1 %vm5704_vm0, %v5703_v2  ;;  %5493 = vmatpush3.msra.mxu1 %v1981_v23  ;;  %v6057_v41 = vpop.permute.xlu0 %2670  ;;  %v6063_v48 = vpop.permute.xlu1 %2748 }
 0x15e   :  { %5502 = vmatprep.subr.mxu1 %v5703_v2 }
 0x161   :  { %v6068_v53 = vpop.permute.xlu0 %2668  ;;  %v2747_v62 = vpop.permute.xlu1 %2746 }
 0x165   :  { %v2827_v12 = vpop.permute.xlu0 %2826  ;;  %v2905_v21 = vpop.permute.xlu1 %2904 }
 0x1fc   :  { %v6033_v3 = vpop.f32.mrf.mxu0 }
 0x1fe   :  { %v5411_v4 = vpop.f32.mrf.mxu0 }
 0x200   :  { %v6039_v5 = vpop.f32.mrf.mxu1  ;;  %v6041_v6 = vpop.f32.mrf.mxu0 }
 0x202   :  { %v5416_v7 = vpop.f32.mrf.mxu1  ;;  %v5421_v29 = vpop.f32.mrf.mxu0 }
 0x204   :  { %v6045_v30 = vpop.f32.mrf.mxu1  ;;  %v6047_v31 = vpop.f32.mrf.mxu0 }
 0x206   :  { %v5426_v34 = vpop.f32.mrf.mxu1  ;;  %v5431_v35 = vpop.f32.mrf.mxu0 }
 0x208   :  { %v6051_v36 = vpop.f32.mrf.mxu1  ;;  %v6053_v37 = vpop.f32.mrf.mxu0 }
 0x20a   :  { %v5436_v39 = vpop.f32.mrf.mxu1  ;;  %v5441_v40 = vpop.f32.mrf.mxu0 }
 0x20c   :  { %v6059_v42 = vpop.f32.mrf.mxu1  ;;  %v1338_v43 = vpop.f32.mrf.mxu0 }
 0x20d   :  { %v1888_v44 = vmul.f32 0.125, %v1338_v43 }
 0x20e   :  { %v5446_v45 = vpop.f32.mrf.mxu1  ;;  %v5451_v46 = vpop.f32.mrf.mxu0 }
 0x20f   :  { %v1896_v47 = vsel %vm5893_vm2, %v1888_v44, 0.0 }
 0x210   :  { %v1416_v49 = vpop.f32.mrf.mxu1  ;;  %v1494_v50 = vpop.f32.mrf.mxu0  ;;  %5490 = vmatmul.mubr.msk.f32.vlgmr.msra.gmra.mxu0 %vm24_vm1, %v1896_v47 }
 0x211   :  { %v1889_v51 = vmul.f32 0.125, %v1416_v49  ;;  %v1890_v52 = vmul.f32 0.125, %v1494_v50  ;;  %5498 = vmatpush3.msra.mxu0 %v2057_v24  ;;  %5499 = vmatprep.mubr.msk.f32.mxu0 %vm5704_vm0, %v5703_v2  ;;  %v2825_v24 = vpop.permute.xlu0 %2824 }
 0x212   :  { %v5456_v54 = vpop.f32.mrf.mxu1  ;;  %v5461_v55 = vpop.f32.mrf.mxu0  ;;  %5507 = vmatprep.subr.mxu0 %v5703_v2 }
 0x213   :  { %v1897_v56 = vsel %vm5893_vm2, %v1889_v51, 0.0  ;;  %v1898_v57 = vsel %vm5893_vm2, %v1890_v52, 0.0 }
 0x214   :  { %v1572_v58 = vpop.f32.mrf.mxu1  ;;  %v1650_v59 = vpop.f32.mrf.mxu0  ;;  %5495 = vmatmul.mubr.msk.f32.vlgmr.msra.gmra.mxu1 %vm24_vm1, %v1897_v56  ;;  %5500 = vmatmul.mubr.msk.f32.vlgmr.msra.gmra.mxu0 %vm24_vm1, %v1898_v57 }
 0x215   :  { %v1891_v60 = vmul.f32 0.125, %v1572_v58  ;;  %v1892_v61 = vmul.f32 0.125, %v1650_v59  ;;  %5503 = vmatpush3.msra.mxu1 %v2133_v25  ;;  %5508 = vmatpush3.msra.mxu0 %v2209_v26 }
 0x216   :  { %v5466_v63 = vpop.f32.mrf.mxu1  ;;  %v5471_v9 = vpop.f32.mrf.mxu0  ;;  %5504 = vmatprep.mubr.msk.f32.mxu1 %vm5704_vm0, %v5703_v2  ;;  %5509 = vmatprep.mubr.msk.f32.mxu0 %vm5704_vm0, %v5703_v2 }
 0x217   :  { %v1899_v10 = vsel %vm5893_vm2, %v1891_v60, 0.0  ;;  %v1900_v11 = vsel %vm5893_vm2, %v1892_v61, 0.0  ;;  %5512 = vmatprep.subr.mxu1 %v5703_v2  ;;  %5517 = vmatprep.subr.mxu0 %v5703_v2 }
 0x218   :  { %v1728_v13 = vpop.f32.mrf.mxu1  ;;  %v1806_v14 = vpop.f32.mrf.mxu0  ;;  %5505 = vmatmul.mubr.msk.f32.vlgmr.msra.gmra.mxu1 %vm24_vm1, %v1899_v10  ;;  %5510 = vmatmul.mubr.msk.f32.vlgmr.msra.gmra.mxu0 %vm24_vm1, %v1900_v11 }
 0x219   :  { %v1893_v15 = vmul.f32 0.125, %v1728_v13  ;;  %v1894_v16 = vmul.f32 0.125, %v1806_v14  ;;  %5513 = vmatpush3.msra.mxu1 %v6029_v27  ;;  %5518 = vmatpush3.msra.mxu0 %v6031_v0  ;;  %v2903_v27 = vpop.permute.xlu1 %2902  ;;  %v2983_v0 = vpop.permute.xlu0 %2982 }
 0x21a   :  { %v5476_v17 = vpop.f32.mrf.mxu1  ;;  %5514 = vmatprep.mubr.msk.f32.mxu1 %vm5704_vm0, %v5703_v2  ;;  %5519 = vmatprep.mubr.msk.f32.mxu0 %vm5704_vm0, %v5703_v2  ;;  %v5481_v18 = vpop.f32.mrf.mxu0 }
 0x21b   :  { %v1901_v19 = vsel %vm5893_vm2, %v1893_v15, 0.0  ;;  %v1902_v20 = vsel %vm5893_vm2, %v1894_v16, 0.0  ;;  %5522 = vmatprep.subr.mxu1 %v5703_v2  ;;  %5527 = vmatprep.subr.mxu0 %v5703_v2 }
 0x21c   :  { %v1884_v22 = vpop.f32.mrf.mxu1  ;;  %5515 = vmatmul.mubr.msk.f32.vlgmr.msra.gmra.mxu1 %vm24_vm1, %v1901_v19  ;;  %5520 = vmatmul.mubr.msk.f32.vlgmr.msra.gmra.mxu0 %vm24_vm1, %v1902_v20 }
 0x21d   :  { %v1895_v23 = vmul.f32 0.125, %v1884_v22  ;;  %5523 = vmatpush3.msra.mxu1 %v6035_v1  ;;  %5528 = vmatpush3.xpose.msk.msra.mxu0 %vm24_vm1, %v6037_v28  ;;  %v3061_v1 = vpop.permute.xlu1 %3060  ;;  %v2981_v4 = vpop.permute.xlu0 %2980 }
 0x21e   :  { %v5486_v25 = vpop.f32.mrf.mxu1  ;;  %5524 = vmatprep.mubr.msk.f32.mxu1 %vm5704_vm0, %v5703_v2  ;;  %5529 = vmatprep.mubr.msk.f32.mxu0 %vm5704_vm0, %v5703_v2 }
 0x21f   :  { %v1903_v26 = vsel %vm5893_vm2, %v1895_v23, 0.0  ;;  %5532 = vmatprep.subr.mxu1 %v5703_v2  ;;  %5537 = vmatprep.subr.mxu0 %v5703_v2 }
 0x220   :  { %5525 = vmatmul.mubr.msk.f32.vlgmr.msra.gmra.mxu1 %vm24_vm1, %v1903_v26  ;;  %5530 = vmatmul.mubr.msk.f32.vlgmr.msra.gmra.mxu0 %vm24_vm1, %v6049_v32 }
 0x221   :  { %5533 = vmatpush3.xpose.msk.msra.mxu1 %vm24_vm1, %v6043_v8  ;;  %5538 = vmatpush3.xpose.msk.msra.mxu0 %vm24_vm1, %v6057_v41  ;;  %v3059_v28 = vpop.permute.xlu1 %3058  ;;  %v3153_v7 = vpop.permute.xlu0 %3152 }
 0x222   :  { %5534 = vmatprep.mubr.msk.f32.mxu1 %vm5704_vm0, %v5703_v2  ;;  %5539 = vmatprep.mubr.msk.f32.mxu0 %vm5704_vm0, %v5703_v2 }
 0x223   :  { %5542 = vmatprep.subr.mxu1 %v5703_v2  ;;  %5547 = vmatprep.subr.mxu0 %v5703_v2 }
 0x224   :  { %5535 = vmatmul.mubr.msk.f32.vlgmr.msra.gmra.mxu1 %vm24_vm1, %v6055_v38  ;;  %5540 = vmatmul.mubr.msk.f32.vlgmr.msra.gmra.mxu0 %vm24_vm1, %v6068_v53 }
 0x225   :  { %5543 = vmatpush3.xpose.msk.msra.mxu1 %vm24_vm1, %v6063_v48  ;;  %5548 = vmatpush3.xpose.msk.msra.mxu0 %vm24_vm1, %v2827_v12  ;;  %v3229_v29 = vpop.permute.xlu1 %3228  ;;  %v3305_v8 = vpop.permute.xlu0 %3304 }
 0x226   :  { %5544 = vmatprep.mubr.msk.f32.mxu1 %vm5704_vm0, %v5703_v2  ;;  %5549 = vmatprep.mubr.msk.f32.mxu0 %vm5704_vm0, %v5703_v2 }
 0x227   :  { %5552 = vmatprep.subr.mxu1 %v5703_v2  ;;  %5557 = vmatprep.subr.mxu0 %v5703_v2 }
 0x228   :  { %5545 = vmatmul.mubr.msk.f32.vlgmr.msra.gmra.mxu1 %vm24_vm1, %v2747_v62  ;;  %5550 = vmatmul.mubr.msk.f32.vlgmr.msra.gmra.mxu0 %vm24_vm1, %v2825_v24 }
 0x229   :  { %5553 = vmatpush3.xpose.msk.msra.mxu1 %vm24_vm1, %v2905_v21  ;;  %5558 = vmatpush3.xpose.msk.msra.mxu0 %vm24_vm1, %v2983_v0  ;;  %v3381_v32 = vpop.permute.xlu1 %3380  ;;  %v3457_v34 = vpop.permute.xlu0 %3456 }
 0x22a   :  { %5554 = vmatprep.mubr.msk.f32.mxu1 %vm5704_vm0, %v5703_v2  ;;  %5559 = vmatprep.mubr.msk.f32.mxu0 %vm5704_vm0, %v5703_v2 }
 0x22b   :  { %5562 = vmatprep.subr.mxu1 %v5703_v2  ;;  %5567 = vmatprep.subr.mxu0 %v5703_v2 }
 0x22c   :  { %5555 = vmatmul.mubr.msk.f32.vlgmr.msra.gmra.mxu1 %vm24_vm1, %v2903_v27  ;;  %5560 = vmatmul.mubr.msk.f32.vlgmr.msra.gmra.mxu0 %vm24_vm1, %v2981_v4 }
 0x22d   :  { %5563 = vmatpush3.xpose.msk.msra.mxu1 %vm24_vm1, %v3061_v1  ;;  %5564 = vmatprep.mubr.msk.f32.mxu1 %vm5704_vm0, %v5703_v2  ;;  %v6163_v35 = vpop.permute.xlu1 %3532  ;;  %v6165_v38 = vpop.permute.xlu0 %3608 }
 0x22e   :  { %5572 = vmatprep.subr.mxu1 %v5703_v2  ;;  %5569 = vmatprep.mubr.msk.f32.mxu0 %vm5704_vm0, %v5703_v2 }
 0x22f   :  { %5568 = vmatpush3.msra.mxu0 %v3153_v7 }
 0x230   :  { %5565 = vmatmul.mubr.msk.f32.vlgmr.msra.gmra.mxu1 %vm24_vm1, %v3059_v28  ;;  %5577 = vmatprep.subr.mxu0 %v5703_v2 }
 0x231   :  { %5574 = vmatprep.mubr.msk.f32.mxu1 %vm5704_vm0, %v5703_v2  ;;  %5573 = vmatpush3.msra.mxu1 %v3229_v29  ;;  %v6167_v39 = vpop.permute.xlu1 %3684  ;;  %v6169_v43 = vpop.permute.xlu0 %3762 }
 0x232   :  { %5582 = vmatprep.subr.mxu1 %v5703_v2 }
 0x235   :  { %v6171_v46 = vpop.permute.xlu1 %3840  ;;  %v6173_v51 = vpop.permute.xlu0 %3760 }
 0x239   :  { %v6175_v54 = vpop.permute.xlu1 %3838  ;;  %v6177_v59 = vpop.permute.xlu0 %3918 }
 0x23d   :  { %v6179_v63 = vpop.permute.xlu1 %3996  ;;  %v6186_v16 = vpop.permute.xlu0 %3916 }
 0x241   :  { %v6193_v21 = vpop.permute.xlu1 %3994  ;;  %v4075_v4 = vpop.permute.xlu0 %4074 }
 0x2d0   :  { %v1976_v40 = vpop.f32.mrf.mxu0 }
 0x2d1   :  { %5016 = vrot.lane.b32.xlu0 %v1976_v40, %s5716_s3 }
 0x2d2   :  { %v5491_v41 = vpop.f32.mrf.mxu0 }
 0x2d4   :  { %v2052_v44 = vpop.f32.mrf.mxu1  ;;  %v2128_v45 = vpop.f32.mrf.mxu0 }
 0x2d5   :  { %5018 = vrot.lane.b32.xlu1 %v2052_v44, %s5716_s3  ;;  %5020 = vrot.lane.b32.xlu0 %v2128_v45, %s5716_s3  ;;  %v4073_v45 = vpop.permute.xlu0 %4072 }
 0x2d6   :  { %v5496_v47 = vpop.f32.mrf.mxu1  ;;  %v5501_v48 = vpop.f32.mrf.mxu0 }
 0x2d8   :  { %v2204_v49 = vpop.f32.mrf.mxu1  ;;  %v2280_v50 = vpop.f32.mrf.mxu0 }
 0x2d9   :  { %5022 = vrot.lane.b32.xlu1 %v2204_v49, %s5716_s3  ;;  %5024 = vrot.lane.b32.xlu0 %v2280_v50, %s5716_s3 }
 0x2da   :  { %v5506_v52 = vpop.f32.mrf.mxu1  ;;  %v5511_v53 = vpop.f32.mrf.mxu0 }
 0x2dc   :  { %v2356_v55 = vpop.f32.mrf.mxu1  ;;  %v2432_v56 = vpop.f32.mrf.mxu0 }
 0x2dd   :  { %5026 = vrot.lane.b32.xlu1 %v2356_v55, %s5716_s3  ;;  %5028 = vrot.lane.b32.xlu0 %v2432_v56, %s5716_s3 }
 0x2de   :  { %v5516_v57 = vpop.f32.mrf.mxu1  ;;  %v5521_v58 = vpop.f32.mrf.mxu0 }
 0x2e0   :  { %v2508_v60 = vpop.f32.mrf.mxu1  ;;  %v2586_v61 = vpop.f32.mrf.mxu0 }
 0x2e1   :  { %v3136_v62 = vmul.f32 0.125, %v2586_v61  ;;  %5030 = vrot.lane.b32.xlu1 %v2508_v60, %s5716_s3 }
 0x2e2   :  { %v5526_v9 = vpop.f32.mrf.mxu1  ;;  %v5531_v10 = vpop.f32.mrf.mxu0 }
 0x2e3   :  { %v3144_v11 = vsel %vm5893_vm2, %v3136_v62, 0.0 }
 0x2e4   :  { %v2664_v12 = vpop.f32.mrf.mxu1  ;;  %v2742_v13 = vpop.f32.mrf.mxu0  ;;  %5570 = vmatmul.mubr.msk.f32.vlgmr.msra.gmra.mxu0 %vm24_vm1, %v3144_v11 }
 0x2e5   :  { %v3137_v14 = vmul.f32 0.125, %v2664_v12  ;;  %v3138_v15 = vmul.f32 0.125, %v2742_v13  ;;  %5578 = vmatpush3.msra.mxu0 %v3305_v8  ;;  %5579 = vmatprep.mubr.msk.f32.mxu0 %vm5704_vm0, %v5703_v2 }
 0x2e6   :  { %v5536_v17 = vpop.f32.mrf.mxu1  ;;  %v5541_v18 = vpop.f32.mrf.mxu0  ;;  %5587 = vmatprep.subr.mxu0 %v5703_v2 }
 0x2e7   :  { %v3145_v19 = vsel %vm5893_vm2, %v3137_v14, 0.0  ;;  %v3146_v20 = vsel %vm5893_vm2, %v3138_v15, 0.0 }
 0x2e8   :  { %v2820_v22 = vpop.f32.mrf.mxu1  ;;  %v2898_v23 = vpop.f32.mrf.mxu0  ;;  %5575 = vmatmul.mubr.msk.f32.vlgmr.msra.gmra.mxu1 %vm24_vm1, %v3145_v19  ;;  %5580 = vmatmul.mubr.msk.f32.vlgmr.msra.gmra.mxu0 %vm24_vm1, %v3146_v20 }
 0x2e9   :  { %v3139_v24 = vmul.f32 0.125, %v2820_v22  ;;  %v3140_v25 = vmul.f32 0.125, %v2898_v23  ;;  %5583 = vmatpush3.msra.mxu1 %v3381_v32  ;;  %5588 = vmatpush3.msra.mxu0 %v3457_v34  ;;  %v4153_v32 = vpop.permute.xlu1 %4152 }
 0x2ea   :  { %v5546_v26 = vpop.f32.mrf.mxu1  ;;  %v5551_v27 = vpop.f32.mrf.mxu0  ;;  %5584 = vmatprep.mubr.msk.f32.mxu1 %vm5704_vm0, %v5703_v2  ;;  %5589 = vmatprep.mubr.msk.f32.mxu0 %vm5704_vm0, %v5703_v2 }
 0x2eb   :  { %v3147_v0 = vsel %vm5893_vm2, %v3139_v24, 0.0  ;;  %v3148_v1 = vsel %vm5893_vm2, %v3140_v25, 0.0  ;;  %5592 = vmatprep.subr.mxu1 %v5703_v2  ;;  %5597 = vmatprep.subr.mxu0 %v5703_v2 }
 0x2ec   :  { %v2976_v28 = vpop.f32.mrf.mxu1  ;;  %v3054_v7 = vpop.f32.mrf.mxu0  ;;  %5585 = vmatmul.mubr.msk.f32.vlgmr.msra.gmra.mxu1 %vm24_vm1, %v3147_v0  ;;  %5590 = vmatmul.mubr.msk.f32.vlgmr.msra.gmra.mxu0 %vm24_vm1, %v3148_v1 }
 0x2ed   :  { %v3141_v29 = vmul.f32 0.125, %v2976_v28  ;;  %v3142_v8 = vmul.f32 0.125, %v3054_v7  ;;  %5593 = vmatpush3.msra.mxu1 %v6163_v35  ;;  %5598 = vmatpush3.msra.mxu0 %v6165_v38 }
 0x2ee   :  { %v5556_v34 = vpop.f32.mrf.mxu1  ;;  %5594 = vmatprep.mubr.msk.f32.mxu1 %vm5704_vm0, %v5703_v2  ;;  %5599 = vmatprep.mubr.msk.f32.mxu0 %vm5704_vm0, %v5703_v2  ;;  %v5561_v40 = vpop.f32.mrf.mxu0 }
 0x2ef   :  { %v3149_v41 = vsel %vm5893_vm2, %v3141_v29, 0.0  ;;  %v3150_v44 = vsel %vm5893_vm2, %v3142_v8, 0.0  ;;  %5602 = vmatprep.subr.mxu1 %v5703_v2  ;;  %5607 = vmatprep.subr.mxu0 %v5703_v2 }
 0x2f0   :  { %v3132_v35 = vpop.f32.mrf.mxu1  ;;  %5595 = vmatmul.mubr.msk.f32.vlgmr.msra.gmra.mxu1 %vm24_vm1, %v3149_v41  ;;  %5600 = vmatmul.mubr.msk.f32.vlgmr.msra.gmra.mxu0 %vm24_vm1, %v3150_v44 }
 0x2f1   :  { %v3143_v38 = vmul.f32 0.125, %v3132_v35  ;;  %5603 = vmatpush3.msra.mxu1 %v6167_v39  ;;  %5608 = vmatpush3.xpose.msk.msra.mxu0 %vm24_vm1, %v6169_v43  ;;  %v4151_v39 = vpop.permute.xlu1 %4150  ;;  %v4231_v43 = vpop.permute.xlu0 %4230 }
 0x2f2   :  { %v5566_v47 = vpop.f32.mrf.mxu1  ;;  %5604 = vmatprep.mubr.msk.f32.mxu1 %vm5704_vm0, %v5703_v2  ;;  %5609 = vmatprep.mubr.msk.f32.mxu0 %vm5704_vm0, %v5703_v2 }
 0x2f3   :  { %v3151_v48 = vsel %vm5893_vm2, %v3143_v38, 0.0  ;;  %5612 = vmatprep.subr.mxu1 %v5703_v2  ;;  %5617 = vmatprep.subr.mxu0 %v5703_v2 }
 0x2f4   :  { %5605 = vmatmul.mubr.msk.f32.vlgmr.msra.gmra.mxu1 %vm24_vm1, %v3151_v48  ;;  %5610 = vmatmul.mubr.msk.f32.vlgmr.msra.gmra.mxu0 %vm24_vm1, %v6173_v51 }
 0x2f5   :  { %5613 = vmatpush3.xpose.msk.msra.mxu1 %vm24_vm1, %v6171_v46  ;;  %5618 = vmatpush3.xpose.msk.msra.mxu0 %vm24_vm1, %v6177_v59  ;;  %v4309_v46 = vpop.permute.xlu1 %4308  ;;  %v4229_v49 = vpop.permute.xlu0 %4228 }
 0x2f6   :  { %5614 = vmatprep.mubr.msk.f32.mxu1 %vm5704_vm0, %v5703_v2  ;;  %5619 = vmatprep.mubr.msk.f32.mxu0 %vm5704_vm0, %v5703_v2 }
 0x2f7   :  { %5622 = vmatprep.subr.mxu1 %v5703_v2  ;;  %5627 = vmatprep.subr.mxu0 %v5703_v2 }
 0x2f8   :  { %5615 = vmatmul.mubr.msk.f32.vlgmr.msra.gmra.mxu1 %vm24_vm1, %v6175_v54  ;;  %5620 = vmatmul.mubr.msk.f32.vlgmr.msra.gmra.mxu0 %vm24_vm1, %v6186_v16 }
 0x2f9   :  { %5623 = vmatpush3.xpose.msk.msra.mxu1 %vm24_vm1, %v6179_v63  ;;  %5628 = vmatpush3.xpose.msk.msra.mxu0 %vm24_vm1, %v4075_v4  ;;  %v4307_v50 = vpop.permute.xlu1 %4306  ;;  %v4401_v51 = vpop.permute.xlu0 %4400 }
 0x2fa   :  { %5624 = vmatprep.mubr.msk.f32.mxu1 %vm5704_vm0, %v5703_v2  ;;  %5629 = vmatprep.mubr.msk.f32.mxu0 %vm5704_vm0, %v5703_v2 }
 0x2fb   :  { %5632 = vmatprep.subr.mxu1 %v5703_v2  ;;  %5637 = vmatprep.subr.mxu0 %v5703_v2 }
 0x2fc   :  { %5625 = vmatmul.mubr.msk.f32.vlgmr.msra.gmra.mxu1 %vm24_vm1, %v6193_v21  ;;  %5630 = vmatmul.mubr.msk.f32.vlgmr.msra.gmra.mxu0 %vm24_vm1, %v4073_v45 }
 0x2fd   :  { %5633 = vmatpush3.xpose.msk.msra.mxu1 %vm24_vm1, %v4153_v32  ;;  %5638 = vmatpush3.xpose.msk.msra.mxu0 %vm24_vm1, %v4231_v43  ;;  %v4477_v52 = vpop.permute.xlu1 %4476  ;;  %v4553_v14 = vpop.permute.xlu0 %4552 }
 0x2fe   :  { %5634 = vmatprep.mubr.msk.f32.mxu1 %vm5704_vm0, %v5703_v2  ;;  %5639 = vmatprep.mubr.msk.f32.mxu0 %vm5704_vm0, %v5703_v2 }
 0x2ff   :  { %5642 = vmatprep.subr.mxu1 %v5703_v2  ;;  %5647 = vmatprep.subr.mxu0 %v5703_v2 }
 0x300   :  { %5635 = vmatmul.mubr.msk.f32.vlgmr.msra.gmra.mxu1 %vm24_vm1, %v4151_v39  ;;  %5640 = vmatmul.mubr.msk.f32.vlgmr.msra.gmra.mxu0 %vm24_vm1, %v4229_v49 }
 0x301   :  { %5643 = vmatpush3.xpose.msk.msra.mxu1 %vm24_vm1, %v4309_v46  ;;  %5644 = vmatprep.mubr.msk.f32.mxu1 %vm5704_vm0, %v5703_v2  ;;  %v4629_v18 = vpop.permute.xlu1 %4628  ;;  %v4705_v26 = vpop.permute.xlu0 %4704 }
 0x302   :  { %5648 = vmatpush3.msra.mxu0 %v4401_v51  ;;  %5649 = vmatprep.mubr.msk.f32.mxu0 %vm5704_vm0, %v5703_v2 }
 0x303   :  { %5652 = vmatprep.subr.mxu1 %v5703_v2  ;;  %5657 = vmatprep.subr.mxu0 %v5703_v2 }
 0x304   :  { %5645 = vmatmul.mubr.msk.f32.vlgmr.msra.gmra.mxu1 %vm24_vm1, %v4307_v50 }
 0x305   :  { %5653 = vmatpush3.msra.mxu1 %v4477_v52  ;;  %5654 = vmatprep.mubr.msk.f32.mxu1 %vm5704_vm0, %v5703_v2  ;;  %v4781_v28 = vpop.permute.xlu1 %4780  ;;  %v4857_v35 = vpop.permute.xlu0 %4856 }
 0x306   :  { %5662 = vmatprep.subr.mxu1 %v5703_v2 }
 0x309   :  { %v4933_v46 = vpop.permute.xlu1 %4932 }
 0x3a4   :  { %v3224_v53 = vpop.f32.mrf.mxu0 }
 0x3a5   :  { %5048 = vrot.lane.b32.xlu0 %v3224_v53, %s5717_s4 }
 0x3a6   :  { %v5571_v54 = vpop.f32.mrf.mxu0 }
 0x3a8   :  { %v3300_v55 = vpop.f32.mrf.mxu1  ;;  %v3376_v56 = vpop.f32.mrf.mxu0 }
 0x3a9   :  { %5050 = vrot.lane.b32.xlu1 %v3300_v55, %s5717_s4  ;;  %5052 = vrot.lane.b32.xlu0 %v3376_v56, %s5717_s4 }
 0x3aa   :  { %v5576_v57 = vpop.f32.mrf.mxu1  ;;  %v5581_v58 = vpop.f32.mrf.mxu0 }
 0x3ac   :  { %v3452_v59 = vpop.f32.mrf.mxu1  ;;  %v3528_v60 = vpop.f32.mrf.mxu0 }
 0x3ad   :  { %5054 = vrot.lane.b32.xlu1 %v3452_v59, %s5717_s4  ;;  %5056 = vrot.lane.b32.xlu0 %v3528_v60, %s5717_s4 }
 0x3ae   :  { %v5586_v61 = vpop.f32.mrf.mxu1  ;;  %v5591_v62 = vpop.f32.mrf.mxu0 }
 0x3b0   :  { %v3604_v63 = vpop.f32.mrf.mxu1  ;;  %v3680_v9 = vpop.f32.mrf.mxu0 }
 0x3b1   :  { %5058 = vrot.lane.b32.xlu1 %v3604_v63, %s5717_s4  ;;  %5060 = vrot.lane.b32.xlu0 %v3680_v9, %s5717_s4 }
 0x3b2   :  { %v5596_v10 = vpop.f32.mrf.mxu1  ;;  %v5601_v11 = vpop.f32.mrf.mxu0 }
 0x3b4   :  { %v3756_v12 = vpop.f32.mrf.mxu1  ;;  %v3834_v13 = vpop.f32.mrf.mxu0 }
 0x3b5   :  { %v4384_v15 = vmul.f32 0.125, %v3834_v13  ;;  %5062 = vrot.lane.b32.xlu1 %v3756_v12, %s5717_s4  ;;  %v5017_v12 = vpop.permute.xlu0 %5016  ;;  %v5019_v13 = vpop.permute.xlu1 %5018 }
 0x3b6   :  { %v5606_v16 = vpop.f32.mrf.mxu1  ;;  %v5611_v17 = vpop.f32.mrf.mxu0 }
 0x3b7   :  { %v4392_v19 = vsel %vm5893_vm2, %v4384_v15, 0.0 }
 0x3b8   :  { %v3912_v20 = vpop.f32.mrf.mxu1  ;;  %v3990_v21 = vpop.f32.mrf.mxu0  ;;  %5650 = vmatmul.mubr.msk.f32.vlgmr.msra.gmra.mxu0 %vm24_vm1, %v4392_v19 }
 0x3b9   :  { %v4385_v22 = vmul.f32 0.125, %v3912_v20  ;;  %v4386_v23 = vmul.f32 0.125, %v3990_v21  ;;  %5658 = vmatpush3.msra.mxu0 %v4553_v14  ;;  %5659 = vmatprep.mubr.msk.f32.mxu0 %vm5704_vm0, %v5703_v2  ;;  %v5021_v14 = vpop.permute.xlu0 %5020  ;;  %v5023_v15 = vpop.permute.xlu1 %5022 }
 0x3ba   :  { %v5616_v24 = vpop.f32.mrf.mxu1  ;;  %v5621_v25 = vpop.f32.mrf.mxu0  ;;  %5667 = vmatprep.subr.mxu0 %v5703_v2 }
 0x3bb   :  { %v4393_v27 = vsel %vm5893_vm2, %v4385_v22, 0.0  ;;  %v4394_v0 = vsel %vm5893_vm2, %v4386_v23, 0.0 }
 0x3bc   :  { %v4068_v1 = vpop.f32.mrf.mxu1  ;;  %v4146_v4 = vpop.f32.mrf.mxu0  ;;  %5655 = vmatmul.mubr.msk.f32.vlgmr.msra.gmra.mxu1 %vm24_vm1, %v4393_v27  ;;  %5660 = vmatmul.mubr.msk.f32.vlgmr.msra.gmra.mxu0 %vm24_vm1, %v4394_v0  ;;  %v5104_v27 = vsel %vm24_vm1, %v6033_v3, %v5017_v12 }
 0x3bd   :  { %v4387_v7 = vmul.f32 0.125, %v4068_v1  ;;  %v4388_v29 = vmul.f32 0.125, %v4146_v4  ;;  %5663 = vmatpush3.msra.mxu1 %v4629_v18  ;;  %5664 = vmatprep.mubr.msk.f32.mxu1 %vm5704_vm0, %v5703_v2  ;;  %v5025_v16 = vpop.permute.xlu0 %5024  ;;  %v5027_v17 = vpop.permute.xlu1 %5026 }
 0x3be   :  { %v5626_v8 = vpop.f32.mrf.mxu1  ;;  %v5631_v32 = vpop.f32.mrf.mxu0  ;;  %5668 = vmatpush3.msra.mxu0 %v4705_v26  ;;  %5669 = vmatprep.mubr.msk.f32.mxu0 %vm5704_vm0, %v5703_v2 }
 0x3bf   :  { %v4395_v34 = vsel %vm5893_vm2, %v4387_v7, 0.0  ;;  %v4396_v40 = vsel %vm5893_vm2, %v4388_v29, 0.0  ;;  %5672 = vmatprep.subr.mxu1 %v5703_v2  ;;  %5677 = vmatprep.subr.mxu0 %v5703_v2  ;;  %v5105_v7 = vsel %vm24_vm1, %v6039_v5, %v5019_v13  ;;  %v5106_v29 = vsel %vm24_vm1, %v6041_v6, %v5021_v14 }
 0x3c0   :  { %v4224_v41 = vpop.f32.mrf.mxu1  ;;  %v4302_v44 = vpop.f32.mrf.mxu0  ;;  %5665 = vmatmul.mubr.msk.f32.vlgmr.msra.gmra.mxu1 %vm24_vm1, %v4395_v34  ;;  %5670 = vmatmul.mubr.msk.f32.vlgmr.msra.gmra.mxu0 %vm24_vm1, %v4396_v40  ;;  %v5107_v5 = vsel %vm24_vm1, %v6045_v30, %v5023_v15  ;;  %v5108_v6 = vsel %vm24_vm1, %v6047_v31, %v5025_v16  ;;  %v5109_v30 = vsel %vm24_vm1, %v6051_v36, %v5027_v17 }
 0x3c1   :  { %v4389_v38 = vmul.f32 0.125, %v4224_v41  ;;  %v4390_v45 = vmul.f32 0.125, %v4302_v44  ;;  %5673 = vmatpush3.msra.mxu1 %v4781_v28  ;;  %5674 = vmatprep.mubr.msk.f32.mxu1 %vm5704_vm0, %v5703_v2  ;;  %v5029_v18 = vpop.permute.xlu0 %5028  ;;  %v5031_v19 = vpop.permute.xlu1 %5030 }
 0x3c2   :  { %v5636_v47 = vpop.f32.mrf.mxu1  ;;  %5678 = vmatpush3.msra.mxu0 %v4857_v35  ;;  %5679 = vmatprep.mubr.msk.f32.mxu0 %vm5704_vm0, %v5703_v2  ;;  %v5641_v48 = vpop.f32.mrf.mxu0  ;;  %v5110_v31 = vsel %vm24_vm1, %v6053_v37, %v5029_v18  ;;  %v5111_v36 = vsel %vm24_vm1, %v6059_v42, %v5031_v19 }
 0x3c3   :  { %v4397_v39 = vsel %vm5893_vm2, %v4389_v38, 0.0  ;;  %v4398_v43 = vsel %vm5893_vm2, %v4390_v45, 0.0  ;;  %5682 = vmatprep.subr.mxu1 %v5703_v2 }
 0x3c4   :  { %v4380_v49 = vpop.f32.mrf.mxu1  ;;  %5675 = vmatmul.mubr.msk.f32.vlgmr.msra.gmra.mxu1 %vm24_vm1, %v4397_v39  ;;  %5680 = vmatmul.mubr.msk.f32.vlgmr.msra.gmra.mxu0 %vm24_vm1, %v4398_v43 }
 0x3c5   :  { %v4391_v50 = vmul.f32 0.125, %v4380_v49  ;;  %5683 = vmatpush3.msra.mxu1 %v4933_v46  ;;  %5684 = vmatprep.mubr.msk.f32.mxu1 %vm5704_vm0, %v5703_v2 }
 0x3c6   :  { %v5646_v51 = vpop.f32.mrf.mxu1 }
 0x3c7   :  { %v4399_v52 = vsel %vm5893_vm2, %v4391_v50, 0.0 }
 0x3c8   :  { %5685 = vmatmul.mubr.msk.f32.vlgmr.msra.gmra.mxu1 %vm24_vm1, %v4399_v52 }
 0x417   :  { %v5049_v20 = vpop.permute.xlu0 %5048 }
 0x418   :  { %v5113_v0 = vsel %vm5112_vm3, %v5104_v27, %v5049_v20 }
 0x41b   :  { %v5051_v21 = vpop.permute.xlu1 %5050  ;;  %v5053_v22 = vpop.permute.xlu0 %5052 }
 0x41c   :  { %v5114_v3 = vsel %vm5112_vm3, %v5105_v7, %v5051_v21  ;;  %v5115_v8 = vsel %vm5112_vm3, %v5106_v29, %v5053_v22 }
 0x41f   :  { %v5055_v23 = vpop.permute.xlu1 %5054  ;;  %v5057_v24 = vpop.permute.xlu0 %5056 }
 0x420   :  { %v5116_v44 = vsel %vm5112_vm3, %v5107_v5, %v5055_v23  ;;  %v5117_v35 = vsel %vm5112_vm3, %v5108_v6, %v5057_v24 }
 0x423   :  { %v5059_v25 = vpop.permute.xlu1 %5058  ;;  %v5061_v26 = vpop.permute.xlu0 %5060 }
 0x424   :  { %v5118_v39 = vsel %vm5112_vm3, %v5109_v30, %v5059_v25  ;;  %v5119_v43 = vsel %vm5112_vm3, %v5110_v31, %v5061_v26 }
 0x427   :  { %v5063_v1 = vpop.permute.xlu1 %5062 }
 0x428   :  { %v5120_v37 = vsel %vm5112_vm3, %v5111_v36, %v5063_v1 }
 0x478   :  { %v4472_v53 = vpop.f32.mrf.mxu0 }
 0x479   :  { %5080 = vrot.lane.b32.xlu0 %v4472_v53, %s5718_s5 }
 0x47a   :  { %v5651_v54 = vpop.f32.mrf.mxu0 }
 0x47c   :  { %v4548_v55 = vpop.f32.mrf.mxu1  ;;  %v4624_v56 = vpop.f32.mrf.mxu0 }
 0x47d   :  { %5082 = vrot.lane.b32.xlu1 %v4548_v55, %s5718_s5  ;;  %5084 = vrot.lane.b32.xlu0 %v4624_v56, %s5718_s5 }
 0x47e   :  { %v5656_v57 = vpop.f32.mrf.mxu1  ;;  %v5661_v58 = vpop.f32.mrf.mxu0 }
 0x480   :  { %v4700_v59 = vpop.f32.mrf.mxu1  ;;  %v4776_v60 = vpop.f32.mrf.mxu0 }
 0x481   :  { %5086 = vrot.lane.b32.xlu1 %v4700_v59, %s5718_s5  ;;  %5088 = vrot.lane.b32.xlu0 %v4776_v60, %s5718_s5 }
 0x482   :  { %v5666_v2 = vpop.f32.mrf.mxu1  ;;  %v5671_v61 = vpop.f32.mrf.mxu0 }
 0x484   :  { %v4852_v33 = vpop.f32.mrf.mxu1  ;;  %v4928_v62 = vpop.f32.mrf.mxu0 }
 0x485   :  { %5090 = vrot.lane.b32.xlu1 %v4852_v33, %s5718_s5  ;;  %5092 = vrot.lane.b32.xlu0 %v4928_v62, %s5718_s5 }
 0x486   :  { %v5676_v63 = vpop.f32.mrf.mxu1  ;;  %v5681_v9 = vpop.f32.mrf.mxu0 }
 0x488   :  { %v5004_v10 = vpop.f32.mrf.mxu1 }
 0x489   :  { %5094 = vrot.lane.b32.xlu1 %v5004_v10, %s5718_s5 }
 0x48a   :  { %v5686_v11 = vpop.f32.mrf.mxu1 }
 0x4eb   :  { %v5081_v4 = vpop.permute.xlu0 %5080 }
 0x4ec   :  { %v5122_v28 = vsel %vm5121_vm4, %v5113_v0, %v5081_v4 }
 0x4ed   :  { %5131 = vst.msk [vmem:[%s6389_s1] sm:$0xff] %vm5130_vm5, %v5122_v28 }
 0x4ef   :  { %v5083_v32 = vpop.permute.xlu1 %5082  ;;  %v5085_v34 = vpop.permute.xlu0 %5084 }
 0x4f0   :  { %v5123_v40 = vsel %vm5121_vm4, %v5114_v3, %v5083_v32  ;;  %v5124_v41 = vsel %vm5121_vm4, %v5115_v8, %v5085_v34 }
 0x4f1   :  { %5132 = vst.msk [vmem:[%s6389_s1 + $0x8] sm:$0xff] %vm5130_vm5, %v5123_v40  ;;  %5133 = vst.msk [vmem:[%s6389_s1 + $0x10] sm:$0xff] %vm5130_vm5, %v5124_v41 }
 0x4f3   :  { %v5087_v38 = vpop.permute.xlu1 %5086  ;;  %v5089_v45 = vpop.permute.xlu0 %5088 }
 0x4f4   :  { %v5125_v47 = vsel %vm5121_vm4, %v5116_v44, %v5087_v38  ;;  %v5126_v48 = vsel %vm5121_vm4, %v5117_v35, %v5089_v45 }
 0x4f5   :  { %5134 = vst.msk [vmem:[%s6389_s1 + $0x18] sm:$0xff] %vm5130_vm5, %v5125_v47  ;;  %5135 = vst.msk [vmem:[%s6389_s1 + $0x20] sm:$0xff] %vm5130_vm5, %v5126_v48 }
 0x4f7   :  { %v5091_v46 = vpop.permute.xlu1 %5090  ;;  %v5093_v49 = vpop.permute.xlu0 %5092 }
 0x4f8   :  { %v5127_v50 = vsel %vm5121_vm4, %v5118_v39, %v5091_v46  ;;  %v5128_v51 = vsel %vm5121_vm4, %v5119_v43, %v5093_v49 }
 0x4f9   :  { %5136 = vst.msk [vmem:[%s6389_s1 + $0x28] sm:$0xff] %vm5130_vm5, %v5127_v50  ;;  %5137 = vst.msk [vmem:[%s6389_s1 + $0x30] sm:$0xff] %vm5130_vm5, %v5128_v51 }
 0x4fb   :  { %v5095_v52 = vpop.permute.xlu1 %5094 }
 0x4fc   :  { %v5129_v53 = vsel %vm5121_vm4, %v5120_v37, %v5095_v52 }
 0x4fd   :  { %5138 = vst.msk [vmem:[%s6389_s1 + $0x38] sm:$0xff] %vm5130_vm5, %v5129_v53 }

</bundles_post_ra>
